<compile_context>
chip_gen: v7x
topology: tpu7x:2x2x1
jax: 0.10.0
libtpu: 0.0.40
codegen_flags: <defaults>
</compile_context>

<pallas_src>
import jax
import jax.numpy as jnp
import numpy as np
from jax.experimental import pallas as pl
from jax.experimental.pallas import tpu as pltpu

# Scaled-down hyperparameters for a small, fast synthetic test
# (original module: DIM=64, NLAT=128).
DIM = 8
NLAT = 16
NUM_CHANNELS = 3
LEAK = 0.2
BN_EPS = 1e-5

TILE_M_MAX = 512     # lane tile of the (Cout, M) output (~85% of HBM roofline)
TILE_K_MAX = 256     # reduction tile; small enough for v5e/v7x VMEM at DIM=64
                     # (v6e can use 512-1024; tune per chip)
# MXU input dtype.  jnp.bfloat16 gives ~2x MXU throughput and halves patch HBM
# traffic on v6e/v7x, but the end-to-end tolerance must be re-verified (review
# correctness note), so f32 is the default for this self-checking script.
MXU_DTYPE = jnp.float32


def _ru(x, m):
    return (x + m - 1) // m * m


# ----------------------------------------------------------------------------
# Pallas kernels
# ----------------------------------------------------------------------------
def _dense_kernel(x_ref, w_ref, o_ref):
    """Layer 1: (N, NLAT) @ (NLAT, Cout*4*4); lane-dense output (Cout*16 cols)."""
    o_ref[...] = jnp.dot(x_ref[...], w_ref[...],
                         preferred_element_type=jnp.float32)


def _convt_bn_stats_kernel(p_ref, w_ref, sc_ref, sh_ref, o_ref, st_ref, acc_ref):
    """One (group, M-tile, K-tile) step of a sub-pixel ConvTranspose layer.

    The previous layer's BatchNorm (folded scale/shift) + LeakyReLU is applied to
    the raw patch block, then accumulated via the MXU.  At the last K step the raw
    (pre-BN) output tile is stored lane-dense and per-tile partial sum /
    sum-of-squares (this layer's BN statistics) are emitted.
    """
    k = pl.program_id(2)

    @pl.when(k == 0)
    def _init():
        acc_ref[...] = jnp.zeros_like(acc_ref)

    a = p_ref[...].astype(jnp.float32) * sc_ref[...] + sh_ref[...]
    a = jnp.where(a > 0, a, LEAK * a)                    # LeakyReLU(0.2)
    acc_ref[...] += jnp.dot(w_ref[...], a.astype(w_ref.dtype),
                            preferred_element_type=jnp.float32)

    @pl.when(k == pl.num_programs(2) - 1)
    def _finalize():
        acc = acc_ref[...]
        o_ref[...] = acc
        s1 = jnp.sum(acc, axis=1, keepdims=True)         # (Cout_p, 1)
        s2 = jnp.sum(acc * acc, axis=1, keepdims=True)
        lane = jax.lax.broadcasted_iota(jnp.int32, (acc.shape[0], 128), 1)
        # lane 0 <- sum, lane 1 <- sum of squares, rest 0 (tiny partials array)
        st_ref[...] = (jnp.where(lane == 0, s1, 0.0) +
                       jnp.where(lane == 1, s2, 0.0))


def _convt_tanh_kernel(p_ref, w_ref, sc_ref, sh_ref, o_ref, acc_ref):
    """Final layer: fused (prev BN + LeakyReLU) -> matmul -> tanh."""
    k = pl.program_id(2)

    @pl.when(k == 0)
    def _init():
        acc_ref[...] = jnp.zeros_like(acc_ref)

    a = p_ref[...].astype(jnp.float32) * sc_ref[...] + sh_ref[...]
    a = jnp.where(a > 0, a, LEAK * a)
    acc_ref[...] += jnp.dot(w_ref[...], a.astype(w_ref.dtype),
                            preferred_element_type=jnp.float32)

    @pl.when(k == pl.num_programs(2) - 1)
    def _finalize():
        o_ref[...] = jnp.tanh(acc_ref[...])


# ----------------------------------------------------------------------------
# Pallas wrappers
# ----------------------------------------------------------------------------
def _dense_matmul(x2d, wm):
    n = x2d.shape[0]
    cols = wm.shape[1]
    return pl.pallas_call(
        _dense_kernel,
        out_shape=jax.ShapeDtypeStruct((n, cols), jnp.float32),
    )(x2d, wm)


def _convt_fused(Pt, Wt, scale_k, shift_k, *, tile_m, tile_k, last):
    g_dim, k_dim, m_pad = Pt.shape
    cout_p = Wt.shape[1]
    nt = m_pad // tile_m
    nk = k_dim // tile_k
    grid = (g_dim, nt, nk)

    in_specs = [
        pl.BlockSpec((None, tile_k, tile_m), lambda g, i, k: (g, k, i)),
        pl.BlockSpec((None, cout_p, tile_k), lambda g, i, k: (g, 0, k)),
        pl.BlockSpec((tile_k, 1), lambda g, i, k: (k, 0)),
        pl.BlockSpec((tile_k, 1), lambda g, i, k: (k, 0)),
    ]
    y_spec = pl.BlockSpec((None, cout_p, tile_m), lambda g, i, k: (g, 0, i))
    cparams = pltpu.CompilerParams(
        dimension_semantics=("parallel", "parallel", "arbitrary"),
        vmem_limit_bytes=32 * 1024 * 1024)
    scratch = [pltpu.VMEM((cout_p, tile_m), jnp.float32)]

    if last:
        return pl.pallas_call(
            _convt_tanh_kernel,
            out_shape=jax.ShapeDtypeStruct((g_dim, cout_p, m_pad), jnp.float32),
            grid=grid, in_specs=in_specs, out_specs=y_spec,
            scratch_shapes=scratch, compiler_params=cparams,
        )(Pt, Wt, scale_k, shift_k)

    return pl.pallas_call(
        _convt_bn_stats_kernel,
        out_shape=(jax.ShapeDtypeStruct((g_dim, cout_p, m_pad), jnp.float32),
                   jax.ShapeDtypeStruct((g_dim, nt, cout_p, 128), jnp.float32)),
        grid=grid, in_specs=in_specs,
        out_specs=(y_spec,
                   pl.BlockSpec((None, None, cout_p, 128),
                                lambda g, i, k: (g, i, 0, 0))),
        scratch_shapes=scratch, compiler_params=cparams,
    )(Pt, Wt, scale_k, shift_k)


# ----------------------------------------------------------------------------
# JAX glue: zero-skipping sub-pixel decomposition of ConvTranspose2d(4, 2, 1)
# ----------------------------------------------------------------------------
# Output row o = 2j + ph only touches kernel taps of one parity:
#   ph=0 -> kh in (3, 1) on inputs (j-1, j);  ph=1 -> kh in (2, 0) on inputs (j, j+1).
# After padding the input by 1 (xp[r] = x[r-1]) both parities become 2-tap stride-1
# convolutions whose window starts at row j + ph of xp.  Same along columns.
_TAPS = ((3, 1), (2, 0))


def _subpixel_weights(w):
    """w: (Cin, Cout, 4, 4) -> (4, Cout, Cin*4) transposed per-parity-group weights."""
    cin, cout = w.shape[0], w.shape[1]
    groups = []
    for ph in range(2):
        for pw in range(2):
            wg = w[:, :, _TAPS[ph], :][:, :, :, _TAPS[pw]]     # (Cin, Cout, 2, 2)
            groups.append(wg.transpose(1, 0, 2, 3).reshape(cout, cin * 4))
    return jnp.stack(groups, axis=0)


def _subpixel_patches(xp_c):
    """xp_c: (C, N, H+2, W+2) -> (4, C*4, N*H*W) transposed per-group patches."""
    c, n, hp, wp = xp_c.shape
    h, w = hp - 2, wp - 2
    groups = []
    for ph in range(2):
        for pw in range(2):
            taps = [xp_c[:, :, ph + a: ph + a + h, pw + b: pw + b + w]
                    for a in range(2) for b in range(2)]        # 4 x (C, N, H, W)
            pg = jnp.stack(taps, axis=1)                        # (C, 4, N, H, W)
            groups.append(pg.reshape(c * 4, n * h * w))         # K = c*4 + a*2 + b
    return jnp.stack(groups, axis=0)


def convt_layer(act_c, scale, shift, weight, last):
    """Stride-2 ConvTranspose on the RAW previous activation act_c ((C, N, H, W),
    channels-first).  The previous layer's BN+LeakyReLU (scale/shift) is fused into
    the Pallas kernel.  Returns the raw (pre-BN) output as (Cout, N, 2H, 2W) plus
    per-channel (sum, sumsq) partial reductions (None for the final tanh layer)."""
    c, n, h, w_sp = act_c.shape
    cout = weight.shape[1]
    m = n * h * w_sp
    k_dim = 4 * c

    # Spatial halo: pad with v = -shift/scale so the fused affine+LeakyReLU maps the
    # halo to exactly 0 (matches ConvTranspose's implicit zero boundary post-BN).
    v = -shift / scale
    v4 = v.reshape(-1, 1, 1, 1)
    xp_c = jnp.pad(act_c - v4, ((0, 0), (0, 0), (1, 1), (1, 1))) + v4

    Pt = _subpixel_patches(xp_c)                                # (4, K, M)
    Wt = _subpixel_weights(weight)                              # (4, Cout, K)
    scale_k = jnp.repeat(scale, 4).reshape(-1, 1)               # (K, 1)
    shift_k = jnp.repeat(shift, 4).reshape(-1, 1)

    tile_m = min(TILE_M_MAX, _ru(m, 128))
    tile_k = min(TILE_K_MAX, k_dim)
    m_pad = _ru(m, tile_m)
    cout_p = _ru(cout, 8)

    if m_pad > m:   # pad M with the per-row BN-zero value so stats stay exact
        v_k = (-shift_k / scale_k)[None]                        # (1, K, 1)
        Pt = jnp.pad(Pt - v_k, ((0, 0), (0, 0), (0, m_pad - m))) + v_k
    if cout_p > cout:
        Wt = jnp.pad(Wt, ((0, 0), (0, cout_p - cout), (0, 0)))

    Pt = Pt.astype(MXU_DTYPE)
    Wt = Wt.astype(MXU_DTYPE)

    if last:
        y = _convt_fused(Pt, Wt, scale_k, shift_k,
                         tile_m=tile_m, tile_k=tile_k, last=True)
        stats = None
    else:
        y, st = _convt_fused(Pt, Wt, scale_k, shift_k,
                             tile_m=tile_m, tile_k=tile_k, last=False)
        stats = (jnp.sum(st[:, :, :cout, 0], axis=(0, 1)),
                 jnp.sum(st[:, :, :cout, 1], axis=(0, 1)))

    # Interleave the 4 parity groups back into (Cout, N, 2H, 2W).
    y = y[:, :cout, :m].reshape(2, 2, cout, n, h, w_sp)
    y = y.transpose(2, 3, 4, 0, 5, 1).reshape(cout, n, 2 * h, 2 * w_sp)
    return y, stats


def _bn_scale_shift(sum_, sumsq, count, gamma, beta):
    mean = sum_ / count
    # Biased variance (PyTorch BN training mode).  E[x^2]-mean^2 is the
    # cancellation-prone form; fine at these magnitudes (see review note).
    var = sumsq / count - mean * mean
    scale = gamma * jax.lax.rsqrt(var + BN_EPS)
    return scale, beta - mean * scale


def generator_forward(x, params, shift=None):
    """forward(input): ConvT->BN->LeakyReLU x5, ConvT->Tanh (+ optional shift).
    x: (N, NLAT, 1, 1) NCHW -> (N, NUM_CHANNELS, 128, 128)."""
    n = x.shape[0]
    p1 = params[0]
    cout1 = p1['w'].shape[1]

    # Layer 1: ConvT(NLAT, DIM*16, 4, 1, 0) on a 1x1 latent == dense matmul.
    x2d = x.reshape(n, NLAT)
    wm1 = p1['w'].reshape(NLAT, cout1 * 16)        # cols ordered (cout, kh, kw)
    o1 = _dense_matmul(x2d, wm1)                   # (N, Cout1*16), raw (pre-BN)
    o1r = o1.reshape(n, cout1, 16)
    bn_scale, bn_shift = _bn_scale_shift(jnp.sum(o1r, axis=(0, 2)),
                                         jnp.sum(o1r * o1r, axis=(0, 2)),
                                         n * 16, p1['gamma'], p1['beta'])
    act_c = o1.reshape(n, cout1, 4, 4).transpose(1, 0, 2, 3)   # (C, N, 4, 4), raw

    for i, p in enumerate(params[1:]):
        last = (i == len(params) - 2)
        act_c, stats = convt_layer(act_c, bn_scale, bn_shift, p['w'], last)
        if not last:
            cnt = act_c.shape[1] * act_c.shape[2] * act_c.shape[3]   # N*Ho*Wo
            bn_scale, bn_shift = _bn_scale_shift(stats[0], stats[1], cnt,
                                                 p['gamma'], p['beta'])

    out = act_c.transpose(1, 0, 2, 3)              # (N, NUM_CHANNELS, 128, 128)
    if shift is not None:
        out = out + shift
    return out


# ----------------------------------------------------------------------------
# Parameters (deterministic synthetic init) + pure-JAX reference
# ----------------------------------------------------------------------------
def init_params(key):
    cfg = [
        (NLAT, DIM * 16, 1, 0),
        (DIM * 16, DIM * 8, 2, 1),
        (DIM * 8, DIM * 4, 2, 1),
        (DIM * 4, DIM * 2, 2, 1),
        (DIM * 2, DIM, 2, 1),
        (DIM, NUM_CHANNELS, 2, 1),
    ]
    params = []
    for (cin, cout, s, p) in cfg:
        key, kw, kg, kb = jax.random.split(key, 4)
        params.append(dict(
            w=0.05 * jax.random.normal(kw, (cin, cout, 4, 4), jnp.float32),
            gamma=1.0 + 0.1 * jax.random.normal(kg, (cout,), jnp.float32),
            beta=0.1 * jax.random.normal(kb, (cout,), jnp.float32),
            stride=s, pad=p))
    return params


def _convt_ref(x, w, stride, pad):
    k = w.shape[2]
    w_conv = jnp.flip(w, (2, 3)).transpose(1, 0, 2, 3)  # (Cout, Cin, k, k)
    return jax.lax.conv_general_dilated(
        x, w_conv, window_strides=(1, 1),
        padding=[(k - 1 - pad, k - 1 - pad)] * 2,
        lhs_dilation=(stride, stride),
        dimension_numbers=('NCHW', 'OIHW', 'NCHW'))


def ref_forward(x, params):
    h = x
    n = len(params)
    for i, p in enumerate(params):
        h = _convt_ref(h, p['w'], p['stride'], p['pad'])
        if i < n - 1:
            mean = h.mean(axis=(0, 2, 3), keepdims=True)
            var = ((h - mean) ** 2).mean(axis=(0, 2, 3), keepdims=True)
            h = (h - mean) / jnp.sqrt(var + BN_EPS)
            h = h * p['gamma'].reshape(1, -1, 1, 1) + p['beta'].reshape(1, -1, 1, 1)
            h = jnp.where(h > 0, h, LEAK * h)
        else:
            h = jnp.tanh(h)
    return h


if __name__ == "__main__":
    key = jax.random.PRNGKey(0)
    kp, kx = jax.random.split(key)
    params = init_params(kp)

    N = 2
    x = jax.random.normal(kx, (N, NLAT, 1, 1), jnp.float32)

    fwd = jax.jit(lambda latent: generator_forward(latent, params))
    out = jax.block_until_ready(fwd(x))
    assert out.shape == (N, NUM_CHANNELS, 128, 128), out.shape

    ref = jax.block_until_ready(ref_forward(x, params))
    np.testing.assert_allclose(np.asarray(out), np.asarray(ref),
                               rtol=2e-3, atol=2e-3)
    print("KERNEL_OK")
</pallas_src>

<mosaic_0001>
module attributes {stable_mosaic.version = 11 : i64} {
  func.func @_dense_kernel(%arg0: memref<2x16xf32, #tpu.memory_space<vmem>>, %arg1: memref<16x2048xf32, #tpu.memory_space<vmem>>, %arg2: memref<2x2048xf32, #tpu.memory_space<vmem>>) attributes {dimension_semantics = [], scalar_prefetch = 0 : i64, scratch_operands = 0 : i64, tpu.core_type = #tpu.core_type<tc>} {
    %c0 = arith.constant 0 : index
    %c0_0 = arith.constant 0 : index
    %0 = vector.load %arg0[%c0, %c0_0] : memref<2x16xf32, #tpu.memory_space<vmem>>, vector<2x16xf32>
    %c0_1 = arith.constant 0 : index
    %c0_2 = arith.constant 0 : index
    %1 = vector.load %arg1[%c0_1, %c0_2] : memref<16x2048xf32, #tpu.memory_space<vmem>>, vector<16x2048xf32>
    %cst = arith.constant dense<0.000000e+00> : vector<2x2048xf32>
    %2 = tpu.matmul %0, %1, %cst {dimension_numbers = #tpu.dot_dimension_numbers<[1], [0], [0], [1], [0, 0, 1, 1], [], []>} : vector<2x16xf32>, vector<16x2048xf32>, vector<2x2048xf32> -> vector<2x2048xf32>
    %c0_3 = arith.constant 0 : index
    %c0_4 = arith.constant 0 : index
    %3 = vector.load %arg2[%c0_3, %c0_4] : memref<2x2048xf32, #tpu.memory_space<vmem>>, vector<2x2048xf32>
    tpu.vector_store %arg2[%c0_3, %c0_4], %2 {strides = array<i32>} : memref<2x2048xf32, #tpu.memory_space<vmem>>, vector<2x2048xf32>,
    return
  }
}

module attributes {stable_mosaic.version = 11 : i64} {
  func.func @_convt_bn_stats_kernel(%arg0: i32, %arg1: i32, %arg2: i32, %arg3: memref<1x256x128xf32, #tpu.memory_space<vmem>>, %arg4: memref<1x64x256xf32, #tpu.memory_space<vmem>>, %arg5: memref<256x1xf32, #tpu.memory_space<vmem>>, %arg6: memref<256x1xf32, #tpu.memory_space<vmem>>, %arg7: memref<1x64x128xf32, #tpu.memory_space<vmem>>, %arg8: memref<1x1x64x128xf32, #tpu.memory_space<vmem>>, %arg9: memref<64x128xf32, #tpu.memory_space<vmem>>) attributes {dimension_semantics = [#tpu.dimension_semantics<parallel>, #tpu.dimension_semantics<parallel>, #tpu.dimension_semantics<arbitrary>], iteration_bounds = array<i64: 4, 1, 2>, scalar_prefetch = 0 : i64, scratch_operands = 1 : i64, tpu.core_type = #tpu.core_type<tc>, window_params = [{transform_indices = @transform_0, window_bounds = array<i64: 1, 256, 128>}, {transform_indices = @transform_1, window_bounds = array<i64: 1, 64, 256>}, {transform_indices = @transform_2, window_bounds = array<i64: 256, 1>}, {transform_indices = @transform_3, window_bounds = array<i64: 256, 1>}, {transform_indices = @transform_4, window_bounds = array<i64: 1, 64, 128>}, {transform_indices = @transform_5, window_bounds = array<i64: 1, 1, 64, 128>}]} {
    %c0_i32 = arith.constant 0 : i32
    %0 = arith.cmpi eq, %arg2, %c0_i32 : i32
    %1 = arith.extui %0 : i1 to i32
    %c0_i32_0 = arith.constant 0 : i32
    %2 = arith.cmpi ne, %1, %c0_i32_0 : i32
    scf.if %2 {
      %cst_17 = arith.constant 0.000000e+00 : f32
      %25 = vector.broadcast %cst_17 : f32 to vector<64x128xf32>
      %c0_18 = arith.constant 0 : index
      %c0_19 = arith.constant 0 : index
      %26 = vector.load %arg9[%c0_18, %c0_19] : memref<64x128xf32, #tpu.memory_space<vmem>>, vector<64x128xf32>
      tpu.vector_store %arg9[%c0_18, %c0_19], %25 {strides = array<i32>} : memref<64x128xf32, #tpu.memory_space<vmem>>, vector<64x128xf32>,
    } else {
    }
    %c0 = arith.constant 0 : index
    %c0_1 = arith.constant 0 : index
    %c0_2 = arith.constant 0 : index
    %3 = vector.load %arg3[%c0, %c0_1, %c0_2] : memref<1x256x128xf32, #tpu.memory_space<vmem>>, vector<1x256x128xf32>
    %4 = vector.shape_cast %3 : vector<1x256x128xf32> to vector<256x128xf32>
    %c0_3 = arith.constant 0 : index
    %c0_4 = arith.constant 0 : index
    %5 = vector.load %arg5[%c0_3, %c0_4] : memref<256x1xf32, #tpu.memory_space<vmem>>, vector<256x1xf32>
    %6 = vector.broadcast %5 : vector<256x1xf32> to vector<256x128xf32>
    %7 = arith.mulf %4, %6 : vector<256x128xf32>
    %c0_5 = arith.constant 0 : index
    %c0_6 = arith.constant 0 : index
    %8 = vector.load %arg6[%c0_5, %c0_6] : memref<256x1xf32, #tpu.memory_space<vmem>>, vector<256x1xf32>
    %9 = vector.broadcast %8 : vector<256x1xf32> to vector<256x128xf32>
    %10 = arith.addf %7, %9 : vector<256x128xf32>
    %cst = arith.constant 0.000000e+00 : f32
    %11 = vector.broadcast %cst : f32 to vector<256x128xf32>
    %12 = arith.cmpf ogt, %10, %11 : vector<256x128xf32>
    %cst_7 = arith.constant 2.000000e-01 : f32
    %13 = vector.broadcast %cst_7 : f32 to vector<256x128xf32>
    %14 = arith.mulf %13, %10 : vector<256x128xf32>
    %15 = arith.select %12, %10, %14 : vector<256x128xi1>, vector<256x128xf32>
    %c0_8 = arith.constant 0 : index
    %c0_9 = arith.constant 0 : index
    %16 = vector.load %arg9[%c0_8, %c0_9] : memref<64x128xf32, #tpu.memory_space<vmem>>, vector<64x128xf32>
    %c0_10 = arith.constant 0 : index
    %c0_11 = arith.constant 0 : index
    %c0_12 = arith.constant 0 : index
    %17 = vector.load %arg4[%c0_10, %c0_11, %c0_12] : memref<1x64x256xf32, #tpu.memory_space<vmem>>, vector<1x64x256xf32>
    %18 = vector.shape_cast %17 : vector<1x64x256xf32> to vector<64x256xf32>
    %cst_13 = arith.constant dense<0.000000e+00> : vector<64x128xf32>
    %19 = tpu.matmul %18, %15, %cst_13 {dimension_numbers = #tpu.dot_dimension_numbers<[1], [0], [0], [1], [0, 0, 1, 1], [], []>} : vector<64x256xf32>, vector<256x128xf32>, vector<64x128xf32> -> vector<64x128xf32>
    %20 = arith.addf %16, %19 : vector<64x128xf32>
    %c0_14 = arith.constant 0 : index
    %c0_15 = arith.constant 0 : index
    %21 = vector.load %arg9[%c0_14, %c0_15] : memref<64x128xf32, #tpu.memory_space<vmem>>, vector<64x128xf32>
    tpu.vector_store %arg9[%c0_14, %c0_15], %20 {strides = array<i32>} : memref<64x128xf32, #tpu.memory_space<vmem>>, vector<64x128xf32>,
    %c1_i32 = arith.constant 1 : i32
    %22 = arith.cmpi eq, %arg2, %c1_i32 : i32
    %23 = arith.extui %22 : i1 to i32
    %c0_i32_16 = arith.constant 0 : i32
    %24 = arith.cmpi ne, %23, %c0_i32_16 : i32
    scf.if %24 {
      %c0_17 = arith.constant 0 : index
      %c0_18 = arith.constant 0 : index
      %25 = vector.load %arg9[%c0_17, %c0_18] : memref<64x128xf32, #tpu.memory_space<vmem>>, vector<64x128xf32>
      %c0_19 = arith.constant 0 : index
      %c0_20 = arith.constant 0 : index
      %c0_21 = arith.constant 0 : index
      %26 = vector.load %arg7[%c0_19, %c0_20, %c0_21] : memref<1x64x128xf32, #tpu.memory_space<vmem>>, vector<1x64x128xf32>
      %27 = vector.shape_cast %26 : vector<1x64x128xf32> to vector<64x128xf32>
      %28 = vector.shape_cast %25 : vector<64x128xf32> to vector<1x64x128xf32>
      tpu.vector_store %arg7[%c0_19, %c0_20, %c0_21], %28 {strides = array<i32>} : memref<1x64x128xf32, #tpu.memory_space<vmem>>, vector<1x64x128xf32>,
      %cst_22 = arith.constant dense<0.000000e+00> : vector<64xf32>
      %29 = vector.multi_reduction <add>, %25, %cst_22 [1] : vector<64x128xf32> to vector<64xf32>
      %30 = vector.shape_cast %29 : vector<64xf32> to vector<64x1xf32>
      %31 = arith.mulf %25, %25 : vector<64x128xf32>
      %cst_23 = arith.constant dense<0.000000e+00> : vector<64xf32>
      %32 = vector.multi_reduction <add>, %31, %cst_23 [1] : vector<64x128xf32> to vector<64xf32>
      %33 = vector.shape_cast %32 : vector<64xf32> to vector<64x1xf32>
      %34 = tpu.iota {dimensions = array<i32: 1>} : vector<64x128xi32>
      %c0_i32_24 = arith.constant 0 : i32
      %35 = vector.broadcast %c0_i32_24 : i32 to vector<64x128xi32>
      %36 = arith.cmpi eq, %34, %35 : vector<64x128xi32>
      %cst_25 = arith.constant 0.000000e+00 : f32
      %37 = vector.shape_cast %30 : vector<64x1xf32> to vector<64x1xf32>
      %38 = vector.broadcast %37 : vector<64x1xf32> to vector<64x128xf32>
      %39 = vector.broadcast %cst_25 : f32 to vector<64x128xf32>
      %40 = arith.select %36, %38, %39 : vector<64x128xi1>, vector<64x128xf32>
      %c1_i32_26 = arith.constant 1 : i32
      %41 = vector.broadcast %c1_i32_26 : i32 to vector<64x128xi32>
      %42 = arith.cmpi eq, %34, %41 : vector<64x128xi32>
      %cst_27 = arith.constant 0.000000e+00 : f32
      %43 = vector.shape_cast %33 : vector<64x1xf32> to vector<64x1xf32>
      %44 = vector.broadcast %43 : vector<64x1xf32> to vector<64x128xf32>
      %45 = vector.broadcast %cst_27 : f32 to vector<64x128xf32>
      %46 = arith.select %42, %44, %45 : vector<64x128xi1>, vector<64x128xf32>
      %47 = arith.addf %40, %46 : vector<64x128xf32>
      %c0_28 = arith.constant 0 : index
      %c0_29 = arith.constant 0 : index
      %c0_30 = arith.constant 0 : index
      %c0_31 = arith.constant 0 : index
      %48 = vector.load %arg8[%c0_28, %c0_29, %c0_30, %c0_31] : memref<1x1x64x128xf32, #tpu.memory_space<vmem>>, vector<1x1x64x128xf32>
      %49 = vector.shape_cast %48 : vector<1x1x64x128xf32> to vector<64x128xf32>
      %50 = vector.shape_cast %47 : vector<64x128xf32> to vector<1x1x64x128xf32>
      tpu.vector_store %arg8[%c0_28, %c0_29, %c0_30, %c0_31], %50 {strides = array<i32>} : memref<1x1x64x128xf32, #tpu.memory_space<vmem>>, vector<1x1x64x128xf32>,
    } else {
    }
    return
  }
  func.func @transform_0(%arg0: i32, %arg1: i32, %arg2: i32) -> (i32, i32, i32) {
    %c0_i32 = arith.constant 0 : i32
    return %arg0, %arg2, %arg1 : i32, i32, i32
  }
  func.func @transform_1(%arg0: i32, %arg1: i32, %arg2: i32) -> (i32, i32, i32) {
    %c0_i32 = arith.constant 0 : i32
    %c0_i32_0 = arith.constant 0 : i32
    return %arg0, %c0_i32, %arg2 : i32, i32, i32
  }
  func.func @transform_2(%arg0: i32, %arg1: i32, %arg2: i32) -> (i32, i32) {
    %c0_i32 = arith.constant 0 : i32
    %c0_i32_0 = arith.constant 0 : i32
    return %arg2, %c0_i32 : i32, i32
  }
  func.func @transform_3(%arg0: i32, %arg1: i32, %arg2: i32) -> (i32, i32) {
    %c0_i32 = arith.constant 0 : i32
    %c0_i32_0 = arith.constant 0 : i32
    return %arg2, %c0_i32 : i32, i32
  }
  func.func @transform_4(%arg0: i32, %arg1: i32, %arg2: i32) -> (i32, i32, i32) {
    %c0_i32 = arith.constant 0 : i32
    %c0_i32_0 = arith.constant 0 : i32
    return %arg0, %c0_i32, %arg1 : i32, i32, i32
  }
  func.func @transform_5(%arg0: i32, %arg1: i32, %arg2: i32) -> (i32, i32, i32, i32) {
    %c0_i32 = arith.constant 0 : i32
    %c0_i32_0 = arith.constant 0 : i32
    %c0_i32_1 = arith.constant 0 : i32
    return %arg0, %arg1, %c0_i32, %c0_i32_0 : i32, i32, i32, i32
  }
}

module attributes {stable_mosaic.version = 11 : i64} {
  func.func @_convt_bn_stats_kernel(%arg0: i32, %arg1: i32, %arg2: i32, %arg3: memref<1x256x128xf32, #tpu.memory_space<vmem>>, %arg4: memref<1x32x256xf32, #tpu.memory_space<vmem>>, %arg5: memref<256x1xf32, #tpu.memory_space<vmem>>, %arg6: memref<256x1xf32, #tpu.memory_space<vmem>>, %arg7: memref<1x32x128xf32, #tpu.memory_space<vmem>>, %arg8: memref<1x1x32x128xf32, #tpu.memory_space<vmem>>, %arg9: memref<32x128xf32, #tpu.memory_space<vmem>>) attributes {dimension_semantics = [#tpu.dimension_semantics<parallel>, #tpu.dimension_semantics<parallel>, #tpu.dimension_semantics<arbitrary>], iteration_bounds = array<i64: 4, 1, 1>, scalar_prefetch = 0 : i64, scratch_operands = 1 : i64, tpu.core_type = #tpu.core_type<tc>, window_params = [{transform_indices = @transform_0, window_bounds = array<i64: 1, 256, 128>}, {transform_indices = @transform_1, window_bounds = array<i64: 1, 32, 256>}, {transform_indices = @transform_2, window_bounds = array<i64: 256, 1>}, {transform_indices = @transform_3, window_bounds = array<i64: 256, 1>}, {transform_indices = @transform_4, window_bounds = array<i64: 1, 32, 128>}, {transform_indices = @transform_5, window_bounds = array<i64: 1, 1, 32, 128>}]} {
    %c0_i32 = arith.constant 0 : i32
    %0 = arith.cmpi eq, %arg2, %c0_i32 : i32
    %1 = arith.extui %0 : i1 to i32
    %c0_i32_0 = arith.constant 0 : i32
    %2 = arith.cmpi ne, %1, %c0_i32_0 : i32
    scf.if %2 {
      %cst_18 = arith.constant 0.000000e+00 : f32
      %25 = vector.broadcast %cst_18 : f32 to vector<32x128xf32>
      %c0_19 = arith.constant 0 : index
      %c0_20 = arith.constant 0 : index
      %26 = vector.load %arg9[%c0_19, %c0_20] : memref<32x128xf32, #tpu.memory_space<vmem>>, vector<32x128xf32>
      tpu.vector_store %arg9[%c0_19, %c0_20], %25 {strides = array<i32>} : memref<32x128xf32, #tpu.memory_space<vmem>>, vector<32x128xf32>,
    } else {
    }
    %c0 = arith.constant 0 : index
    %c0_1 = arith.constant 0 : index
    %c0_2 = arith.constant 0 : index
    %3 = vector.load %arg3[%c0, %c0_1, %c0_2] : memref<1x256x128xf32, #tpu.memory_space<vmem>>, vector<1x256x128xf32>
    %4 = vector.shape_cast %3 : vector<1x256x128xf32> to vector<256x128xf32>
    %c0_3 = arith.constant 0 : index
    %c0_4 = arith.constant 0 : index
    %5 = vector.load %arg5[%c0_3, %c0_4] : memref<256x1xf32, #tpu.memory_space<vmem>>, vector<256x1xf32>
    %6 = vector.broadcast %5 : vector<256x1xf32> to vector<256x128xf32>
    %7 = arith.mulf %4, %6 : vector<256x128xf32>
    %c0_5 = arith.constant 0 : index
    %c0_6 = arith.constant 0 : index
    %8 = vector.load %arg6[%c0_5, %c0_6] : memref<256x1xf32, #tpu.memory_space<vmem>>, vector<256x1xf32>
    %9 = vector.broadcast %8 : vector<256x1xf32> to vector<256x128xf32>
    %10 = arith.addf %7, %9 : vector<256x128xf32>
    %cst = arith.constant 0.000000e+00 : f32
    %11 = vector.broadcast %cst : f32 to vector<256x128xf32>
    %12 = arith.cmpf ogt, %10, %11 : vector<256x128xf32>
    %cst_7 = arith.constant 2.000000e-01 : f32
    %13 = vector.broadcast %cst_7 : f32 to vector<256x128xf32>
    %14 = arith.mulf %13, %10 : vector<256x128xf32>
    %15 = arith.select %12, %10, %14 : vector<256x128xi1>, vector<256x128xf32>
    %c0_8 = arith.constant 0 : index
    %c0_9 = arith.constant 0 : index
    %16 = vector.load %arg9[%c0_8, %c0_9] : memref<32x128xf32, #tpu.memory_space<vmem>>, vector<32x128xf32>
    %c0_10 = arith.constant 0 : index
    %c0_11 = arith.constant 0 : index
    %c0_12 = arith.constant 0 : index
    %17 = vector.load %arg4[%c0_10, %c0_11, %c0_12] : memref<1x32x256xf32, #tpu.memory_space<vmem>>, vector<1x32x256xf32>
    %18 = vector.shape_cast %17 : vector<1x32x256xf32> to vector<32x256xf32>
    %cst_13 = arith.constant dense<0.000000e+00> : vector<32x128xf32>
    %19 = tpu.matmul %18, %15, %cst_13 {dimension_numbers = #tpu.dot_dimension_numbers<[1], [0], [0], [1], [0, 0, 1, 1], [], []>} : vector<32x256xf32>, vector<256x128xf32>, vector<32x128xf32> -> vector<32x128xf32>
    %20 = arith.addf %16, %19 : vector<32x128xf32>
    %c0_14 = arith.constant 0 : index
    %c0_15 = arith.constant 0 : index
    %21 = vector.load %arg9[%c0_14, %c0_15] : memref<32x128xf32, #tpu.memory_space<vmem>>, vector<32x128xf32>
    tpu.vector_store %arg9[%c0_14, %c0_15], %20 {strides = array<i32>} : memref<32x128xf32, #tpu.memory_space<vmem>>, vector<32x128xf32>,
    %c0_i32_16 = arith.constant 0 : i32
    %22 = arith.cmpi eq, %arg2, %c0_i32_16 : i32
    %23 = arith.extui %22 : i1 to i32
    %c0_i32_17 = arith.constant 0 : i32
    %24 = arith.cmpi ne, %23, %c0_i32_17 : i32
    scf.if %24 {
      %c0_18 = arith.constant 0 : index
      %c0_19 = arith.constant 0 : index
      %25 = vector.load %arg9[%c0_18, %c0_19] : memref<32x128xf32, #tpu.memory_space<vmem>>, vector<32x128xf32>
      %c0_20 = arith.constant 0 : index
      %c0_21 = arith.constant 0 : index
      %c0_22 = arith.constant 0 : index
      %26 = vector.load %arg7[%c0_20, %c0_21, %c0_22] : memref<1x32x128xf32, #tpu.memory_space<vmem>>, vector<1x32x128xf32>
      %27 = vector.shape_cast %26 : vector<1x32x128xf32> to vector<32x128xf32>
      %28 = vector.shape_cast %25 : vector<32x128xf32> to vector<1x32x128xf32>
      tpu.vector_store %arg7[%c0_20, %c0_21, %c0_22], %28 {strides = array<i32>} : memref<1x32x128xf32, #tpu.memory_space<vmem>>, vector<1x32x128xf32>,
      %cst_23 = arith.constant dense<0.000000e+00> : vector<32xf32>
      %29 = vector.multi_reduction <add>, %25, %cst_23 [1] : vector<32x128xf32> to vector<32xf32>
      %30 = vector.shape_cast %29 : vector<32xf32> to vector<32x1xf32>
      %31 = arith.mulf %25, %25 : vector<32x128xf32>
      %cst_24 = arith.constant dense<0.000000e+00> : vector<32xf32>
      %32 = vector.multi_reduction <add>, %31, %cst_24 [1] : vector<32x128xf32> to vector<32xf32>
      %33 = vector.shape_cast %32 : vector<32xf32> to vector<32x1xf32>
      %34 = tpu.iota {dimensions = array<i32: 1>} : vector<32x128xi32>
      %c0_i32_25 = arith.constant 0 : i32
      %35 = vector.broadcast %c0_i32_25 : i32 to vector<32x128xi32>
      %36 = arith.cmpi eq, %34, %35 : vector<32x128xi32>
      %cst_26 = arith.constant 0.000000e+00 : f32
      %37 = vector.shape_cast %30 : vector<32x1xf32> to vector<32x1xf32>
      %38 = vector.broadcast %37 : vector<32x1xf32> to vector<32x128xf32>
      %39 = vector.broadcast %cst_26 : f32 to vector<32x128xf32>
      %40 = arith.select %36, %38, %39 : vector<32x128xi1>, vector<32x128xf32>
      %c1_i32 = arith.constant 1 : i32
      %41 = vector.broadcast %c1_i32 : i32 to vector<32x128xi32>
      %42 = arith.cmpi eq, %34, %41 : vector<32x128xi32>
      %cst_27 = arith.constant 0.000000e+00 : f32
      %43 = vector.shape_cast %33 : vector<32x1xf32> to vector<32x1xf32>
      %44 = vector.broadcast %43 : vector<32x1xf32> to vector<32x128xf32>
      %45 = vector.broadcast %cst_27 : f32 to vector<32x128xf32>
      %46 = arith.select %42, %44, %45 : vector<32x128xi1>, vector<32x128xf32>
      %47 = arith.addf %40, %46 : vector<32x128xf32>
      %c0_28 = arith.constant 0 : index
      %c0_29 = arith.constant 0 : index
      %c0_30 = arith.constant 0 : index
      %c0_31 = arith.constant 0 : index
      %48 = vector.load %arg8[%c0_28, %c0_29, %c0_30, %c0_31] : memref<1x1x32x128xf32, #tpu.memory_space<vmem>>, vector<1x1x32x128xf32>
      %49 = vector.shape_cast %48 : vector<1x1x32x128xf32> to vector<32x128xf32>
      %50 = vector.shape_cast %47 : vector<32x128xf32> to vector<1x1x32x128xf32>
      tpu.vector_store %arg8[%c0_28, %c0_29, %c0_30, %c0_31], %50 {strides = array<i32>} : memref<1x1x32x128xf32, #tpu.memory_space<vmem>>, vector<1x1x32x128xf32>,
    } else {
    }
    return
  }
  func.func @transform_0(%arg0: i32, %arg1: i32, %arg2: i32) -> (i32, i32, i32) {
    %c0_i32 = arith.constant 0 : i32
    return %arg0, %arg2, %arg1 : i32, i32, i32
  }
  func.func @transform_1(%arg0: i32, %arg1: i32, %arg2: i32) -> (i32, i32, i32) {
    %c0_i32 = arith.constant 0 : i32
    %c0_i32_0 = arith.constant 0 : i32
    return %arg0, %c0_i32, %arg2 : i32, i32, i32
  }
  func.func @transform_2(%arg0: i32, %arg1: i32, %arg2: i32) -> (i32, i32) {
    %c0_i32 = arith.constant 0 : i32
    %c0_i32_0 = arith.constant 0 : i32
    return %arg2, %c0_i32 : i32, i32
  }
  func.func @transform_3(%arg0: i32, %arg1: i32, %arg2: i32) -> (i32, i32) {
    %c0_i32 = arith.constant 0 : i32
    %c0_i32_0 = arith.constant 0 : i32
    return %arg2, %c0_i32 : i32, i32
  }
  func.func @transform_4(%arg0: i32, %arg1: i32, %arg2: i32) -> (i32, i32, i32) {
    %c0_i32 = arith.constant 0 : i32
    %c0_i32_0 = arith.constant 0 : i32
    return %arg0, %c0_i32, %arg1 : i32, i32, i32
  }
  func.func @transform_5(%arg0: i32, %arg1: i32, %arg2: i32) -> (i32, i32, i32, i32) {
    %c0_i32 = arith.constant 0 : i32
    %c0_i32_0 = arith.constant 0 : i32
    %c0_i32_1 = arith.constant 0 : i32
    return %arg0, %arg1, %c0_i32, %c0_i32_0 : i32, i32, i32, i32
  }
}

module attributes {stable_mosaic.version = 11 : i64} {
  func.func @_convt_bn_stats_kernel(%arg0: i32, %arg1: i32, %arg2: i32, %arg3: memref<1x128x512xf32, #tpu.memory_space<vmem>>, %arg4: memref<1x16x128xf32, #tpu.memory_space<vmem>>, %arg5: memref<128x1xf32, #tpu.memory_space<vmem>>, %arg6: memref<128x1xf32, #tpu.memory_space<vmem>>, %arg7: memref<1x16x512xf32, #tpu.memory_space<vmem>>, %arg8: memref<1x1x16x128xf32, #tpu.memory_space<vmem>>, %arg9: memref<16x512xf32, #tpu.memory_space<vmem>>) attributes {dimension_semantics = [#tpu.dimension_semantics<parallel>, #tpu.dimension_semantics<parallel>, #tpu.dimension_semantics<arbitrary>], iteration_bounds = array<i64: 4, 1, 1>, scalar_prefetch = 0 : i64, scratch_operands = 1 : i64, tpu.core_type = #tpu.core_type<tc>, window_params = [{transform_indices = @transform_0, window_bounds = array<i64: 1, 128, 512>}, {transform_indices = @transform_1, window_bounds = array<i64: 1, 16, 128>}, {transform_indices = @transform_2, window_bounds = array<i64: 128, 1>}, {transform_indices = @transform_3, window_bounds = array<i64: 128, 1>}, {transform_indices = @transform_4, window_bounds = array<i64: 1, 16, 512>}, {transform_indices = @transform_5, window_bounds = array<i64: 1, 1, 16, 128>}]} {
    %c0_i32 = arith.constant 0 : i32
    %0 = arith.cmpi eq, %arg2, %c0_i32 : i32
    %1 = arith.extui %0 : i1 to i32
    %c0_i32_0 = arith.constant 0 : i32
    %2 = arith.cmpi ne, %1, %c0_i32_0 : i32
    scf.if %2 {
      %cst_18 = arith.constant 0.000000e+00 : f32
      %25 = vector.broadcast %cst_18 : f32 to vector<16x512xf32>
      %c0_19 = arith.constant 0 : index
      %c0_20 = arith.constant 0 : index
      %26 = vector.load %arg9[%c0_19, %c0_20] : memref<16x512xf32, #tpu.memory_space<vmem>>, vector<16x512xf32>
      tpu.vector_store %arg9[%c0_19, %c0_20], %25 {strides = array<i32>} : memref<16x512xf32, #tpu.memory_space<vmem>>, vector<16x512xf32>,
    } else {
    }
    %c0 = arith.constant 0 : index
    %c0_1 = arith.constant 0 : index
    %c0_2 = arith.constant 0 : index
    %3 = vector.load %arg3[%c0, %c0_1, %c0_2] : memref<1x128x512xf32, #tpu.memory_space<vmem>>, vector<1x128x512xf32>
    %4 = vector.shape_cast %3 : vector<1x128x512xf32> to vector<128x512xf32>
    %c0_3 = arith.constant 0 : index
    %c0_4 = arith.constant 0 : index
    %5 = vector.load %arg5[%c0_3, %c0_4] : memref<128x1xf32, #tpu.memory_space<vmem>>, vector<128x1xf32>
    %6 = vector.broadcast %5 : vector<128x1xf32> to vector<128x512xf32>
    %7 = arith.mulf %4, %6 : vector<128x512xf32>
    %c0_5 = arith.constant 0 : index
    %c0_6 = arith.constant 0 : index
    %8 = vector.load %arg6[%c0_5, %c0_6] : memref<128x1xf32, #tpu.memory_space<vmem>>, vector<128x1xf32>
    %9 = vector.broadcast %8 : vector<128x1xf32> to vector<128x512xf32>
    %10 = arith.addf %7, %9 : vector<128x512xf32>
    %cst = arith.constant 0.000000e+00 : f32
    %11 = vector.broadcast %cst : f32 to vector<128x512xf32>
    %12 = arith.cmpf ogt, %10, %11 : vector<128x512xf32>
    %cst_7 = arith.constant 2.000000e-01 : f32
    %13 = vector.broadcast %cst_7 : f32 to vector<128x512xf32>
    %14 = arith.mulf %13, %10 : vector<128x512xf32>
    %15 = arith.select %12, %10, %14 : vector<128x512xi1>, vector<128x512xf32>
    %c0_8 = arith.constant 0 : index
    %c0_9 = arith.constant 0 : index
    %16 = vector.load %arg9[%c0_8, %c0_9] : memref<16x512xf32, #tpu.memory_space<vmem>>, vector<16x512xf32>
    %c0_10 = arith.constant 0 : index
    %c0_11 = arith.constant 0 : index
    %c0_12 = arith.constant 0 : index
    %17 = vector.load %arg4[%c0_10, %c0_11, %c0_12] : memref<1x16x128xf32, #tpu.memory_space<vmem>>, vector<1x16x128xf32>
    %18 = vector.shape_cast %17 : vector<1x16x128xf32> to vector<16x128xf32>
    %cst_13 = arith.constant dense<0.000000e+00> : vector<16x512xf32>
    %19 = tpu.matmul %18, %15, %cst_13 {dimension_numbers = #tpu.dot_dimension_numbers<[1], [0], [0], [1], [0, 0, 1, 1], [], []>} : vector<16x128xf32>, vector<128x512xf32>, vector<16x512xf32> -> vector<16x512xf32>
    %20 = arith.addf %16, %19 : vector<16x512xf32>
    %c0_14 = arith.constant 0 : index
    %c0_15 = arith.constant 0 : index
    %21 = vector.load %arg9[%c0_14, %c0_15] : memref<16x512xf32, #tpu.memory_space<vmem>>, vector<16x512xf32>
    tpu.vector_store %arg9[%c0_14, %c0_15], %20 {strides = array<i32>} : memref<16x512xf32, #tpu.memory_space<vmem>>, vector<16x512xf32>,
    %c0_i32_16 = arith.constant 0 : i32
    %22 = arith.cmpi eq, %arg2, %c0_i32_16 : i32
    %23 = arith.extui %22 : i1 to i32
    %c0_i32_17 = arith.constant 0 : i32
    %24 = arith.cmpi ne, %23, %c0_i32_17 : i32
    scf.if %24 {
      %c0_18 = arith.constant 0 : index
      %c0_19 = arith.constant 0 : index
      %25 = vector.load %arg9[%c0_18, %c0_19] : memref<16x512xf32, #tpu.memory_space<vmem>>, vector<16x512xf32>
      %c0_20 = arith.constant 0 : index
      %c0_21 = arith.constant 0 : index
      %c0_22 = arith.constant 0 : index
      %26 = vector.load %arg7[%c0_20, %c0_21, %c0_22] : memref<1x16x512xf32, #tpu.memory_space<vmem>>, vector<1x16x512xf32>
      %27 = vector.shape_cast %26 : vector<1x16x512xf32> to vector<16x512xf32>
      %28 = vector.shape_cast %25 : vector<16x512xf32> to vector<1x16x512xf32>
      tpu.vector_store %arg7[%c0_20, %c0_21, %c0_22], %28 {strides = array<i32>} : memref<1x16x512xf32, #tpu.memory_space<vmem>>, vector<1x16x512xf32>,
      %cst_23 = arith.constant dense<0.000000e+00> : vector<16xf32>
      %29 = vector.multi_reduction <add>, %25, %cst_23 [1] : vector<16x512xf32> to vector<16xf32>
      %30 = vector.shape_cast %29 : vector<16xf32> to vector<16x1xf32>
      %31 = arith.mulf %25, %25 : vector<16x512xf32>
      %cst_24 = arith.constant dense<0.000000e+00> : vector<16xf32>
      %32 = vector.multi_reduction <add>, %31, %cst_24 [1] : vector<16x512xf32> to vector<16xf32>
      %33 = vector.shape_cast %32 : vector<16xf32> to vector<16x1xf32>
      %34 = tpu.iota {dimensions = array<i32: 1>} : vector<16x128xi32>
      %c0_i32_25 = arith.constant 0 : i32
      %35 = vector.broadcast %c0_i32_25 : i32 to vector<16x128xi32>
      %36 = arith.cmpi eq, %34, %35 : vector<16x128xi32>
      %cst_26 = arith.constant 0.000000e+00 : f32
      %37 = vector.shape_cast %30 : vector<16x1xf32> to vector<16x1xf32>
      %38 = vector.broadcast %37 : vector<16x1xf32> to vector<16x128xf32>
      %39 = vector.broadcast %cst_26 : f32 to vector<16x128xf32>
      %40 = arith.select %36, %38, %39 : vector<16x128xi1>, vector<16x128xf32>
      %c1_i32 = arith.constant 1 : i32
      %41 = vector.broadcast %c1_i32 : i32 to vector<16x128xi32>
      %42 = arith.cmpi eq, %34, %41 : vector<16x128xi32>
      %cst_27 = arith.constant 0.000000e+00 : f32
      %43 = vector.shape_cast %33 : vector<16x1xf32> to vector<16x1xf32>
      %44 = vector.broadcast %43 : vector<16x1xf32> to vector<16x128xf32>
      %45 = vector.broadcast %cst_27 : f32 to vector<16x128xf32>
      %46 = arith.select %42, %44, %45 : vector<16x128xi1>, vector<16x128xf32>
      %47 = arith.addf %40, %46 : vector<16x128xf32>
      %c0_28 = arith.constant 0 : index
      %c0_29 = arith.constant 0 : index
      %c0_30 = arith.constant 0 : index
      %c0_31 = arith.constant 0 : index
      %48 = vector.load %arg8[%c0_28, %c0_29, %c0_30, %c0_31] : memref<1x1x16x128xf32, #tpu.memory_space<vmem>>, vector<1x1x16x128xf32>
      %49 = vector.shape_cast %48 : vector<1x1x16x128xf32> to vector<16x128xf32>
      %50 = vector.shape_cast %47 : vector<16x128xf32> to vector<1x1x16x128xf32>
      tpu.vector_store %arg8[%c0_28, %c0_29, %c0_30, %c0_31], %50 {strides = array<i32>} : memref<1x1x16x128xf32, #tpu.memory_space<vmem>>, vector<1x1x16x128xf32>,
    } else {
    }
    return
  }
  func.func @transform_0(%arg0: i32, %arg1: i32, %arg2: i32) -> (i32, i32, i32) {
    %c0_i32 = arith.constant 0 : i32
    return %arg0, %arg2, %arg1 : i32, i32, i32
  }
  func.func @transform_1(%arg0: i32, %arg1: i32, %arg2: i32) -> (i32, i32, i32) {
    %c0_i32 = arith.constant 0 : i32
    %c0_i32_0 = arith.constant 0 : i32
    return %arg0, %c0_i32, %arg2 : i32, i32, i32
  }
  func.func @transform_2(%arg0: i32, %arg1: i32, %arg2: i32) -> (i32, i32) {
    %c0_i32 = arith.constant 0 : i32
    %c0_i32_0 = arith.constant 0 : i32
    return %arg2, %c0_i32 : i32, i32
  }
  func.func @transform_3(%arg0: i32, %arg1: i32, %arg2: i32) -> (i32, i32) {
    %c0_i32 = arith.constant 0 : i32
    %c0_i32_0 = arith.constant 0 : i32
    return %arg2, %c0_i32 : i32, i32
  }
  func.func @transform_4(%arg0: i32, %arg1: i32, %arg2: i32) -> (i32, i32, i32) {
    %c0_i32 = arith.constant 0 : i32
    %c0_i32_0 = arith.constant 0 : i32
    return %arg0, %c0_i32, %arg1 : i32, i32, i32
  }
  func.func @transform_5(%arg0: i32, %arg1: i32, %arg2: i32) -> (i32, i32, i32, i32) {
    %c0_i32 = arith.constant 0 : i32
    %c0_i32_0 = arith.constant 0 : i32
    %c0_i32_1 = arith.constant 0 : i32
    return %arg0, %arg1, %c0_i32, %c0_i32_0 : i32, i32, i32, i32
  }
}

module attributes {stable_mosaic.version = 11 : i64} {
  func.func @_convt_bn_stats_kernel(%arg0: i32, %arg1: i32, %arg2: i32, %arg3: memref<1x64x512xf32, #tpu.memory_space<vmem>>, %arg4: memref<1x8x64xf32, #tpu.memory_space<vmem>>, %arg5: memref<64x1xf32, #tpu.memory_space<vmem>>, %arg6: memref<64x1xf32, #tpu.memory_space<vmem>>, %arg7: memref<1x8x512xf32, #tpu.memory_space<vmem>>, %arg8: memref<1x1x8x128xf32, #tpu.memory_space<vmem>>, %arg9: memref<8x512xf32, #tpu.memory_space<vmem>>) attributes {dimension_semantics = [#tpu.dimension_semantics<parallel>, #tpu.dimension_semantics<parallel>, #tpu.dimension_semantics<arbitrary>], iteration_bounds = array<i64: 4, 4, 1>, scalar_prefetch = 0 : i64, scratch_operands = 1 : i64, tpu.core_type = #tpu.core_type<tc>, window_params = [{transform_indices = @transform_0, window_bounds = array<i64: 1, 64, 512>}, {transform_indices = @transform_1, window_bounds = array<i64: 1, 8, 64>}, {transform_indices = @transform_2, window_bounds = array<i64: 64, 1>}, {transform_indices = @transform_3, window_bounds = array<i64: 64, 1>}, {transform_indices = @transform_4, window_bounds = array<i64: 1, 8, 512>}, {transform_indices = @transform_5, window_bounds = array<i64: 1, 1, 8, 128>}]} {
    %c0_i32 = arith.constant 0 : i32
    %0 = arith.cmpi eq, %arg2, %c0_i32 : i32
    %1 = arith.extui %0 : i1 to i32
    %c0_i32_0 = arith.constant 0 : i32
    %2 = arith.cmpi ne, %1, %c0_i32_0 : i32
    scf.if %2 {
      %cst_18 = arith.constant 0.000000e+00 : f32
      %25 = vector.broadcast %cst_18 : f32 to vector<8x512xf32>
      %c0_19 = arith.constant 0 : index
      %c0_20 = arith.constant 0 : index
      %26 = vector.load %arg9[%c0_19, %c0_20] : memref<8x512xf32, #tpu.memory_space<vmem>>, vector<8x512xf32>
      tpu.vector_store %arg9[%c0_19, %c0_20], %25 {strides = array<i32>} : memref<8x512xf32, #tpu.memory_space<vmem>>, vector<8x512xf32>,
    } else {
    }
    %c0 = arith.constant 0 : index
    %c0_1 = arith.constant 0 : index
    %c0_2 = arith.constant 0 : index
    %3 = vector.load %arg3[%c0, %c0_1, %c0_2] : memref<1x64x512xf32, #tpu.memory_space<vmem>>, vector<1x64x512xf32>
    %4 = vector.shape_cast %3 : vector<1x64x512xf32> to vector<64x512xf32>
    %c0_3 = arith.constant 0 : index
    %c0_4 = arith.constant 0 : index
    %5 = vector.load %arg5[%c0_3, %c0_4] : memref<64x1xf32, #tpu.memory_space<vmem>>, vector<64x1xf32>
    %6 = vector.broadcast %5 : vector<64x1xf32> to vector<64x512xf32>
    %7 = arith.mulf %4, %6 : vector<64x512xf32>
    %c0_5 = arith.constant 0 : index
    %c0_6 = arith.constant 0 : index
    %8 = vector.load %arg6[%c0_5, %c0_6] : memref<64x1xf32, #tpu.memory_space<vmem>>, vector<64x1xf32>
    %9 = vector.broadcast %8 : vector<64x1xf32> to vector<64x512xf32>
    %10 = arith.addf %7, %9 : vector<64x512xf32>
    %cst = arith.constant 0.000000e+00 : f32
    %11 = vector.broadcast %cst : f32 to vector<64x512xf32>
    %12 = arith.cmpf ogt, %10, %11 : vector<64x512xf32>
    %cst_7 = arith.constant 2.000000e-01 : f32
    %13 = vector.broadcast %cst_7 : f32 to vector<64x512xf32>
    %14 = arith.mulf %13, %10 : vector<64x512xf32>
    %15 = arith.select %12, %10, %14 : vector<64x512xi1>, vector<64x512xf32>
    %c0_8 = arith.constant 0 : index
    %c0_9 = arith.constant 0 : index
    %16 = vector.load %arg9[%c0_8, %c0_9] : memref<8x512xf32, #tpu.memory_space<vmem>>, vector<8x512xf32>
    %c0_10 = arith.constant 0 : index
    %c0_11 = arith.constant 0 : index
    %c0_12 = arith.constant 0 : index
    %17 = vector.load %arg4[%c0_10, %c0_11, %c0_12] : memref<1x8x64xf32, #tpu.memory_space<vmem>>, vector<1x8x64xf32>
    %18 = vector.shape_cast %17 : vector<1x8x64xf32> to vector<8x64xf32>
    %cst_13 = arith.constant dense<0.000000e+00> : vector<8x512xf32>
    %19 = tpu.matmul %18, %15, %cst_13 {dimension_numbers = #tpu.dot_dimension_numbers<[1], [0], [0], [1], [0, 0, 1, 1], [], []>} : vector<8x64xf32>, vector<64x512xf32>, vector<8x512xf32> -> vector<8x512xf32>
    %20 = arith.addf %16, %19 : vector<8x512xf32>
    %c0_14 = arith.constant 0 : index
    %c0_15 = arith.constant 0 : index
    %21 = vector.load %arg9[%c0_14, %c0_15] : memref<8x512xf32, #tpu.memory_space<vmem>>, vector<8x512xf32>
    tpu.vector_store %arg9[%c0_14, %c0_15], %20 {strides = array<i32>} : memref<8x512xf32, #tpu.memory_space<vmem>>, vector<8x512xf32>,
    %c0_i32_16 = arith.constant 0 : i32
    %22 = arith.cmpi eq, %arg2, %c0_i32_16 : i32
    %23 = arith.extui %22 : i1 to i32
    %c0_i32_17 = arith.constant 0 : i32
    %24 = arith.cmpi ne, %23, %c0_i32_17 : i32
    scf.if %24 {
      %c0_18 = arith.constant 0 : index
      %c0_19 = arith.constant 0 : index
      %25 = vector.load %arg9[%c0_18, %c0_19] : memref<8x512xf32, #tpu.memory_space<vmem>>, vector<8x512xf32>
      %c0_20 = arith.constant 0 : index
      %c0_21 = arith.constant 0 : index
      %c0_22 = arith.constant 0 : index
      %26 = vector.load %arg7[%c0_20, %c0_21, %c0_22] : memref<1x8x512xf32, #tpu.memory_space<vmem>>, vector<1x8x512xf32>
      %27 = vector.shape_cast %26 : vector<1x8x512xf32> to vector<8x512xf32>
      %28 = vector.shape_cast %25 : vector<8x512xf32> to vector<1x8x512xf32>
      tpu.vector_store %arg7[%c0_20, %c0_21, %c0_22], %28 {strides = array<i32>} : memref<1x8x512xf32, #tpu.memory_space<vmem>>, vector<1x8x512xf32>,
      %cst_23 = arith.constant dense<0.000000e+00> : vector<8xf32>
      %29 = vector.multi_reduction <add>, %25, %cst_23 [1] : vector<8x512xf32> to vector<8xf32>
      %30 = vector.shape_cast %29 : vector<8xf32> to vector<8x1xf32>
      %31 = arith.mulf %25, %25 : vector<8x512xf32>
      %cst_24 = arith.constant dense<0.000000e+00> : vector<8xf32>
      %32 = vector.multi_reduction <add>, %31, %cst_24 [1] : vector<8x512xf32> to vector<8xf32>
      %33 = vector.shape_cast %32 : vector<8xf32> to vector<8x1xf32>
      %34 = tpu.iota {dimensions = array<i32: 1>} : vector<8x128xi32>
      %c0_i32_25 = arith.constant 0 : i32
      %35 = vector.broadcast %c0_i32_25 : i32 to vector<8x128xi32>
      %36 = arith.cmpi eq, %34, %35 : vector<8x128xi32>
      %cst_26 = arith.constant 0.000000e+00 : f32
      %37 = vector.shape_cast %30 : vector<8x1xf32> to vector<8x1xf32>
      %38 = vector.broadcast %37 : vector<8x1xf32> to vector<8x128xf32>
      %39 = vector.broadcast %cst_26 : f32 to vector<8x128xf32>
      %40 = arith.select %36, %38, %39 : vector<8x128xi1>, vector<8x128xf32>
      %c1_i32 = arith.constant 1 : i32
      %41 = vector.broadcast %c1_i32 : i32 to vector<8x128xi32>
      %42 = arith.cmpi eq, %34, %41 : vector<8x128xi32>
      %cst_27 = arith.constant 0.000000e+00 : f32
      %43 = vector.shape_cast %33 : vector<8x1xf32> to vector<8x1xf32>
      %44 = vector.broadcast %43 : vector<8x1xf32> to vector<8x128xf32>
      %45 = vector.broadcast %cst_27 : f32 to vector<8x128xf32>
      %46 = arith.select %42, %44, %45 : vector<8x128xi1>, vector<8x128xf32>
      %47 = arith.addf %40, %46 : vector<8x128xf32>
      %c0_28 = arith.constant 0 : index
      %c0_29 = arith.constant 0 : index
      %c0_30 = arith.constant 0 : index
      %c0_31 = arith.constant 0 : index
      %48 = vector.load %arg8[%c0_28, %c0_29, %c0_30, %c0_31] : memref<1x1x8x128xf32, #tpu.memory_space<vmem>>, vector<1x1x8x128xf32>
      %49 = vector.shape_cast %48 : vector<1x1x8x128xf32> to vector<8x128xf32>
      %50 = vector.shape_cast %47 : vector<8x128xf32> to vector<1x1x8x128xf32>
      tpu.vector_store %arg8[%c0_28, %c0_29, %c0_30, %c0_31], %50 {strides = array<i32>} : memref<1x1x8x128xf32, #tpu.memory_space<vmem>>, vector<1x1x8x128xf32>,
    } else {
    }
    return
  }
  func.func @transform_0(%arg0: i32, %arg1: i32, %arg2: i32) -> (i32, i32, i32) {
    %c0_i32 = arith.constant 0 : i32
    return %arg0, %arg2, %arg1 : i32, i32, i32
  }
  func.func @transform_1(%arg0: i32, %arg1: i32, %arg2: i32) -> (i32, i32, i32) {
    %c0_i32 = arith.constant 0 : i32
    %c0_i32_0 = arith.constant 0 : i32
    return %arg0, %c0_i32, %arg2 : i32, i32, i32
  }
  func.func @transform_2(%arg0: i32, %arg1: i32, %arg2: i32) -> (i32, i32) {
    %c0_i32 = arith.constant 0 : i32
    %c0_i32_0 = arith.constant 0 : i32
    return %arg2, %c0_i32 : i32, i32
  }
  func.func @transform_3(%arg0: i32, %arg1: i32, %arg2: i32) -> (i32, i32) {
    %c0_i32 = arith.constant 0 : i32
    %c0_i32_0 = arith.constant 0 : i32
    return %arg2, %c0_i32 : i32, i32
  }
  func.func @transform_4(%arg0: i32, %arg1: i32, %arg2: i32) -> (i32, i32, i32) {
    %c0_i32 = arith.constant 0 : i32
    %c0_i32_0 = arith.constant 0 : i32
    return %arg0, %c0_i32, %arg1 : i32, i32, i32
  }
  func.func @transform_5(%arg0: i32, %arg1: i32, %arg2: i32) -> (i32, i32, i32, i32) {
    %c0_i32 = arith.constant 0 : i32
    %c0_i32_0 = arith.constant 0 : i32
    %c0_i32_1 = arith.constant 0 : i32
    return %arg0, %arg1, %c0_i32, %c0_i32_0 : i32, i32, i32, i32
  }
}

module attributes {stable_mosaic.version = 11 : i64} {
  func.func @_convt_tanh_kernel(%arg0: i32, %arg1: i32, %arg2: i32, %arg3: memref<1x32x512xf32, #tpu.memory_space<vmem>>, %arg4: memref<1x8x32xf32, #tpu.memory_space<vmem>>, %arg5: memref<32x1xf32, #tpu.memory_space<vmem>>, %arg6: memref<32x1xf32, #tpu.memory_space<vmem>>, %arg7: memref<1x8x512xf32, #tpu.memory_space<vmem>>, %arg8: memref<8x512xf32, #tpu.memory_space<vmem>>) attributes {dimension_semantics = [#tpu.dimension_semantics<parallel>, #tpu.dimension_semantics<parallel>, #tpu.dimension_semantics<arbitrary>], iteration_bounds = array<i64: 4, 16, 1>, scalar_prefetch = 0 : i64, scratch_operands = 1 : i64, tpu.core_type = #tpu.core_type<tc>, window_params = [{transform_indices = @transform_0, window_bounds = array<i64: 1, 32, 512>}, {transform_indices = @transform_1, window_bounds = array<i64: 1, 8, 32>}, {transform_indices = @transform_2, window_bounds = array<i64: 32, 1>}, {transform_indices = @transform_3, window_bounds = array<i64: 32, 1>}, {transform_indices = @transform_4, window_bounds = array<i64: 1, 8, 512>}]} {
    %c0_i32 = arith.constant 0 : i32
    %0 = arith.cmpi eq, %arg2, %c0_i32 : i32
    %1 = arith.extui %0 : i1 to i32
    %c0_i32_0 = arith.constant 0 : i32
    %2 = arith.cmpi ne, %1, %c0_i32_0 : i32
    scf.if %2 {
      %cst_18 = arith.constant 0.000000e+00 : f32
      %25 = vector.broadcast %cst_18 : f32 to vector<8x512xf32>
      %c0_19 = arith.constant 0 : index
      %c0_20 = arith.constant 0 : index
      %26 = vector.load %arg8[%c0_19, %c0_20] : memref<8x512xf32, #tpu.memory_space<vmem>>, vector<8x512xf32>
      tpu.vector_store %arg8[%c0_19, %c0_20], %25 {strides = array<i32>} : memref<8x512xf32, #tpu.memory_space<vmem>>, vector<8x512xf32>,
    } else {
    }
    %c0 = arith.constant 0 : index
    %c0_1 = arith.constant 0 : index
    %c0_2 = arith.constant 0 : index
    %3 = vector.load %arg3[%c0, %c0_1, %c0_2] : memref<1x32x512xf32, #tpu.memory_space<vmem>>, vector<1x32x512xf32>
    %4 = vector.shape_cast %3 : vector<1x32x512xf32> to vector<32x512xf32>
    %c0_3 = arith.constant 0 : index
    %c0_4 = arith.constant 0 : index
    %5 = vector.load %arg5[%c0_3, %c0_4] : memref<32x1xf32, #tpu.memory_space<vmem>>, vector<32x1xf32>
    %6 = vector.broadcast %5 : vector<32x1xf32> to vector<32x512xf32>
    %7 = arith.mulf %4, %6 : vector<32x512xf32>
    %c0_5 = arith.constant 0 : index
    %c0_6 = arith.constant 0 : index
    %8 = vector.load %arg6[%c0_5, %c0_6] : memref<32x1xf32, #tpu.memory_space<vmem>>, vector<32x1xf32>
    %9 = vector.broadcast %8 : vector<32x1xf32> to vector<32x512xf32>
    %10 = arith.addf %7, %9 : vector<32x512xf32>
    %cst = arith.constant 0.000000e+00 : f32
    %11 = vector.broadcast %cst : f32 to vector<32x512xf32>
    %12 = arith.cmpf ogt, %10, %11 : vector<32x512xf32>
    %cst_7 = arith.constant 2.000000e-01 : f32
    %13 = vector.broadcast %cst_7 : f32 to vector<32x512xf32>
    %14 = arith.mulf %13, %10 : vector<32x512xf32>
    %15 = arith.select %12, %10, %14 : vector<32x512xi1>, vector<32x512xf32>
    %c0_8 = arith.constant 0 : index
    %c0_9 = arith.constant 0 : index
    %16 = vector.load %arg8[%c0_8, %c0_9] : memref<8x512xf32, #tpu.memory_space<vmem>>, vector<8x512xf32>
    %c0_10 = arith.constant 0 : index
    %c0_11 = arith.constant 0 : index
    %c0_12 = arith.constant 0 : index
    %17 = vector.load %arg4[%c0_10, %c0_11, %c0_12] : memref<1x8x32xf32, #tpu.memory_space<vmem>>, vector<1x8x32xf32>
    %18 = vector.shape_cast %17 : vector<1x8x32xf32> to vector<8x32xf32>
    %cst_13 = arith.constant dense<0.000000e+00> : vector<8x512xf32>
    %19 = tpu.matmul %18, %15, %cst_13 {dimension_numbers = #tpu.dot_dimension_numbers<[1], [0], [0], [1], [0, 0, 1, 1], [], []>} : vector<8x32xf32>, vector<32x512xf32>, vector<8x512xf32> -> vector<8x512xf32>
    %20 = arith.addf %16, %19 : vector<8x512xf32>
    %c0_14 = arith.constant 0 : index
    %c0_15 = arith.constant 0 : index
    %21 = vector.load %arg8[%c0_14, %c0_15] : memref<8x512xf32, #tpu.memory_space<vmem>>, vector<8x512xf32>
    tpu.vector_store %arg8[%c0_14, %c0_15], %20 {strides = array<i32>} : memref<8x512xf32, #tpu.memory_space<vmem>>, vector<8x512xf32>,
    %c0_i32_16 = arith.constant 0 : i32
    %22 = arith.cmpi eq, %arg2, %c0_i32_16 : i32
    %23 = arith.extui %22 : i1 to i32
    %c0_i32_17 = arith.constant 0 : i32
    %24 = arith.cmpi ne, %23, %c0_i32_17 : i32
    scf.if %24 {
      %c0_18 = arith.constant 0 : index
      %c0_19 = arith.constant 0 : index
      %25 = vector.load %arg8[%c0_18, %c0_19] : memref<8x512xf32, #tpu.memory_space<vmem>>, vector<8x512xf32>
      %26 = math.tanh %25 : vector<8x512xf32>
      %c0_20 = arith.constant 0 : index
      %c0_21 = arith.constant 0 : index
      %c0_22 = arith.constant 0 : index
      %27 = vector.load %arg7[%c0_20, %c0_21, %c0_22] : memref<1x8x512xf32, #tpu.memory_space<vmem>>, vector<1x8x512xf32>
      %28 = vector.shape_cast %27 : vector<1x8x512xf32> to vector<8x512xf32>
      %29 = vector.shape_cast %26 : vector<8x512xf32> to vector<1x8x512xf32>
      tpu.vector_store %arg7[%c0_20, %c0_21, %c0_22], %29 {strides = array<i32>} : memref<1x8x512xf32, #tpu.memory_space<vmem>>, vector<1x8x512xf32>,
    } else {
    }
    return
  }
  func.func @transform_0(%arg0: i32, %arg1: i32, %arg2: i32) -> (i32, i32, i32) {
    %c0_i32 = arith.constant 0 : i32
    return %arg0, %arg2, %arg1 : i32, i32, i32
  }
  func.func @transform_1(%arg0: i32, %arg1: i32, %arg2: i32) -> (i32, i32, i32) {
    %c0_i32 = arith.constant 0 : i32
    %c0_i32_0 = arith.constant 0 : i32
    return %arg0, %c0_i32, %arg2 : i32, i32, i32
  }
  func.func @transform_2(%arg0: i32, %arg1: i32, %arg2: i32) -> (i32, i32) {
    %c0_i32 = arith.constant 0 : i32
    %c0_i32_0 = arith.constant 0 : i32
    return %arg2, %c0_i32 : i32, i32
  }
  func.func @transform_3(%arg0: i32, %arg1: i32, %arg2: i32) -> (i32, i32) {
    %c0_i32 = arith.constant 0 : i32
    %c0_i32_0 = arith.constant 0 : i32
    return %arg2, %c0_i32 : i32, i32
  }
  func.func @transform_4(%arg0: i32, %arg1: i32, %arg2: i32) -> (i32, i32, i32) {
    %c0_i32 = arith.constant 0 : i32
    %c0_i32_0 = arith.constant 0 : i32
    return %arg0, %c0_i32, %arg1 : i32, i32, i32
  }
}

</mosaic_0001>

<bundles_post_ra>
// kernel: _lambda_.6
= control target key start
LH: loop header
LB: loop body
LE: loop exit
PB: predicated region body
PF: predicated region fallthrough
CT: control target
= control target key end

     0   :  { %7 = vsyncpa [#allocation3], 0  ;;  %s924_s0 = inlined_call_operand.hbm [shape: f32[2,16], index: 0, kind: input, shape index: {}]   ;;  %s925_s1 = inlined_call_operand.hbm [shape: f32[16,2048], index: 1, kind: input, shape index: {}]   ;;  %s926_s2 = inlined_call_operand.vmem [shape: f32[2,2048], index: 2, kind: output, shape index: {}]  }
   0x1   :  { %8 = vsyncpa [#allocation5], 0  ;;  %s834_s9 = smov [#allocation2]   ;;  %s835_s11 = smov [#allocation4]  }
   0x2   :  { %s15_s10 = sshll.u32 %s834_s9, 4  ;;  %s24_s12 = sshll.u32 %s835_s11, 4  ;;  %s16_s10 = int_to_ptr.vmem [resolvable:$true] %s15_s10  ;;  %s855_s12 = int_to_ptr.vmem [resolvable:$true] %s24_s12 }
   0x3   :  { %s786_s15 = scalar_lea.hbm %s924_s0, 32 }
   0x4   :  { %p787_p0 = scmp.ne.s32.totalorder %s924_s0, %s786_s15  ;;  %p790_p1 = scmp.lt.u32.totalorder %s786_s15, %s924_s0 }
   0x6   :  { %p792_p2 = pnand %p790_p1, %p787_p0 }
   0x8   :  { %795 = shalt.err (!%p792_p2)
}
   0x9   :  { %s796_s20 = scalar_lea.vmem %s16_s10, 32  ;;  %p801_p4 = scmp.lt.s32.totalorder %s16_s10, %s16_s10 }
   0xa   :  { %p797_p3 = scmp.ne.s32.totalorder %s16_s10, %s796_s20  ;;  %p802_p5 = scmp.lt.s32.totalorder %s796_s20, %s796_s20 }
   0xc   :  { %p803_p6 = por %p802_p5, %p801_p4 }
   0xe   :  { %p804_p7 = pnand %p803_p6, %p797_p3 }
  0x10   :  { %807 = shalt.err (!%p804_p7)
}
  0x11   :  { %18 = dma.hbm_to_vmem [thread:$0]  %s924_s0, 32, %s16_s10, [#allocation3]  }
  0x12   :  { %s808_s25 = scalar_lea.hbm %s925_s1, 4096 }
  0x13   :  { %p809_p8 = scmp.ne.s32.totalorder %s925_s1, %s808_s25  ;;  %p812_p9 = scmp.lt.u32.totalorder %s808_s25, %s925_s1 }
  0x15   :  { %p814_p10 = pnand %p812_p9, %p809_p8 }
  0x17   :  { %817 = shalt.err (!%p814_p10)
}
  0x18   :  { %s818_s30 = scalar_lea.vmem %s855_s12, 4096  ;;  %p823_p12 = scmp.lt.s32.totalorder %s855_s12, %s855_s12 }
  0x19   :  { %p819_p11 = scmp.ne.s32.totalorder %s855_s12, %s818_s30  ;;  %p824_p13 = scmp.lt.s32.totalorder %s818_s30, %s818_s30 }
  0x1b   :  { %p825_p0 = por %p824_p13, %p823_p12 }
  0x1d   :  { %p826_p1 = pnand %p825_p0, %p819_p11 }
  0x1f   :  { %829 = shalt.err (!%p826_p1)
}
  0x20   :  { %s836_s0 = smov 2048   ;;  %s837_s3 = smov 128  }
  0x21   :  { %30 = dma.hbm_to_vmem [thread:$0]  %s925_s1, 4096, %s855_s12, [#allocation5], %s836_s0, %s836_s0, %s837_s3  }
  0x22   :  { %830 = dma.done.wait [#allocation3], 32  }
  0x23   :  { %831 = vsyncadd [#allocation3], 4294967264 }
  0x24   :  { %832 = dma.done.wait [#allocation5], 4096  }
  0x25   :  { %833 = vsyncadd [#allocation5], 4294963200  ;;  %v838_v0 = vmov 0.0   ;;  %v39_v1 = vld [vmem:[#allocation4 + $0x8] sm:$0xff]  ;;  %v41_v3 = vld [vmem:[#allocation4 + $0x18] sm:$0xff]  ;;  %vm70_vm0 = vcmask 130048   ;;  %v663_v52 = vlaneseq }
  0x26   :  { %138 = vmatprep.mubr.f32.mxu0 %v838_v0  ;;  %209 = vmatprep.mubr.f32.mxu1 %v838_v0  ;;  %v55_v2 = vld [vmem:[#allocation4 + $0x88] sm:$0xff]  ;;  %v57_v5 = vld [vmem:[#allocation4 + $0x98] sm:$0xff]  ;;  %v38_v6 = vld [vmem:[#allocation4] sm:$0xff]  ;;  %v839_v50 = vmov 1983009808  }
  0x27   :  { %v748_v4 = vpack.c.bf16 %v55_v2, %v39_v1  ;;  %v54_v7 = vld [vmem:[#allocation4 + $0x80] sm:$0xff]  ;;  %v752_v8 = vpack.c.bf16 %v57_v5, %v41_v3  ;;  %v40_v10 = vld [vmem:[#allocation4 + $0x10] sm:$0xff]  ;;  %v888_v12 = vld [vmem:[#allocation2] sm:$0x3]  ;;  %v661_v51 = vunpack.c.l.s4 %v839_v50  ;;  %v664_v54 = vshrl.u32 %v663_v52, 7 }
  0x28   :  { %v750_v9 = vpack.c.bf16 %v54_v7, %v38_v6  ;;  %v56_v11 = vld [vmem:[#allocation4 + $0x90] sm:$0xff]  ;;  %v43_v14 = vld [vmem:[#allocation4 + $0x28] sm:$0xff]  ;;  %v45_v16 = vld [vmem:[#allocation4 + $0x38] sm:$0xff] }
  0x29   :  { %749 = vmatprep.subr.bf16.mxu0 %v748_v4  ;;  %v754_v13 = vpack.c.bf16 %v56_v11, %v40_v10  ;;  %v59_v15 = vld [vmem:[#allocation4 + $0xa8] sm:$0xff]  ;;  %753 = vmatprep.subr.bf16.mxu1 %v752_v8  ;;  %v61_v18 = vld [vmem:[#allocation4 + $0xb8] sm:$0xff]  ;;  %v42_v19 = vld [vmem:[#allocation4 + $0x20] sm:$0xff]  ;;  %v662_v53 = vunpack.c.0.s8 %v661_v51 }
  0x2a   :  { %751 = vmatpush1.bf16.msra.mxu0 %v750_v9  ;;  %v756_v17 = vpack.c.bf16 %v59_v15, %v43_v14  ;;  %v58_v20 = vld [vmem:[#allocation4 + $0xa0] sm:$0xff]  ;;  %v760_v21 = vpack.c.bf16 %v61_v18, %v45_v16  ;;  %v44_v23 = vld [vmem:[#allocation4 + $0x30] sm:$0xff]  ;;  %v47_v25 = vld [vmem:[#allocation4 + $0x48] sm:$0xff] }
  0x2b   :  { %755 = vmatpush1.bf16.msra.mxu1 %v754_v13  ;;  %v758_v22 = vpack.c.bf16 %v58_v20, %v42_v19  ;;  %v60_v24 = vld [vmem:[#allocation4 + $0xb0] sm:$0xff]  ;;  %v63_v27 = vld [vmem:[#allocation4 + $0xc8] sm:$0xff]  ;;  %v49_v28 = vld [vmem:[#allocation4 + $0x58] sm:$0xff]  ;;  %v665_v56 = vsub.s32 %v662_v53, %v664_v54 }
  0x2c   :  { %757 = vmatprep.subr.bf16.mxu0 %v756_v17  ;;  %v762_v26 = vpack.c.bf16 %v60_v24, %v44_v23  ;;  %v65_v29 = vld [vmem:[#allocation4 + $0xd8] sm:$0xff]  ;;  %761 = vmatprep.subr.bf16.mxu1 %v760_v21  ;;  %v764_v30 = vpack.c.bf16 %v63_v27, %v47_v25  ;;  %v46_v32 = vld [vmem:[#allocation4 + $0x40] sm:$0xff]  ;;  %v48_v34 = vld [vmem:[#allocation4 + $0x50] sm:$0xff] }
  0x2d   :  { %740 = vmatmul.mubr.msk.f32.vlgmr.msra.gmra.mrb[0].mxu0 %vm70_vm0, %v888_v12  ;;  %v768_v31 = vpack.c.bf16 %v65_v29, %v49_v28  ;;  %v62_v33 = vld [vmem:[#allocation4 + $0xc0] sm:$0xff]  ;;  %v64_v36 = vld [vmem:[#allocation4 + $0xd0] sm:$0xff]  ;;  %v51_v37 = vld [vmem:[#allocation4 + $0x68] sm:$0xff] }
  0x2e   :  { %741 = vmatmul.mubr.msk.f32.vlgmr.msra.gmra.mrb[0].mxu1 %vm70_vm0, %v888_v12  ;;  %759 = vmatpush1.bf16.msra.mxu0 %v758_v22  ;;  %v766_v35 = vpack.c.bf16 %v62_v33, %v46_v32  ;;  %v67_v38 = vld [vmem:[#allocation4 + $0xe8] sm:$0xff]  ;;  %v770_v39 = vpack.c.bf16 %v64_v36, %v48_v34  ;;  %v53_v40 = vld [vmem:[#allocation4 + $0x78] sm:$0xff]  ;;  %v50_v42 = vld [vmem:[#allocation4 + $0x60] sm:$0xff] }
  0x2f   :  { %763 = vmatpush1.bf16.msra.mxu1 %v762_v26  ;;  %280 = vmatprep.mubr.f32.mxu0 %v838_v0  ;;  %v69_v41 = vld [vmem:[#allocation4 + $0xf8] sm:$0xff]  ;;  %v772_v43 = vpack.c.bf16 %v67_v38, %v51_v37  ;;  %v66_v44 = vld [vmem:[#allocation4 + $0xe0] sm:$0xff]  ;;  %v52_v45 = vld [vmem:[#allocation4 + $0x70] sm:$0xff] }
  0x30   :  { %351 = vmatprep.mubr.f32.mxu1 %v838_v0  ;;  %765 = vmatprep.subr.bf16.mxu0 %v764_v30  ;;  %v68_v46 = vld [vmem:[#allocation4 + $0xf0] sm:$0xff]  ;;  %v776_v47 = vpack.c.bf16 %v69_v41, %v53_v40  ;;  %v774_v48 = vpack.c.bf16 %v66_v44, %v50_v42 }
  0x31   :  { %742 = vmatmul.mubr.msk.f32.vlgmr.msra.gmra.mrb[2].mxu0 %vm70_vm0, %v888_v12  ;;  %769 = vmatprep.subr.bf16.mxu1 %v768_v31  ;;  %v778_v49 = vpack.c.bf16 %v68_v46, %v52_v45 }
  0x32   :  { %743 = vmatmul.mubr.msk.f32.vlgmr.msra.gmra.mrb[2].mxu1 %vm70_vm0, %v888_v12  ;;  %767 = vmatpush1.bf16.msra.mxu0 %v766_v35 }
  0x33   :  { %771 = vmatpush1.bf16.msra.mxu1 %v770_v39  ;;  %422 = vmatprep.mubr.f32.mxu0 %v838_v0 }
  0x34   :  { %493 = vmatprep.mubr.f32.mxu1 %v838_v0  ;;  %773 = vmatprep.subr.bf16.mxu0 %v772_v43 }
  0x35   :  { %744 = vmatmul.mubr.msk.f32.vlgmr.msra.gmra.mrb[4].mxu0 %vm70_vm0, %v888_v12  ;;  %777 = vmatprep.subr.bf16.mxu1 %v776_v47 }
  0x36   :  { %745 = vmatmul.mubr.msk.f32.vlgmr.msra.gmra.mrb[4].mxu1 %vm70_vm0, %v888_v12  ;;  %775 = vmatpush1.bf16.msra.mxu0 %v774_v48 }
  0x37   :  { %779 = vmatpush1.bf16.msra.mxu1 %v778_v49  ;;  %564 = vmatprep.mubr.f32.mxu0 %v838_v0 }
  0x38   :  { %635 = vmatprep.mubr.f32.mxu1 %v838_v0 }
  0x39   :  { %746 = vmatmul.mubr.msk.f32.vlgmr.msra.gmra.mrb[6].mxu0 %vm70_vm0, %v888_v12 }
  0x3a   :  { %747 = vmatmul.mubr.msk.f32.vlgmr.msra.gmra.mrb[6].mxu1 %vm70_vm0, %v888_v12 }
 0x100   :  { %v140_v55 = vpop.f32.mrb[0].mxu0 }
 0x101   :  { %v211_v57 = vpop.f32.mrb[0].mxu1  ;;  %v142_v58 = vpop.f32.mrb[1].mxu0 }
 0x102   :  { %v658_v59 = vcombine.low %v140_v55, %v142_v58  ;;  %v213_v60 = vpop.f32.mrb[1].mxu1 }
 0x103   :  { %v659_v61 = vcombine.low %v211_v57, %v213_v60 }
 0x104   :  { %v666_v62 = vrot.slane %v658_v59, %v665_v56  ;;  %v282_v63 = vpop.f32.mrb[2].mxu0 }
 0x105   :  { %v673_v0 = vrot.slane %v659_v61, %v665_v56  ;;  %v353_v1 = vpop.f32.mrb[2].mxu1  ;;  %v284_v2 = vpop.f32.mrb[3].mxu0 }
 0x106   :  { %v675_v3 = vcombine.low %v282_v63, %v284_v2  ;;  %v355_v4 = vpop.f32.mrb[3].mxu1 }
 0x107   :  { %v674_v5 = vcombine.low %v666_v62, %v673_v0  ;;  %v676_v6 = vcombine.low %v353_v1, %v355_v4 }
 0x108   :  { %v683_v7 = vrot.slane %v675_v3, %v665_v56  ;;  %v424_v8 = vpop.f32.mrb[4].mxu0 }
 0x109   :  { %730 = vst [vmem:[%s926_s2] sm:$0xff] %v674_v5  ;;  %v690_v9 = vrot.slane %v676_v6, %v665_v56  ;;  %v495_v10 = vpop.f32.mrb[4].mxu1  ;;  %v426_v11 = vpop.f32.mrb[5].mxu0 }
 0x10a   :  { %v692_v12 = vcombine.low %v424_v8, %v426_v11  ;;  %v497_v13 = vpop.f32.mrb[5].mxu1 }
 0x10b   :  { %v691_v14 = vcombine.low %v683_v7, %v690_v9  ;;  %v693_v15 = vcombine.low %v495_v10, %v497_v13 }
 0x10c   :  { %v700_v16 = vrot.slane %v692_v12, %v665_v56  ;;  %v566_v17 = vpop.f32.mrb[6].mxu0 }
 0x10d   :  { %731 = vst [vmem:[%s926_s2 + $0x8] sm:$0xff] %v691_v14  ;;  %v707_v18 = vrot.slane %v693_v15, %v665_v56  ;;  %v637_v19 = vpop.f32.mrb[6].mxu1  ;;  %v568_v20 = vpop.f32.mrb[7].mxu0 }
 0x10e   :  { %v709_v21 = vcombine.low %v566_v17, %v568_v20  ;;  %v639_v22 = vpop.f32.mrb[7].mxu1 }
 0x10f   :  { %v708_v23 = vcombine.low %v700_v16, %v707_v18  ;;  %v710_v24 = vcombine.low %v637_v19, %v639_v22 }
 0x110   :  { %v717_v25 = vrot.slane %v709_v21, %v665_v56 }
 0x111   :  { %732 = vst [vmem:[%s926_s2 + $0x10] sm:$0xff] %v708_v23  ;;  %v724_v26 = vrot.slane %v710_v24, %v665_v56 }
 0x113   :  { %v725_v27 = vcombine.low %v717_v25, %v724_v26 }
 0x115   :  { %733 = vst [vmem:[%s926_s2 + $0x18] sm:$0xff] %v725_v27 }
 0x116   :  { %738 = vsyncpa [#allocation3], 1 }
 0x117   :  { %739 = vsyncpa [#allocation5], 1 }

// kernel: _lambda_.7
= control target key start
LH: loop header
LB: loop body
LE: loop exit
PB: predicated region body
PF: predicated region fallthrough
CT: control target
= control target key end

     0   :  { %s1997_s0 = inlined_call_operand.vmem [shape: f32[4,512,128], index: 0, kind: input, shape index: {}]   ;;  %s1998_s1 = inlined_call_operand.vmem [shape: f32[4,64,512], index: 1, kind: input, shape index: {}]   ;;  %s1999_s2 = inlined_call_operand.vmem [shape: f32[512,1], index: 2, kind: input, shape index: {}]   ;;  %s2000_s3 = inlined_call_operand.vmem [shape: f32[512,1], index: 3, kind: input, shape index: {}]   ;;  %s2001_s4 = inlined_call_operand.vmem [shape: f32[4,64,128], index: 4, kind: output, shape index: {0}]   ;;  %s2002_s5 = inlined_call_operand.vmem [shape: f32[4,1,64,128], index: 5, kind: output, shape index: {1}]  }
   0x1   :  { %2003 = sst [smem:[#allocation4_spill]] %s1998_s1 }
   0x2   :  { %s1719_s18 = smov 0   ;;  %s1721_s19 = smov 0  }
   0x3   :  { %s1723_s20 = smov 0   ;;  %s1725_s21 = smov 0  }
   0x4   :  { %s1727_s22 = smov 0   ;;  %s1729_s23 = smov 0  }
   0x5   :  { %s1731_s24 = smov 0  }
   0x6 LB: > { %s28_s25 = sadd.s32 1, %s1677_s22  ;;  %s35_s26 = sadd.s32 1, %s1681_s23  ;;  %s1685_s24 = sphi %s1731_s24, %s16_s24   ;;  %s1681_s23 = sphi %s1729_s23, %s2010_s23   ;;  %s1677_s22 = sphi %s1727_s22, %s2009_s22   ;;  %s1673_s21 = sphi %s1725_s21, %s2008_s21   ;;  %s1669_s20 = sphi %s1723_s20, %s2007_s20   ;;  %s1665_s19 = sphi %s1721_s19, %s2006_s19   ;;  %s1661_s18 = sphi %s1719_s18, %s2005_s18  }
   0x7   : > { %p29_p0 = scmp.ge.s32.totalorder %s28_s25, 2  ;;  %p81_p1 = scmp.ne.s32.totalorder %s1665_s19, %s1661_s18 }
   0x8   : > { %p82_p2 = scmp.eq.s32.totalorder %s1685_s24, 0  ;;  %s74_s30 = sadd.s32 1, %s1665_s19 }
   0x9   : > { %s2012_s25 = smov (%p29_p0, %s28_s25), 0  ;;  %s2014_s26 = smov (!%p29_p0, %s35_s26), %s1681_s23 }
   0xa   : > { %p83_p3 = por %p82_p2, %p81_p1  ;;  %p37_p4 = scmp.ge.s32.totalorder %s2014_s26, 4 }
   0xb   : > { %s70_s27 = ssub.s32 %s1677_s22, %s2012_s25  ;;  %p1443_p6 = scmp.ge.s32.totalorder %s1685_s24, 8 }
   0xc   : > { %s2016_s26 = smov (%p37_p4, %s2014_s26), 0 }
   0xd   : > { %s69_s28 = ssub.s32 %s1681_s23, %s2016_s26  ;;  %215 = sbr.rel (%p1443_p6) target bundleno = 38 (0x26), region = 16 }
   0xe   : > { %s71_s29 = sor.u32 %s70_s27, %s69_s28 }
   0xf   : > { %p72_p5 = scmp.eq.s32.totalorder %s71_s29, 0 }
  0x11   : > { %s1770_s6 = scalar_select %p72_p5, %s1665_s19, %s74_s30  }
  0x14   : > { %234 = sbr.rel (!%p83_p3) target bundleno = 38 (0x26), region = 24  ;;  %s236_s7 = sand.u32 (%p83_p3), 1, %s1665_s19  }
  0x15   : > { %s1445_s8 = sshll.u32 (%p83_p3), %s1677_s22, 1  ;;  %s1444_s9 = sshll.u32 (%p83_p3), %s236_s7, 7 }
  0x16   : > { %s1446_s10 = sshll.u32 (%p83_p3), %s1681_s23, 5  ;;  %s2004_s1 = sld [smem:[#allocation4_spill]] (%p83_p3) }
  0x17   : > { %s241_s11 = sadd.s32 (%p83_p3), %s1446_s10, %s1445_s8  ;;  %s238_s16 = scalar_lea.vmem (%p83_p3), [#allocation3], %s1444_s9 }
  0x18   : > { %s1447_s12 = sshll.u32 (%p83_p3), %s241_s11, 3 }
  0x1c   : > { %s1779_s15 = scalar_lea.vmem %s2004_s1, %s1447_s12 }
  0x1d   : > { %v256_v0 = vld [vmem:[%s1779_s15] sm:$0xff]  ;;  %v258_v1 = vld [vmem:[%s1779_s15 + $0x8] sm:$0xff] }
  0x1e   : > { %v260_v2 = vld [vmem:[%s1779_s15 + $0x20] sm:$0xff]  ;;  %257 = vst [vmem:[%s238_s16] sm:$0xff] %v256_v0  ;;  %259 = vst [vmem:[%s238_s16 + $0x8] sm:$0xff] %v258_v1  ;;  %v262_v3 = vld [vmem:[%s1779_s15 + $0x28] sm:$0xff] }
  0x1f   : > { %261 = vst [vmem:[%s238_s16 + $0x10] sm:$0xff] %v260_v2  ;;  %v264_v4 = vld [vmem:[%s1779_s15 + $0x40] sm:$0xff]  ;;  %v266_v5 = vld [vmem:[%s1779_s15 + $0x48] sm:$0xff]  ;;  %263 = vst [vmem:[%s238_s16 + $0x18] sm:$0xff] %v262_v3 }
  0x20   : > { %265 = vst [vmem:[%s238_s16 + $0x20] sm:$0xff] %v264_v4  ;;  %267 = vst [vmem:[%s238_s16 + $0x28] sm:$0xff] %v266_v5  ;;  %v268_v6 = vld [vmem:[%s1779_s15 + $0x60] sm:$0xff]  ;;  %v270_v7 = vld [vmem:[%s1779_s15 + $0x68] sm:$0xff] }
  0x21   : > { %v272_v8 = vld [vmem:[%s1779_s15 + $0x80] sm:$0xff]  ;;  %269 = vst [vmem:[%s238_s16 + $0x30] sm:$0xff] %v268_v6  ;;  %271 = vst [vmem:[%s238_s16 + $0x38] sm:$0xff] %v270_v7  ;;  %v274_v9 = vld [vmem:[%s1779_s15 + $0x88] sm:$0xff] }
  0x22   : > { %273 = vst [vmem:[%s238_s16 + $0x40] sm:$0xff] %v272_v8  ;;  %v276_v10 = vld [vmem:[%s1779_s15 + $0xa0] sm:$0xff]  ;;  %v278_v11 = vld [vmem:[%s1779_s15 + $0xa8] sm:$0xff]  ;;  %275 = vst [vmem:[%s238_s16 + $0x48] sm:$0xff] %v274_v9 }
  0x23   : > { %277 = vst [vmem:[%s238_s16 + $0x50] sm:$0xff] %v276_v10  ;;  %279 = vst [vmem:[%s238_s16 + $0x58] sm:$0xff] %v278_v11  ;;  %v280_v12 = vld [vmem:[%s1779_s15 + $0xc0] sm:$0xff]  ;;  %v282_v13 = vld [vmem:[%s1779_s15 + $0xc8] sm:$0xff] }
  0x24   : > { %v284_v14 = vld [vmem:[%s1779_s15 + $0xe0] sm:$0xff]  ;;  %281 = vst [vmem:[%s238_s16 + $0x60] sm:$0xff] %v280_v12  ;;  %283 = vst [vmem:[%s238_s16 + $0x68] sm:$0xff] %v282_v13  ;;  %v286_v15 = vld [vmem:[%s1779_s15 + $0xe8] sm:$0xff] }
  0x25   : > { %285 = vst [vmem:[%s238_s16 + $0x70] sm:$0xff] %v284_v14  ;;  %287 = vst [vmem:[%s238_s16 + $0x78] sm:$0xff] %v286_v15 }
  0x26 PF: > { %p1448_p7 = scmp.ge.s32.totalorder %s1685_s24, 1  ;;  %p310_p8 = scmp.lt.s32.totalorder %s1685_s24, 9 }
  0x28   : > { %p311_p9 = pnand %p1448_p7, %p310_p8 }
  0x29   : > { %s317_s17 = sand.u32 (!%p311_p9), 1, %s1661_s18   ;;  %s1450_s27 = sshll.u32 (!%p311_p9), %s1669_s20, 5 }
  0x2a   : > { %314 = sbr.rel (%p311_p9) target bundleno = 732 (0x2dc), region = 55  ;;  %s1449_s28 = sshll.u32 (!%p311_p9), %s317_s17, 7 }
  0x2b   : > { %p379_p10 = scmp.lt.s32.totalorder (!%p311_p9), %s1673_s21, 3  ;;  %p381_p11 = scmp.lt.s32.totalorder (!%p311_p9), %s1450_s27, 63 }
  0x2c   : > { %s1828_s10 = scalar_lea.vmem (!%p311_p9), [#allocation3], %s1449_s28  ;;  %p1461_p12 = scmp.ne.s32.totalorder (!%p311_p9), %s1669_s20, 0 }
  0x31   : > { %s2018_s21 = smov (!%p379_p10, %s1673_s21), 3  ;;  %s2020_s27 = smov (!%p381_p11, %s1450_s27), 63 }
  0x32   : > { %s1451_s29 = sshll.u32 %s2018_s21, 6  ;;  %s1454_s7 = sshll.u32 %s2020_s27, 3  ;;  %v1687_v16 = vmov (!%p1461_p12), 0.0  }
  0x33   : > { %s387_s30 = sadd.s32 %s1451_s29, %s2020_s27  ;;  %s1806_s11 = scalar_lea.vmem %s1999_s2, %s1454_s7  ;;  %425 = vst [vmem:[#allocation2] sm:$0xff] (!%p1461_p12), %v1687_v16  ;;  %426 = vst [vmem:[#allocation2 + $0x8] sm:$0xff] (!%p1461_p12), %v1687_v16 }
  0x34   : > { %s1452_s8 = sshll.u32 %s387_s30, 3  ;;  %s1816_s16 = scalar_lea.vmem %s2000_s3, %s1454_s7  ;;  %427 = vst [vmem:[#allocation2 + $0x10] sm:$0xff] (!%p1461_p12), %v1687_v16  ;;  %428 = vst [vmem:[#allocation2 + $0x18] sm:$0xff] (!%p1461_p12), %v1687_v16 }
  0x35   : > { %s1811_s14 = scalar_lea.vmem %s1997_s0, %s1452_s8  ;;  %s1821_s27 = scalar_lea.vmem %s2001_s4, %s1451_s29  ;;  %429 = vst [vmem:[#allocation2 + $0x20] sm:$0xff] (!%p1461_p12), %v1687_v16  ;;  %430 = vst [vmem:[#allocation2 + $0x28] sm:$0xff] (!%p1461_p12), %v1687_v16 }
  0x36   : > { %s1826_s9 = scalar_lea.vmem %s2002_s5, %s1451_s29  ;;  %424 = sbr.rel (%p1461_p12) target bundleno = 61 (0x3d), region = 63  ;;  %431 = vst [vmem:[#allocation2 + $0x30] sm:$0xff] (!%p1461_p12), %v1687_v16  ;;  %432 = vst [vmem:[#allocation2 + $0x38] sm:$0xff] (!%p1461_p12), %v1687_v16 }
  0x3d PF: > { %v481_v17 = vld [vmem:[%s1806_s11 + $0x80] sm:$0xff]  ;;  %v1688_v19 = vmov 0   ;;  %v482_v20 = vld [vmem:[%s1806_s11 + $0x88] sm:$0xff]  ;;  %v483_v26 = vld [vmem:[%s1806_s11 + $0x90] sm:$0xff]  ;;  %p1462_p13 = scmp.ne.s32.totalorder %s1669_s20, 1 }
  0x3e   : > { %v465_v18 = vld [vmem:[%s1806_s11] sm:$0xff]  ;;  %1630 = vset.pattern.permute.xlu1 %v1688_v19  ;;  %1629 = vset.pattern.permute.xlu0 %v1688_v19  ;;  %v466_v21 = vld [vmem:[%s1806_s11 + $0x8] sm:$0xff]  ;;  %v484_v27 = vld [vmem:[%s1806_s11 + $0x98] sm:$0xff] }
  0x3f   : > { %579 = vperm.xlu0 %1629, %v481_v17   ;;  %499 = vperm.xlu1 %1630, %v465_v18   ;;  %v705_v22 = vld [vmem:[%s1816_s16 + $0x80] sm:$0xff]  ;;  %v706_v23 = vld [vmem:[%s1816_s16 + $0x88] sm:$0xff]  ;;  %v467_v28 = vld [vmem:[%s1806_s11 + $0x10] sm:$0xff] }
  0x40   : > { %v689_v24 = vld [vmem:[%s1816_s16] sm:$0xff]  ;;  %v690_v25 = vld [vmem:[%s1816_s16 + $0x8] sm:$0xff]  ;;  %v468_v29 = vld [vmem:[%s1806_s11 + $0x18] sm:$0xff] }
  0x41   : > { %v707_v30 = vld [vmem:[%s1816_s16 + $0x90] sm:$0xff]  ;;  %v708_v31 = vld [vmem:[%s1816_s16 + $0x98] sm:$0xff]  ;;  %v485_v34 = vld [vmem:[%s1806_s11 + $0xa0] sm:$0xff] }
  0x42   : > { %v691_v32 = vld [vmem:[%s1816_s16 + $0x10] sm:$0xff]  ;;  %v692_v33 = vld [vmem:[%s1816_s16 + $0x18] sm:$0xff]  ;;  %v486_v35 = vld [vmem:[%s1806_s11 + $0xa8] sm:$0xff] }
  0x43   : > { %584 = vperm.xlu0 %1629, %v482_v20   ;;  %504 = vperm.xlu1 %1630, %v466_v21   ;;  %v469_v36 = vld [vmem:[%s1806_s11 + $0x20] sm:$0xff]  ;;  %v470_v37 = vld [vmem:[%s1806_s11 + $0x28] sm:$0xff]  ;;  %v487_v42 = vld [vmem:[%s1806_s11 + $0xb0] sm:$0xff] }
  0x44   : > { %v709_v38 = vld [vmem:[%s1816_s16 + $0xa0] sm:$0xff]  ;;  %v710_v39 = vld [vmem:[%s1816_s16 + $0xa8] sm:$0xff]  ;;  %v488_v43 = vld [vmem:[%s1806_s11 + $0xb8] sm:$0xff] }
  0x45   : > { %v693_v40 = vld [vmem:[%s1816_s16 + $0x20] sm:$0xff]  ;;  %v694_v41 = vld [vmem:[%s1816_s16 + $0x28] sm:$0xff]  ;;  %v471_v44 = vld [vmem:[%s1806_s11 + $0x30] sm:$0xff] }
  0x46   : > { %v472_v45 = vld [vmem:[%s1806_s11 + $0x38] sm:$0xff]  ;;  %v711_v46 = vld [vmem:[%s1816_s16 + $0xb0] sm:$0xff]  ;;  %v489_v50 = vld [vmem:[%s1806_s11 + $0xc0] sm:$0xff] }
  0x47   : > { %803 = vperm.xlu0 %1629, %v705_v22   ;;  %808 = vperm.xlu1 %1630, %v706_v23   ;;  %v712_v47 = vld [vmem:[%s1816_s16 + $0xb8] sm:$0xff]  ;;  %v695_v48 = vld [vmem:[%s1816_s16 + $0x30] sm:$0xff]  ;;  %v490_v51 = vld [vmem:[%s1806_s11 + $0xc8] sm:$0xff] }
  0x48   : > { %v696_v49 = vld [vmem:[%s1816_s16 + $0x38] sm:$0xff]  ;;  %v473_v52 = vld [vmem:[%s1806_s11 + $0x40] sm:$0xff]  ;;  %v474_v53 = vld [vmem:[%s1806_s11 + $0x48] sm:$0xff] }
  0x49   : > { %v713_v54 = vld [vmem:[%s1816_s16 + $0xc0] sm:$0xff]  ;;  %v714_v55 = vld [vmem:[%s1816_s16 + $0xc8] sm:$0xff]  ;;  %v491_v58 = vld [vmem:[%s1806_s11 + $0xd0] sm:$0xff] }
  0x4a   : > { %v697_v56 = vld [vmem:[%s1816_s16 + $0x40] sm:$0xff]  ;;  %v698_v57 = vld [vmem:[%s1816_s16 + $0x48] sm:$0xff]  ;;  %v492_v59 = vld [vmem:[%s1806_s11 + $0xd8] sm:$0xff] }
  0x4b   : > { %723 = vperm.xlu0 %1629, %v689_v24   ;;  %728 = vperm.xlu1 %1630, %v690_v25   ;;  %v475_v60 = vld [vmem:[%s1806_s11 + $0x50] sm:$0xff]  ;;  %v476_v61 = vld [vmem:[%s1806_s11 + $0x58] sm:$0xff]  ;;  %v493_v2 = vld [vmem:[%s1806_s11 + $0xe0] sm:$0xff] }
  0x4c   : > { %v715_v62 = vld [vmem:[%s1816_s16 + $0xd0] sm:$0xff]  ;;  %v716_v63 = vld [vmem:[%s1816_s16 + $0xd8] sm:$0xff]  ;;  %v494_v3 = vld [vmem:[%s1806_s11 + $0xe8] sm:$0xff] }
  0x4d   : > { %v699_v0 = vld [vmem:[%s1816_s16 + $0x50] sm:$0xff]  ;;  %v700_v1 = vld [vmem:[%s1816_s16 + $0x58] sm:$0xff]  ;;  %v477_v4 = vld [vmem:[%s1806_s11 + $0x60] sm:$0xff] }
  0x4e   : > { %v478_v5 = vld [vmem:[%s1806_s11 + $0x68] sm:$0xff]  ;;  %v717_v6 = vld [vmem:[%s1816_s16 + $0xe0] sm:$0xff]  ;;  %v495_v10 = vld [vmem:[%s1806_s11 + $0xf0] sm:$0xff] }
  0x4f   : > { %589 = vperm.xlu0 %1629, %v483_v26   ;;  %594 = vperm.xlu1 %1630, %v484_v27   ;;  %v718_v7 = vld [vmem:[%s1816_s16 + $0xe8] sm:$0xff]  ;;  %v701_v8 = vld [vmem:[%s1816_s16 + $0x60] sm:$0xff]  ;;  %v496_v11 = vld [vmem:[%s1806_s11 + $0xf8] sm:$0xff] }
  0x50   : > { %v702_v9 = vld [vmem:[%s1816_s16 + $0x68] sm:$0xff]  ;;  %v479_v12 = vld [vmem:[%s1806_s11 + $0x70] sm:$0xff]  ;;  %v480_v13 = vld [vmem:[%s1806_s11 + $0x78] sm:$0xff] }
  0x51   : > { %v719_v14 = vld [vmem:[%s1816_s16 + $0xf0] sm:$0xff]  ;;  %v720_v15 = vld [vmem:[%s1816_s16 + $0xf8] sm:$0xff]  ;;  %v449_v20 = vld [vmem:[%s1811_s14 + $0x80] sm:$0xff] }
  0x52   : > { %v703_v16 = vld [vmem:[%s1816_s16 + $0x70] sm:$0xff]  ;;  %v704_v17 = vld [vmem:[%s1816_s16 + $0x78] sm:$0xff]  ;;  %v450_v22 = vld [vmem:[%s1811_s14 + $0x88] sm:$0xff] }
  0x53   : > { %509 = vperm.xlu0 %1629, %v467_v28   ;;  %514 = vperm.xlu1 %1630, %v468_v29   ;;  %v1018_v24 = vld [vmem:[%s1828_s10 + $0x8] sm:$0xff]  ;;  %v433_v27 = vld [vmem:[%s1811_s14] sm:$0xff] }
  0x54   : > { %v1026_v25 = vld [vmem:[%s1828_s10 + $0x48] sm:$0xff]  ;;  %1097 = vmatprep.mubr.f32.mxu0 %v1018_v24  ;;  %v437_v24 = vld [vmem:[%s1811_s14 + $0x20] sm:$0xff] }
  0x55   : > { %1117 = vmatprep.mubr.f32.mxu1 %v1026_v25  ;;  %v434_v29 = vld [vmem:[%s1811_s14 + $0x8] sm:$0xff] }
  0x56   : > { %v438_v25 = vld [vmem:[%s1811_s14 + $0x28] sm:$0xff] }
  0x57   : > { %813 = vperm.xlu0 %1629, %v707_v30   ;;  %818 = vperm.xlu1 %1630, %v708_v31  }
  0x5b   : > { %733 = vperm.xlu0 %1629, %v691_v32   ;;  %738 = vperm.xlu1 %1630, %v692_v33  }
  0x5f   : > { %599 = vperm.xlu0 %1629, %v485_v34   ;;  %604 = vperm.xlu1 %1630, %v486_v35  }
  0x63   : > { %519 = vperm.xlu0 %1629, %v469_v36   ;;  %524 = vperm.xlu1 %1630, %v470_v37  }
  0x67   : > { %823 = vperm.xlu0 %1629, %v709_v38   ;;  %828 = vperm.xlu1 %1630, %v710_v39  }
  0x6b   : > { %743 = vperm.xlu0 %1629, %v693_v40   ;;  %748 = vperm.xlu1 %1630, %v694_v41  }
  0x6f   : > { %609 = vperm.xlu0 %1629, %v487_v42   ;;  %614 = vperm.xlu1 %1630, %v488_v43  }
  0x73   : > { %529 = vperm.xlu0 %1629, %v471_v44   ;;  %534 = vperm.xlu1 %1630, %v472_v45  }
  0x77   : > { %833 = vperm.xlu0 %1629, %v711_v46   ;;  %838 = vperm.xlu1 %1630, %v712_v47  }
  0x7b   : > { %753 = vperm.xlu0 %1629, %v695_v48   ;;  %758 = vperm.xlu1 %1630, %v696_v49  }
  0x7f   : > { %619 = vperm.xlu0 %1629, %v489_v50   ;;  %624 = vperm.xlu1 %1630, %v490_v51  }
  0x83   : > { %539 = vperm.xlu0 %1629, %v473_v52   ;;  %544 = vperm.xlu1 %1630, %v474_v53   ;;  %v451_v52 = vld [vmem:[%s1811_s14 + $0x90] sm:$0xff]  ;;  %v452_v53 = vld [vmem:[%s1811_s14 + $0x98] sm:$0xff] }
  0x87   : > { %843 = vperm.xlu0 %1629, %v713_v54   ;;  %848 = vperm.xlu1 %1630, %v714_v55  }
  0x8b   : > { %763 = vperm.xlu0 %1629, %v697_v56   ;;  %768 = vperm.xlu1 %1630, %v698_v57  }
  0x8f   : > { %629 = vperm.xlu0 %1629, %v491_v58   ;;  %634 = vperm.xlu1 %1630, %v492_v59   ;;  %v435_v58 = vld [vmem:[%s1811_s14 + $0x10] sm:$0xff]  ;;  %v436_v59 = vld [vmem:[%s1811_s14 + $0x18] sm:$0xff] }
  0x93   : > { %549 = vperm.xlu0 %1629, %v475_v60   ;;  %554 = vperm.xlu1 %1630, %v476_v61  }
  0x97   : > { %853 = vperm.xlu0 %1629, %v715_v62   ;;  %858 = vperm.xlu1 %1630, %v716_v63  }
  0x9b   : > { %773 = vperm.xlu0 %1629, %v699_v0   ;;  %778 = vperm.xlu1 %1630, %v700_v1  }
  0x9f   : > { %639 = vperm.xlu0 %1629, %v493_v2   ;;  %644 = vperm.xlu1 %1630, %v494_v3  }
  0xa3   : > { %559 = vperm.xlu0 %1629, %v477_v4   ;;  %564 = vperm.xlu1 %1630, %v478_v5  }
  0xa7   : > { %863 = vperm.xlu0 %1629, %v717_v6   ;;  %868 = vperm.xlu1 %1630, %v718_v7  }
  0xab   : > { %783 = vperm.xlu0 %1629, %v701_v8   ;;  %788 = vperm.xlu1 %1630, %v702_v9  }
  0xaf   : > { %649 = vperm.xlu0 %1629, %v495_v10   ;;  %654 = vperm.xlu1 %1630, %v496_v11  }
  0xb3   : > { %569 = vperm.xlu0 %1629, %v479_v12   ;;  %574 = vperm.xlu1 %1630, %v480_v13  }
  0xb7   : > { %873 = vperm.xlu0 %1629, %v719_v14   ;;  %878 = vperm.xlu1 %1630, %v720_v15  }
  0xbb   : > { %793 = vperm.xlu0 %1629, %v703_v16   ;;  %798 = vperm.xlu1 %1630, %v704_v17  }
  0xbe   : > { %v580_v18 = vpop.permute.xlu0 %579  ;;  %v500_v19 = vpop.permute.xlu1 %499 }
  0xbf   : > { %v673_v26 = vmul.f32 %v580_v18, %v449_v20  ;;  %v657_v34 = vmul.f32 %v500_v19, %v433_v27  ;;  %v453_v18 = vld [vmem:[%s1811_s14 + $0xa0] sm:$0xff]  ;;  %v454_v19 = vld [vmem:[%s1811_s14 + $0xa8] sm:$0xff] }
  0xc2   : > { %v585_v21 = vpop.permute.xlu0 %584  ;;  %v505_v23 = vpop.permute.xlu1 %504 }
  0xc3   : > { %v674_v28 = vmul.f32 %v585_v21, %v450_v22  ;;  %v658_v35 = vmul.f32 %v505_v23, %v434_v29 }
  0xc6   : > { %v804_v30 = vpop.permute.xlu0 %803  ;;  %v809_v31 = vpop.permute.xlu1 %808 }
  0xc7   : > { %v897_v32 = vadd.f32 %v804_v30, %v673_v26  ;;  %v898_v33 = vadd.f32 %v809_v31, %v674_v28 }
  0xc9   : > { %v961_v36 = vmul.f32 0.2, %v897_v32  ;;  %v962_v37 = vmul.f32 0.2, %v898_v33  ;;  %vm929_vm0 = vcmp.gt.f32.partialorder %v897_v32, 0.0  ;;  %vm930_vm1 = vcmp.gt.f32.partialorder %v898_v33, 0.0 }
  0xca   : > { %v724_v38 = vpop.permute.xlu0 %723  ;;  %v729_v39 = vpop.permute.xlu1 %728 }
  0xcb   : > { %v881_v40 = vadd.f32 %v724_v38, %v657_v34  ;;  %v882_v41 = vadd.f32 %v729_v39, %v658_v35  ;;  %v993_v42 = vsel %vm929_vm0, %v897_v32, %v961_v36  ;;  %v994_v43 = vsel %vm930_vm1, %v898_v33, %v962_v37 }
  0xcc   : > { %v1523_v44 = vpack.c.bf16 %v994_v43, %v993_v42 }
  0xcd   : > { %v945_v45 = vmul.f32 0.2, %v881_v40  ;;  %v946_v46 = vmul.f32 0.2, %v882_v41  ;;  %vm913_vm2 = vcmp.gt.f32.partialorder %v881_v40, 0.0  ;;  %vm914_vm3 = vcmp.gt.f32.partialorder %v882_v41, 0.0 }
  0xce   : > { %v590_v47 = vpop.permute.xlu0 %589  ;;  %v595_v48 = vpop.permute.xlu1 %594  ;;  %1524 = vmatprep.subr.bf16.mxu0 %v1523_v44  ;;  %1555 = vmatprep.subr.bf16.mxu1 %v1523_v44 }
  0xcf   : > { %v977_v49 = vsel %vm913_vm2, %v881_v40, %v945_v45  ;;  %v978_v50 = vsel %vm914_vm3, %v882_v41, %v946_v46  ;;  %v675_v56 = vmul.f32 %v590_v47, %v451_v52  ;;  %v676_v57 = vmul.f32 %v595_v48, %v452_v53  ;;  %v455_v48 = vld [vmem:[%s1811_s14 + $0xb0] sm:$0xff] }
  0xd0   : > { %v1525_v51 = vpack.c.bf16 %v978_v50, %v977_v49  ;;  %v456_v49 = vld [vmem:[%s1811_s14 + $0xb8] sm:$0xff] }
  0xd2   : > { %v510_v54 = vpop.permute.xlu0 %509  ;;  %v515_v55 = vpop.permute.xlu1 %514  ;;  %1526 = vmatpush3.bf16.msra.mxu0 %v1525_v51  ;;  %1563 = vmatpush3.bf16.msra.mxu1 %v1525_v51 }
  0xd3   : > { %v659_v0 = vmul.f32 %v510_v54, %v435_v58  ;;  %v660_v1 = vmul.f32 %v515_v55, %v436_v59  ;;  %v439_v54 = vld [vmem:[%s1811_s14 + $0x30] sm:$0xff]  ;;  %v440_v55 = vld [vmem:[%s1811_s14 + $0x38] sm:$0xff] }
  0xd6   : > { %v814_v60 = vpop.permute.xlu0 %813  ;;  %v819_v61 = vpop.permute.xlu1 %818 }
  0xd7   : > { %v899_v62 = vadd.f32 %v814_v60, %v675_v56  ;;  %v900_v63 = vadd.f32 %v819_v61, %v676_v57 }
  0xd9   : > { %vm931_vm4 = vcmp.gt.f32.partialorder %v899_v62, 0.0  ;;  %v963_v2 = vmul.f32 0.2, %v899_v62  ;;  %vm932_vm5 = vcmp.gt.f32.partialorder %v900_v63, 0.0  ;;  %v964_v3 = vmul.f32 0.2, %v900_v63 }
  0xda   : > { %v734_v4 = vpop.permute.xlu0 %733  ;;  %v739_v5 = vpop.permute.xlu1 %738 }
  0xdb   : > { %v883_v6 = vadd.f32 %v734_v4, %v659_v0  ;;  %v884_v7 = vadd.f32 %v739_v5, %v660_v1  ;;  %v995_v8 = vsel %vm931_vm4, %v899_v62, %v963_v2  ;;  %v996_v9 = vsel %vm932_vm5, %v900_v63, %v964_v3 }
  0xdc   : > { %v1527_v10 = vpack.c.bf16 %v996_v9, %v995_v8 }
  0xdd   : > { %vm915_vm6 = vcmp.gt.f32.partialorder %v883_v6, 0.0  ;;  %v947_v11 = vmul.f32 0.2, %v883_v6  ;;  %vm916_vm7 = vcmp.gt.f32.partialorder %v884_v7, 0.0  ;;  %v948_v12 = vmul.f32 0.2, %v884_v7 }
  0xde   : > { %v600_v13 = vpop.permute.xlu0 %599  ;;  %v605_v14 = vpop.permute.xlu1 %604  ;;  %1528 = vmatprep.subr.bf16.mxu0 %v1527_v10  ;;  %1556 = vmatprep.subr.bf16.mxu1 %v1527_v10 }
  0xdf   : > { %v979_v15 = vsel %vm915_vm6, %v883_v6, %v947_v11  ;;  %v980_v16 = vsel %vm916_vm7, %v884_v7, %v948_v12  ;;  %v677_v22 = vmul.f32 %v600_v13, %v453_v18  ;;  %v678_v23 = vmul.f32 %v605_v14, %v454_v19  ;;  %v457_v14 = vld [vmem:[%s1811_s14 + $0xc0] sm:$0xff] }
  0xe0   : > { %v1529_v17 = vpack.c.bf16 %v980_v16, %v979_v15  ;;  %v458_v15 = vld [vmem:[%s1811_s14 + $0xc8] sm:$0xff] }
  0xe2   : > { %v520_v20 = vpop.permute.xlu0 %519  ;;  %v525_v21 = vpop.permute.xlu1 %524  ;;  %1530 = vmatpush3.bf16.msra.mxu0 %v1529_v17  ;;  %1564 = vmatpush3.bf16.msra.mxu1 %v1529_v17 }
  0xe3   : > { %v661_v30 = vmul.f32 %v520_v20, %v437_v24  ;;  %v662_v31 = vmul.f32 %v525_v21, %v438_v25  ;;  %v441_v20 = vld [vmem:[%s1811_s14 + $0x40] sm:$0xff]  ;;  %v442_v21 = vld [vmem:[%s1811_s14 + $0x48] sm:$0xff] }
  0xe6   : > { %v824_v26 = vpop.permute.xlu0 %823  ;;  %v829_v27 = vpop.permute.xlu1 %828 }
  0xe7   : > { %v901_v28 = vadd.f32 %v824_v26, %v677_v22  ;;  %v902_v29 = vadd.f32 %v829_v27, %v678_v23 }
  0xe9   : > { %vm933_vm8 = vcmp.gt.f32.partialorder %v901_v28, 0.0  ;;  %v965_v32 = vmul.f32 0.2, %v901_v28  ;;  %vm934_vm9 = vcmp.gt.f32.partialorder %v902_v29, 0.0  ;;  %v966_v33 = vmul.f32 0.2, %v902_v29 }
  0xea   : > { %v744_v34 = vpop.permute.xlu0 %743  ;;  %v749_v35 = vpop.permute.xlu1 %748 }
  0xeb   : > { %v885_v36 = vadd.f32 %v744_v34, %v661_v30  ;;  %v886_v37 = vadd.f32 %v749_v35, %v662_v31  ;;  %v997_v38 = vsel %vm933_vm8, %v901_v28, %v965_v32  ;;  %v998_v39 = vsel %vm934_vm9, %v902_v29, %v966_v33 }
  0xec   : > { %v1531_v40 = vpack.c.bf16 %v998_v39, %v997_v38 }
  0xed   : > { %vm917_vm10 = vcmp.gt.f32.partialorder %v885_v36, 0.0  ;;  %v949_v41 = vmul.f32 0.2, %v885_v36  ;;  %vm918_vm11 = vcmp.gt.f32.partialorder %v886_v37, 0.0  ;;  %v950_v42 = vmul.f32 0.2, %v886_v37 }
  0xee   : > { %v610_v43 = vpop.permute.xlu0 %609  ;;  %v615_v44 = vpop.permute.xlu1 %614  ;;  %1532 = vmatprep.subr.bf16.mxu0 %v1531_v40  ;;  %1557 = vmatprep.subr.bf16.mxu1 %v1531_v40 }
  0xef   : > { %v981_v45 = vsel %vm917_vm10, %v885_v36, %v949_v41  ;;  %v982_v46 = vsel %vm918_vm11, %v886_v37, %v950_v42  ;;  %v679_v52 = vmul.f32 %v610_v43, %v455_v48  ;;  %v680_v53 = vmul.f32 %v615_v44, %v456_v49  ;;  %v459_v44 = vld [vmem:[%s1811_s14 + $0xd0] sm:$0xff] }
  0xf0   : > { %v1533_v47 = vpack.c.bf16 %v982_v46, %v981_v45  ;;  %v460_v45 = vld [vmem:[%s1811_s14 + $0xd8] sm:$0xff] }
  0xf2   : > { %v530_v50 = vpop.permute.xlu0 %529  ;;  %v535_v51 = vpop.permute.xlu1 %534  ;;  %1534 = vmatpush3.bf16.msra.mxu0 %v1533_v47  ;;  %1565 = vmatpush3.bf16.msra.mxu1 %v1533_v47 }
  0xf3   : > { %v663_v60 = vmul.f32 %v530_v50, %v439_v54  ;;  %v664_v61 = vmul.f32 %v535_v51, %v440_v55  ;;  %v443_v50 = vld [vmem:[%s1811_s14 + $0x50] sm:$0xff]  ;;  %v444_v51 = vld [vmem:[%s1811_s14 + $0x58] sm:$0xff] }
  0xf6   : > { %v834_v56 = vpop.permute.xlu0 %833  ;;  %v839_v57 = vpop.permute.xlu1 %838 }
  0xf7   : > { %v903_v58 = vadd.f32 %v834_v56, %v679_v52  ;;  %v904_v59 = vadd.f32 %v839_v57, %v680_v53 }
  0xf9   : > { %vm935_vm12 = vcmp.gt.f32.partialorder %v903_v58, 0.0  ;;  %v967_v62 = vmul.f32 0.2, %v903_v58  ;;  %vm936_vm13 = vcmp.gt.f32.partialorder %v904_v59, 0.0  ;;  %v968_v63 = vmul.f32 0.2, %v904_v59 }
  0xfa   : > { %v754_v0 = vpop.permute.xlu0 %753  ;;  %v759_v1 = vpop.permute.xlu1 %758 }
  0xfb   : > { %v887_v2 = vadd.f32 %v754_v0, %v663_v60  ;;  %v888_v3 = vadd.f32 %v759_v1, %v664_v61  ;;  %v999_v4 = vsel %vm935_vm12, %v903_v58, %v967_v62  ;;  %v1000_v5 = vsel %vm936_vm13, %v904_v59, %v968_v63 }
  0xfc   : > { %v1535_v6 = vpack.c.bf16 %v1000_v5, %v999_v4 }
  0xfd   : > { %vm919_vm14 = vcmp.gt.f32.partialorder %v887_v2, 0.0  ;;  %v951_v7 = vmul.f32 0.2, %v887_v2  ;;  %vm920_vm15 = vcmp.gt.f32.partialorder %v888_v3, 0.0  ;;  %v952_v8 = vmul.f32 0.2, %v888_v3 }
  0xfe   : > { %v620_v9 = vpop.permute.xlu0 %619  ;;  %v625_v10 = vpop.permute.xlu1 %624  ;;  %1536 = vmatprep.subr.bf16.mxu0 %v1535_v6  ;;  %1558 = vmatprep.subr.bf16.mxu1 %v1535_v6 }
  0xff   : > { %v983_v11 = vsel %vm919_vm14, %v887_v2, %v951_v7  ;;  %v984_v12 = vsel %vm920_vm15, %v888_v3, %v952_v8  ;;  %v681_v18 = vmul.f32 %v620_v9, %v457_v14  ;;  %v682_v19 = vmul.f32 %v625_v10, %v458_v15  ;;  %v461_v10 = vld [vmem:[%s1811_s14 + $0xe0] sm:$0xff] }
 0x100   : > { %v1537_v13 = vpack.c.bf16 %v984_v12, %v983_v11  ;;  %v462_v11 = vld [vmem:[%s1811_s14 + $0xe8] sm:$0xff] }
 0x102   : > { %v540_v16 = vpop.permute.xlu0 %539  ;;  %v545_v17 = vpop.permute.xlu1 %544  ;;  %1538 = vmatpush3.bf16.msra.mxu0 %v1537_v13  ;;  %1566 = vmatpush3.bf16.msra.mxu1 %v1537_v13 }
 0x103   : > { %v665_v26 = vmul.f32 %v540_v16, %v441_v20  ;;  %v666_v27 = vmul.f32 %v545_v17, %v442_v21  ;;  %v445_v16 = vld [vmem:[%s1811_s14 + $0x60] sm:$0xff]  ;;  %v446_v17 = vld [vmem:[%s1811_s14 + $0x68] sm:$0xff] }
 0x106   : > { %v844_v22 = vpop.permute.xlu0 %843  ;;  %v849_v23 = vpop.permute.xlu1 %848 }
 0x107   : > { %v905_v24 = vadd.f32 %v844_v22, %v681_v18  ;;  %v906_v25 = vadd.f32 %v849_v23, %v682_v19 }
 0x109   : > { %vm937_vm0 = vcmp.gt.f32.partialorder %v905_v24, 0.0  ;;  %v969_v28 = vmul.f32 0.2, %v905_v24  ;;  %vm938_vm1 = vcmp.gt.f32.partialorder %v906_v25, 0.0  ;;  %v970_v29 = vmul.f32 0.2, %v906_v25 }
 0x10a   : > { %v764_v30 = vpop.permute.xlu0 %763  ;;  %v769_v31 = vpop.permute.xlu1 %768 }
 0x10b   : > { %v889_v32 = vadd.f32 %v764_v30, %v665_v26  ;;  %v890_v33 = vadd.f32 %v769_v31, %v666_v27  ;;  %v1001_v34 = vsel %vm937_vm0, %v905_v24, %v969_v28  ;;  %v1002_v35 = vsel %vm938_vm1, %v906_v25, %v970_v29 }
 0x10c   : > { %v1539_v36 = vpack.c.bf16 %v1002_v35, %v1001_v34 }
 0x10d   : > { %vm921_vm2 = vcmp.gt.f32.partialorder %v889_v32, 0.0  ;;  %v953_v37 = vmul.f32 0.2, %v889_v32  ;;  %vm922_vm3 = vcmp.gt.f32.partialorder %v890_v33, 0.0  ;;  %v954_v38 = vmul.f32 0.2, %v890_v33 }
 0x10e   : > { %v630_v39 = vpop.permute.xlu0 %629  ;;  %v635_v40 = vpop.permute.xlu1 %634  ;;  %1540 = vmatprep.subr.bf16.mxu0 %v1539_v36  ;;  %1559 = vmatprep.subr.bf16.mxu1 %v1539_v36 }
 0x10f   : > { %v985_v41 = vsel %vm921_vm2, %v889_v32, %v953_v37  ;;  %v986_v42 = vsel %vm922_vm3, %v890_v33, %v954_v38  ;;  %v683_v48 = vmul.f32 %v630_v39, %v459_v44  ;;  %v684_v49 = vmul.f32 %v635_v40, %v460_v45  ;;  %v463_v40 = vld [vmem:[%s1811_s14 + $0xf0] sm:$0xff] }
 0x110   : > { %v1541_v43 = vpack.c.bf16 %v986_v42, %v985_v41  ;;  %v464_v41 = vld [vmem:[%s1811_s14 + $0xf8] sm:$0xff] }
 0x112   : > { %v550_v46 = vpop.permute.xlu0 %549  ;;  %v555_v47 = vpop.permute.xlu1 %554  ;;  %1542 = vmatpush3.bf16.msra.mxu0 %v1541_v43  ;;  %1567 = vmatpush3.bf16.msra.mxu1 %v1541_v43 }
 0x113   : > { %v667_v56 = vmul.f32 %v550_v46, %v443_v50  ;;  %v668_v57 = vmul.f32 %v555_v47, %v444_v51  ;;  %v447_v46 = vld [vmem:[%s1811_s14 + $0x70] sm:$0xff]  ;;  %v448_v47 = vld [vmem:[%s1811_s14 + $0x78] sm:$0xff] }
 0x116   : > { %v854_v52 = vpop.permute.xlu0 %853  ;;  %v859_v53 = vpop.permute.xlu1 %858 }
 0x117   : > { %v907_v54 = vadd.f32 %v854_v52, %v683_v48  ;;  %v908_v55 = vadd.f32 %v859_v53, %v684_v49 }
 0x119   : > { %vm939_vm4 = vcmp.gt.f32.partialorder %v907_v54, 0.0  ;;  %v971_v58 = vmul.f32 0.2, %v907_v54  ;;  %vm940_vm5 = vcmp.gt.f32.partialorder %v908_v55, 0.0  ;;  %v972_v59 = vmul.f32 0.2, %v908_v55 }
 0x11a   : > { %v774_v60 = vpop.permute.xlu0 %773  ;;  %v779_v61 = vpop.permute.xlu1 %778 }
 0x11b   : > { %v891_v62 = vadd.f32 %v774_v60, %v667_v56  ;;  %v892_v63 = vadd.f32 %v779_v61, %v668_v57  ;;  %v1003_v0 = vsel %vm939_vm4, %v907_v54, %v971_v58  ;;  %v1004_v1 = vsel %vm940_vm5, %v908_v55, %v972_v59 }
 0x11c   : > { %v1543_v2 = vpack.c.bf16 %v1004_v1, %v1003_v0 }
 0x11d   : > { %vm923_vm6 = vcmp.gt.f32.partialorder %v891_v62, 0.0  ;;  %v955_v3 = vmul.f32 0.2, %v891_v62  ;;  %vm924_vm7 = vcmp.gt.f32.partialorder %v892_v63, 0.0  ;;  %v956_v4 = vmul.f32 0.2, %v892_v63 }
 0x11e   : > { %v640_v5 = vpop.permute.xlu0 %639  ;;  %v645_v6 = vpop.permute.xlu1 %644  ;;  %1544 = vmatprep.subr.bf16.mxu0 %v1543_v2  ;;  %1560 = vmatprep.subr.bf16.mxu1 %v1543_v2 }
 0x11f   : > { %v987_v7 = vsel %vm923_vm6, %v891_v62, %v955_v3  ;;  %v988_v8 = vsel %vm924_vm7, %v892_v63, %v956_v4  ;;  %v685_v14 = vmul.f32 %v640_v5, %v461_v10  ;;  %v686_v15 = vmul.f32 %v645_v6, %v462_v11  ;;  %v1017_v4 = vld [vmem:[%s1828_s10] sm:$0xff]  ;;  %v1020_v6 = vld [vmem:[%s1828_s10 + $0x18] sm:$0xff]  ;;  %v1022_v10 = vld [vmem:[%s1828_s10 + $0x28] sm:$0xff] }
 0x120   : > { %v1545_v9 = vpack.c.bf16 %v988_v8, %v987_v7  ;;  %v1025_v5 = vld [vmem:[%s1828_s10 + $0x40] sm:$0xff]  ;;  %v1028_v7 = vld [vmem:[%s1828_s10 + $0x58] sm:$0xff]  ;;  %v1019_v8 = vld [vmem:[%s1828_s10 + $0x10] sm:$0xff] }
 0x121   : > { %v1030_v11 = vld [vmem:[%s1828_s10 + $0x68] sm:$0xff] }
 0x122   : > { %v560_v12 = vpop.permute.xlu0 %559  ;;  %v565_v13 = vpop.permute.xlu1 %564  ;;  %1546 = vmatpush3.bf16.msra.mxu0 %v1545_v9  ;;  %1568 = vmatpush3.bf16.msra.mxu1 %v1545_v9  ;;  %v1027_v9 = vld [vmem:[%s1828_s10 + $0x50] sm:$0xff] }
 0x123   : > { %v669_v22 = vmul.f32 %v560_v12, %v445_v16  ;;  %v670_v23 = vmul.f32 %v565_v13, %v446_v17  ;;  %v1021_v12 = vld [vmem:[%s1828_s10 + $0x20] sm:$0xff]  ;;  %v1023_v16 = vld [vmem:[%s1828_s10 + $0x30] sm:$0xff] }
 0x124   : > { %v1029_v13 = vld [vmem:[%s1828_s10 + $0x60] sm:$0xff]  ;;  %v1031_v17 = vld [vmem:[%s1828_s10 + $0x70] sm:$0xff] }
 0x126   : > { %v864_v18 = vpop.permute.xlu0 %863  ;;  %v869_v19 = vpop.permute.xlu1 %868 }
 0x127   : > { %v909_v20 = vadd.f32 %v864_v18, %v685_v14  ;;  %v910_v21 = vadd.f32 %v869_v19, %v686_v15  ;;  %v1024_v14 = vld [vmem:[%s1828_s10 + $0x38] sm:$0xff] }
 0x128   : > { %v1032_v15 = vld [vmem:[%s1828_s10 + $0x78] sm:$0xff] }
 0x129   : > { %vm941_vm8 = vcmp.gt.f32.partialorder %v909_v20, 0.0  ;;  %v973_v24 = vmul.f32 0.2, %v909_v20  ;;  %vm942_vm9 = vcmp.gt.f32.partialorder %v910_v21, 0.0  ;;  %v974_v25 = vmul.f32 0.2, %v910_v21 }
 0x12a   : > { %v784_v26 = vpop.permute.xlu0 %783  ;;  %v789_v27 = vpop.permute.xlu1 %788 }
 0x12b   : > { %v893_v28 = vadd.f32 %v784_v26, %v669_v22  ;;  %v894_v29 = vadd.f32 %v789_v27, %v670_v23  ;;  %v1005_v30 = vsel %vm941_vm8, %v909_v20, %v973_v24  ;;  %v1006_v31 = vsel %vm942_vm9, %v910_v21, %v974_v25  ;;  %v1009_v20 = vld [vmem:[#allocation2] sm:$0xff] }
 0x12c   : > { %v1547_v32 = vpack.c.bf16 %v1006_v31, %v1005_v30  ;;  %v1013_v22 = vld [vmem:[#allocation2 + $0x20] sm:$0xff]  ;;  %v1010_v30 = vld [vmem:[#allocation2 + $0x8] sm:$0xff] }
 0x12d   : > { %vm925_vm10 = vcmp.gt.f32.partialorder %v893_v28, 0.0  ;;  %v957_v33 = vmul.f32 0.2, %v893_v28  ;;  %vm926_vm11 = vcmp.gt.f32.partialorder %v894_v29, 0.0  ;;  %v958_v34 = vmul.f32 0.2, %v894_v29 }
 0x12e   : > { %v650_v35 = vpop.permute.xlu0 %649  ;;  %v655_v36 = vpop.permute.xlu1 %654  ;;  %1548 = vmatprep.subr.bf16.mxu0 %v1547_v32  ;;  %1561 = vmatprep.subr.bf16.mxu1 %v1547_v32  ;;  %v1014_v32 = vld [vmem:[#allocation2 + $0x28] sm:$0xff] }
 0x12f   : > { %v989_v37 = vsel %vm925_vm10, %v893_v28, %v957_v33  ;;  %v990_v38 = vsel %vm926_vm11, %v894_v29, %v958_v34  ;;  %v687_v44 = vmul.f32 %v650_v35, %v463_v40  ;;  %v688_v45 = vmul.f32 %v655_v36, %v464_v41  ;;  %v1011_v40 = vld [vmem:[#allocation2 + $0x10] sm:$0xff] }
 0x130   : > { %v1549_v39 = vpack.c.bf16 %v990_v38, %v989_v37 }
 0x132   : > { %v570_v42 = vpop.permute.xlu0 %569  ;;  %v575_v43 = vpop.permute.xlu1 %574  ;;  %1550 = vmatpush3.bf16.msra.mxu0 %v1549_v39  ;;  %1569 = vmatpush3.bf16.msra.mxu1 %v1549_v39 }
 0x133   : > { %v671_v52 = vmul.f32 %v570_v42, %v447_v46  ;;  %v672_v53 = vmul.f32 %v575_v43, %v448_v47  ;;  %v1015_v42 = vld [vmem:[#allocation2 + $0x30] sm:$0xff] }
 0x136   : > { %v874_v48 = vpop.permute.xlu0 %873  ;;  %v879_v49 = vpop.permute.xlu1 %878 }
 0x137   : > { %v911_v50 = vadd.f32 %v874_v48, %v687_v44  ;;  %v912_v51 = vadd.f32 %v879_v49, %v688_v45 }
 0x139   : > { %vm943_vm12 = vcmp.gt.f32.partialorder %v911_v50, 0.0  ;;  %v975_v54 = vmul.f32 0.2, %v911_v50  ;;  %vm944_vm13 = vcmp.gt.f32.partialorder %v912_v51, 0.0  ;;  %v976_v55 = vmul.f32 0.2, %v912_v51 }
 0x13a   : > { %v794_v56 = vpop.permute.xlu0 %793  ;;  %v799_v57 = vpop.permute.xlu1 %798 }
 0x13b   : > { %v895_v58 = vadd.f32 %v794_v56, %v671_v52  ;;  %v896_v59 = vadd.f32 %v799_v57, %v672_v53  ;;  %v1007_v60 = vsel %vm943_vm12, %v911_v50, %v975_v54  ;;  %v1008_v61 = vsel %vm944_vm13, %v912_v51, %v976_v55  ;;  %v1012_v50 = vld [vmem:[#allocation2 + $0x18] sm:$0xff] }
 0x13c   : > { %v1551_v62 = vpack.c.bf16 %v1008_v61, %v1007_v60  ;;  %v1016_v52 = vld [vmem:[#allocation2 + $0x38] sm:$0xff] }
 0x13d   : > { %vm927_vm14 = vcmp.gt.f32.partialorder %v895_v58, 0.0  ;;  %v959_v63 = vmul.f32 0.2, %v895_v58  ;;  %vm928_vm15 = vcmp.gt.f32.partialorder %v896_v59, 0.0  ;;  %v960_v0 = vmul.f32 0.2, %v896_v59 }
 0x13e   : > { %1552 = vmatprep.subr.bf16.mxu0 %v1551_v62  ;;  %1562 = vmatprep.subr.bf16.mxu1 %v1551_v62 }
 0x13f   : > { %v991_v1 = vsel %vm927_vm14, %v895_v58, %v959_v63  ;;  %v992_v2 = vsel %vm928_vm15, %v896_v59, %v960_v0 }
 0x140   : > { %v1553_v3 = vpack.c.bf16 %v992_v2, %v991_v1 }
 0x142   : > { %1554 = vmatpush3.bf16.msra.mxu0 %v1553_v3  ;;  %1570 = vmatpush3.bf16.msra.mxu1 %v1553_v3 }
 0x145   : > { %1098 = vmatmul.mubr.f32.vlgmr.msra.gmra.mrb[0].mxu0 %v1017_v4  ;;  %1118 = vmatmul.mubr.f32.vlgmr.msra.gmra.mrb[0].mxu1 %v1025_v5 }
 0x146   : > { %1102 = vmatprep.mubr.f32.mxu0 %v1020_v6  ;;  %1122 = vmatprep.mubr.f32.mxu1 %v1028_v7 }
 0x149   : > { %1103 = vmatmul.mubr.f32.gmra.mrb[2].mxu0 %v1019_v8  ;;  %1123 = vmatmul.mubr.f32.gmra.mrb[2].mxu1 %v1027_v9 }
 0x14a   : > { %1107 = vmatprep.mubr.f32.mxu0 %v1022_v10  ;;  %1127 = vmatprep.mubr.f32.mxu1 %v1030_v11 }
 0x14d   : > { %1108 = vmatmul.mubr.f32.gmra.mrb[4].mxu0 %v1021_v12  ;;  %1128 = vmatmul.mubr.f32.gmra.mrb[4].mxu1 %v1029_v13 }
 0x14e   : > { %1112 = vmatprep.mubr.f32.mxu0 %v1024_v14  ;;  %1132 = vmatprep.mubr.f32.mxu1 %v1032_v15  ;;  %v1214_v14 = vlaneseq (!%p1462_p13) }
 0x151   : > { %1113 = vmatmul.mubr.f32.gmra.mrb[6].mxu0 %v1023_v16  ;;  %1133 = vmatmul.mubr.f32.gmra.mrb[6].mxu1 %v1031_v17  ;;  %v1215_v17 = vand.u32 (!%p1462_p13), 127, %v1214_v14 }
 0x153   : > { %vm1216_vm0 = vcmp.eq.s32.totalorder (!%p1462_p13), %v1215_v17, 0  ;;  %vm1225_vm1 = vcmp.eq.s32.totalorder (!%p1462_p13), %v1215_v17, 1 }
 0x218   : > { %v1499_v18 = vpop.f32.mrb[0].mxu0  ;;  %v1511_v19 = vpop.f32.mrb[0].mxu1 }
 0x219   : > { %v1500_v21 = vpop.f32.mrb[1].mxu0  ;;  %v1512_v23 = vpop.f32.mrb[1].mxu1 }
 0x21a   : > { %v1501_v24 = vadd.f32 %v1500_v21, %v1499_v18  ;;  %v1513_v25 = vadd.f32 %v1512_v23, %v1511_v19 }
 0x21c   : > { %v1138_v26 = vadd.f32 %v1501_v24, %v1009_v20  ;;  %v1142_v27 = vadd.f32 %v1513_v25, %v1013_v22  ;;  %v1502_v28 = vpop.f32.mrb[2].mxu0  ;;  %v1514_v29 = vpop.f32.mrb[2].mxu1 }
 0x21d   : > { %v1503_v31 = vpop.f32.mrb[3].mxu0  ;;  %v1515_v33 = vpop.f32.mrb[3].mxu1 }
 0x21e   : > { %1146 = vst [vmem:[#allocation2] sm:$0xff] %v1138_v26  ;;  %1150 = vst [vmem:[#allocation2 + $0x20] sm:$0xff] %v1142_v27  ;;  %v1504_v34 = vadd.f32 %v1503_v31, %v1502_v28  ;;  %v1516_v35 = vadd.f32 %v1515_v33, %v1514_v29 }
 0x220   : > { %v1139_v36 = vadd.f32 %v1504_v34, %v1010_v30  ;;  %v1143_v37 = vadd.f32 %v1516_v35, %v1014_v32  ;;  %v1505_v38 = vpop.f32.mrb[4].mxu0  ;;  %v1517_v39 = vpop.f32.mrb[4].mxu1 }
 0x221   : > { %v1506_v41 = vpop.f32.mrb[5].mxu0  ;;  %v1518_v43 = vpop.f32.mrb[5].mxu1 }
 0x222   : > { %1147 = vst [vmem:[#allocation2 + $0x8] sm:$0xff] %v1139_v36  ;;  %1151 = vst [vmem:[#allocation2 + $0x28] sm:$0xff] %v1143_v37  ;;  %v1507_v44 = vadd.f32 %v1506_v41, %v1505_v38  ;;  %v1519_v45 = vadd.f32 %v1518_v43, %v1517_v39 }
 0x224   : > { %v1140_v46 = vadd.f32 %v1507_v44, %v1011_v40  ;;  %v1144_v47 = vadd.f32 %v1519_v45, %v1015_v42  ;;  %v1508_v48 = vpop.f32.mrb[6].mxu0  ;;  %v1520_v49 = vpop.f32.mrb[6].mxu1  ;;  %1157 = sbr.rel (%p1462_p13) target bundleno = 732 (0x2dc), region = 67 }
 0x225   : > { %v1509_v51 = vpop.f32.mrb[7].mxu0  ;;  %v1521_v53 = vpop.f32.mrb[7].mxu1  ;;  %v1158_v59 = vld [vmem:[#allocation2] sm:$0xff] (!%p1462_p13) }
 0x226   : > { %1148 = vst [vmem:[#allocation2 + $0x10] sm:$0xff] %v1140_v46  ;;  %1152 = vst [vmem:[#allocation2 + $0x30] sm:$0xff] %v1144_v47  ;;  %v1510_v54 = vadd.f32 %v1509_v51, %v1508_v48  ;;  %v1522_v55 = vadd.f32 %v1521_v53, %v1520_v49  ;;  %1174 = vadd.xlane.f32.xlu0 (!%p1462_p13), %v1158_v59  ;;  %v1162_v63 = vld [vmem:[#allocation2 + $0x20] sm:$0xff] (!%p1462_p13)  ;;  %v1190_v3 = vmul.f32 (!%p1462_p13), %v1158_v59, %v1158_v59 }
 0x227   : > { %1166 = vst [vmem:[%s1821_s27] sm:$0xff] (!%p1462_p13), %v1158_v59  ;;  %1170 = vst [vmem:[%s1821_s27 + $0x20] sm:$0xff] (!%p1462_p13), %v1162_v63  ;;  %v1194_v7 = vmul.f32 (!%p1462_p13), %v1162_v63, %v1162_v63 }
 0x228   : > { %v1141_v56 = vadd.f32 %v1510_v54, %v1012_v50  ;;  %v1145_v57 = vadd.f32 %v1522_v55, %v1016_v52 }
 0x229   : > { %v1159_v61 = vld [vmem:[#allocation2 + $0x8] sm:$0xff] (!%p1462_p13) }
 0x22a   : > { %1149 = vst [vmem:[#allocation2 + $0x18] sm:$0xff] %v1141_v56  ;;  %1153 = vst [vmem:[#allocation2 + $0x38] sm:$0xff] %v1145_v57  ;;  %v1163_v62 = vld [vmem:[#allocation2 + $0x28] sm:$0xff] (!%p1462_p13)  ;;  %1176 = vadd.xlane.f32.xlu0 (!%p1462_p13), %v1159_v61  ;;  %v1191_v2 = vmul.f32 (!%p1462_p13), %v1159_v61, %v1159_v61 }
 0x22b   : > { %1167 = vst [vmem:[%s1821_s27 + $0x8] sm:$0xff] %v1159_v61  ;;  %1171 = vst [vmem:[%s1821_s27 + $0x28] sm:$0xff] %v1163_v62  ;;  %v1195_v6 = vmul.f32 %v1163_v62, %v1163_v62 }
 0x22d   : > { %v1160_v58 = vld [vmem:[#allocation2 + $0x10] sm:$0xff] }
 0x22e   : > { %1178 = vadd.xlane.f32.xlu1 %v1160_v58  ;;  %1168 = vst [vmem:[%s1821_s27 + $0x10] sm:$0xff] %v1160_v58  ;;  %v1164_v1 = vld [vmem:[#allocation2 + $0x30] sm:$0xff]  ;;  %1182 = vadd.xlane.f32.xlu0 %v1162_v63  ;;  %v1192_v5 = vmul.f32 %v1160_v58, %v1160_v58 }
 0x22f   : > { %1172 = vst [vmem:[%s1821_s27 + $0x30] sm:$0xff] %v1164_v1  ;;  %v1196_v9 = vmul.f32 %v1164_v1, %v1164_v1 }
 0x231   : > { %v1161_v60 = vld [vmem:[#allocation2 + $0x18] sm:$0xff] }
 0x232   : > { %1169 = vst [vmem:[%s1821_s27 + $0x18] sm:$0xff] %v1161_v60  ;;  %v1165_v0 = vld [vmem:[#allocation2 + $0x38] sm:$0xff]  ;;  %1180 = vadd.xlane.f32.xlu1 %v1161_v60  ;;  %1186 = vadd.xlane.f32.xlu0 %v1164_v1  ;;  %v1193_v4 = vmul.f32 %v1161_v60, %v1161_v60 }
 0x233   : > { %1173 = vst [vmem:[%s1821_s27 + $0x38] sm:$0xff] %v1165_v0  ;;  %v1197_v8 = vmul.f32 %v1165_v0, %v1165_v0 }
 0x236   : > { %1184 = vadd.xlane.f32.xlu1 %v1163_v62  ;;  %1198 = vadd.xlane.f32.xlu0 %v1190_v3 }
 0x23a   : > { %1188 = vadd.xlane.f32.xlu1 %v1165_v0  ;;  %1202 = vadd.xlane.f32.xlu0 %v1192_v5 }
 0x23e   : > { %1200 = vadd.xlane.f32.xlu1 %v1191_v2  ;;  %1206 = vadd.xlane.f32.xlu0 %v1194_v7 }
 0x242   : > { %1204 = vadd.xlane.f32.xlu1 %v1193_v4  ;;  %1210 = vadd.xlane.f32.xlu0 %v1196_v9 }
 0x246   : > { %1208 = vadd.xlane.f32.xlu1 %v1195_v6 }
 0x24a   : > { %1212 = vadd.xlane.f32.xlu1 %v1197_v8 }
 0x2b3   : > { %v1175_v11 = vpop.xlane.xlu0 %1174 }
 0x2b4   : > { %v1217_v22 = vsel %vm1216_vm0, %v1175_v11, 0.0 }
 0x2b7   : > { %v1177_v13 = vpop.xlane.xlu0 %1176 }
 0x2b8   : > { %v1218_v23 = vsel %vm1216_vm0, %v1177_v13, 0.0 }
 0x2bb   : > { %v1179_v10 = vpop.xlane.xlu1 %1178  ;;  %v1183_v16 = vpop.xlane.xlu0 %1182 }
 0x2bc   : > { %v1219_v30 = vsel %vm1216_vm0, %v1179_v10, 0.0  ;;  %v1221_v39 = vsel %vm1216_vm0, %v1183_v16, 0.0 }
 0x2bf   : > { %v1181_v12 = vpop.xlane.xlu1 %1180  ;;  %v1187_v19 = vpop.xlane.xlu0 %1186 }
 0x2c0   : > { %v1220_v31 = vsel %vm1216_vm0, %v1181_v12, 0.0  ;;  %v1223_v47 = vsel %vm1216_vm0, %v1187_v19, 0.0 }
 0x2c3   : > { %v1185_v15 = vpop.xlane.xlu1 %1184  ;;  %v1199_v21 = vpop.xlane.xlu0 %1198 }
 0x2c4   : > { %v1226_v25 = vsel %vm1225_vm1, %v1199_v21, 0.0  ;;  %v1222_v38 = vsel %vm1216_vm0, %v1185_v15, 0.0 }
 0x2c5   : > { %v1234_v27 = vadd.f32 %v1226_v25, %v1217_v22 }
 0x2c7   : > { %v1189_v18 = vpop.xlane.xlu1 %1188  ;;  %1242 = vst [vmem:[%s1826_s9] sm:$0xff] %v1234_v27  ;;  %v1203_v29 = vpop.xlane.xlu0 %1202 }
 0x2c8   : > { %v1228_v33 = vsel %vm1225_vm1, %v1203_v29, 0.0  ;;  %v1224_v46 = vsel %vm1216_vm0, %v1189_v18, 0.0 }
 0x2c9   : > { %v1236_v35 = vadd.f32 %v1228_v33, %v1219_v30 }
 0x2cb   : > { %v1201_v20 = vpop.xlane.xlu1 %1200  ;;  %1244 = vst [vmem:[%s1826_s9 + $0x10] sm:$0xff] %v1236_v35  ;;  %v1207_v37 = vpop.xlane.xlu0 %1206 }
 0x2cc   : > { %v1227_v24 = vsel %vm1225_vm1, %v1201_v20, 0.0  ;;  %v1230_v41 = vsel %vm1225_vm1, %v1207_v37, 0.0 }
 0x2cd   : > { %v1235_v26 = vadd.f32 %v1227_v24, %v1218_v23  ;;  %v1238_v43 = vadd.f32 %v1230_v41, %v1221_v39 }
 0x2cf   : > { %1243 = vst [vmem:[%s1826_s9 + $0x8] sm:$0xff] %v1235_v26  ;;  %v1205_v28 = vpop.xlane.xlu1 %1204  ;;  %1246 = vst [vmem:[%s1826_s9 + $0x20] sm:$0xff] %v1238_v43  ;;  %v1211_v45 = vpop.xlane.xlu0 %1210 }
 0x2d0   : > { %v1229_v32 = vsel %vm1225_vm1, %v1205_v28, 0.0  ;;  %v1232_v49 = vsel %vm1225_vm1, %v1211_v45, 0.0 }
 0x2d1   : > { %v1237_v34 = vadd.f32 %v1229_v32, %v1220_v31  ;;  %v1240_v51 = vadd.f32 %v1232_v49, %v1223_v47 }
 0x2d3   : > { %1245 = vst [vmem:[%s1826_s9 + $0x18] sm:$0xff] %v1237_v34  ;;  %v1209_v36 = vpop.xlane.xlu1 %1208  ;;  %1248 = vst [vmem:[%s1826_s9 + $0x30] sm:$0xff] %v1240_v51 }
 0x2d4   : > { %v1231_v40 = vsel %vm1225_vm1, %v1209_v36, 0.0 }
 0x2d5   : > { %v1239_v42 = vadd.f32 %v1231_v40, %v1222_v38 }
 0x2d7   : > { %1247 = vst [vmem:[%s1826_s9 + $0x28] sm:$0xff] %v1239_v42  ;;  %v1213_v44 = vpop.xlane.xlu1 %1212 }
 0x2d8   : > { %v1233_v48 = vsel %vm1225_vm1, %v1213_v44, 0.0 }
 0x2d9   : > { %v1241_v50 = vadd.f32 %v1233_v48, %v1224_v46 }
 0x2db   : > { %1249 = vst [vmem:[%s1826_s9 + $0x38] sm:$0xff] %v1241_v50 }
 0x2dc PF: > { %s16_s24 = sadd.s32 1, %s1685_s24   ;;  %s2005_s18 = smov %s1665_s19 }
 0x2dd   : > { %p13_p0 = scmp.ge.s32.totalorder %s16_s24, 10   ;;  %s2006_s19 = smov %s1770_s6 }
 0x2de   : > { %s2007_s20 = smov %s1677_s22  ;;  %s2008_s21 = smov %s1681_s23 }
 0x2df   : > { %s2009_s22 = smov %s2012_s25  ;;  %s2010_s23 = smov %s2016_s26 }
 0x2e0   :  { %15 = sbr.rel (!%p13_p0) target bundleno = 6 (0x6), region = 123 }

// kernel: _lambda_.8
= control target key start
LH: loop header
LB: loop body
LE: loop exit
PB: predicated region body
PF: predicated region fallthrough
CT: control target
= control target key end

     0   :  { %s1508_s18 = smov 0   ;;  %s1510_s19 = smov 0   ;;  %s1804_s0 = inlined_call_operand.vmem [shape: f32[4,256,128], index: 0, kind: input, shape index: {}]   ;;  %s1805_s1 = inlined_call_operand.vmem [shape: f32[4,32,256], index: 1, kind: input, shape index: {}]   ;;  %s1806_s2 = inlined_call_operand.vmem [shape: f32[256,1], index: 2, kind: input, shape index: {}]   ;;  %s1807_s3 = inlined_call_operand.vmem [shape: f32[256,1], index: 3, kind: input, shape index: {}]   ;;  %s1808_s4 = inlined_call_operand.vmem [shape: f32[4,32,128], index: 4, kind: output, shape index: {0}]   ;;  %s1809_s5 = inlined_call_operand.vmem [shape: f32[4,1,32,128], index: 5, kind: output, shape index: {1}]  }
   0x1   :  { %s1512_s20 = smov 0  }
   0x2 LB: > { %s35_s21 = sadd.s32 1, %s1471_s19  ;;  %p1319_p0 = scmp.ge.s32.totalorder %s1475_s20, 1  ;;  %s1475_s20 = sphi %s1512_s20, %s16_s20   ;;  %s1471_s19 = sphi %s1510_s19, %s1811_s19   ;;  %s1467_s18 = sphi %s1508_s18, %s1810_s18  }
   0x3   : > { %p37_p1 = scmp.ge.s32.totalorder %s35_s21, 4  ;;  %p264_p2 = scmp.lt.s32.totalorder %s1475_s20, 5 }
   0x5   : > { %s1813_s21 = smov (%p37_p1, %s35_s21), 0  ;;  %p265_p3 = pnand %p1319_p0, %p264_p2 }
   0x6   : > { %v438_v0 = vld [vmem:[%s1806_s2 + $0x80] sm:$0xff] (!%p265_p3)  ;;  %v1477_v2 = vmov (!%p265_p3), 0   ;;  %v439_v3 = vld [vmem:[%s1806_s2 + $0x88] sm:$0xff] (!%p265_p3)  ;;  %v440_v9 = vld [vmem:[%s1806_s2 + $0x90] sm:$0xff] (!%p265_p3)  ;;  %p331_p4 = scmp.lt.s32.totalorder (!%p265_p3), %s1467_s18, 3 }
   0x7   : > { %268 = sbr.rel (%p265_p3) target bundleno = 647 (0x287), region = 36  ;;  %v422_v1 = vld [vmem:[%s1806_s2] sm:$0xff] (!%p265_p3)  ;;  %1452 = vset.pattern.permute.xlu1 (!%p265_p3), %v1477_v2  ;;  %1451 = vset.pattern.permute.xlu0 (!%p265_p3), %v1477_v2  ;;  %v423_v4 = vld [vmem:[%s1806_s2 + $0x8] sm:$0xff] (!%p265_p3)  ;;  %v441_v10 = vld [vmem:[%s1806_s2 + $0x98] sm:$0xff] (!%p265_p3) }
   0x8   : > { %536 = vperm.xlu0 (!%p265_p3), %1451, %v438_v0   ;;  %456 = vperm.xlu1 (!%p265_p3), %1452, %v422_v1   ;;  %v662_v5 = vld [vmem:[%s1807_s3 + $0x80] sm:$0xff] (!%p265_p3)  ;;  %v663_v6 = vld [vmem:[%s1807_s3 + $0x88] sm:$0xff] (!%p265_p3)  ;;  %v424_v11 = vld [vmem:[%s1806_s2 + $0x10] sm:$0xff] (!%p265_p3) }
   0x9   : > { %v646_v7 = vld [vmem:[%s1807_s3] sm:$0xff] (!%p265_p3)  ;;  %v647_v8 = vld [vmem:[%s1807_s3 + $0x8] sm:$0xff] (!%p265_p3)  ;;  %v425_v12 = vld [vmem:[%s1806_s2 + $0x18] sm:$0xff] (!%p265_p3) }
   0xa   : > { %v664_v13 = vld [vmem:[%s1807_s3 + $0x90] sm:$0xff] (!%p265_p3)  ;;  %v665_v14 = vld [vmem:[%s1807_s3 + $0x98] sm:$0xff] (!%p265_p3)  ;;  %v442_v17 = vld [vmem:[%s1806_s2 + $0xa0] sm:$0xff] (!%p265_p3) }
   0xb   : > { %v648_v15 = vld [vmem:[%s1807_s3 + $0x10] sm:$0xff] (!%p265_p3)  ;;  %v649_v16 = vld [vmem:[%s1807_s3 + $0x18] sm:$0xff] (!%p265_p3)  ;;  %v443_v18 = vld [vmem:[%s1806_s2 + $0xa8] sm:$0xff] (!%p265_p3) }
   0xc   : > { %541 = vperm.xlu0 (!%p265_p3), %1451, %v439_v3   ;;  %461 = vperm.xlu1 (!%p265_p3), %1452, %v423_v4   ;;  %v426_v19 = vld [vmem:[%s1806_s2 + $0x20] sm:$0xff] (!%p265_p3)  ;;  %v427_v20 = vld [vmem:[%s1806_s2 + $0x28] sm:$0xff] (!%p265_p3)  ;;  %v444_v25 = vld [vmem:[%s1806_s2 + $0xb0] sm:$0xff] (!%p265_p3) }
   0xd   : > { %v666_v21 = vld [vmem:[%s1807_s3 + $0xa0] sm:$0xff] (!%p265_p3)  ;;  %v667_v22 = vld [vmem:[%s1807_s3 + $0xa8] sm:$0xff] (!%p265_p3)  ;;  %v445_v26 = vld [vmem:[%s1806_s2 + $0xb8] sm:$0xff] (!%p265_p3) }
   0xe   : > { %v650_v23 = vld [vmem:[%s1807_s3 + $0x20] sm:$0xff]  ;;  %v651_v24 = vld [vmem:[%s1807_s3 + $0x28] sm:$0xff]  ;;  %v428_v27 = vld [vmem:[%s1806_s2 + $0x30] sm:$0xff]  ;;  %s1815_s18 = smov (!%p331_p4, %s1467_s18), 3 }
   0xf   : > { %v429_v28 = vld [vmem:[%s1806_s2 + $0x38] sm:$0xff]  ;;  %v668_v29 = vld [vmem:[%s1807_s3 + $0xb0] sm:$0xff]  ;;  %v446_v33 = vld [vmem:[%s1806_s2 + $0xc0] sm:$0xff]  ;;  %s1330_s24 = sshll.u32 %s1815_s18, 8  ;;  %s1331_s28 = sshll.u32 %s1815_s18, 6 }
  0x10   : > { %760 = vperm.xlu0 %1451, %v662_v5   ;;  %765 = vperm.xlu1 %1452, %v663_v6   ;;  %v669_v30 = vld [vmem:[%s1807_s3 + $0xb8] sm:$0xff]  ;;  %v652_v31 = vld [vmem:[%s1807_s3 + $0x30] sm:$0xff]  ;;  %v447_v34 = vld [vmem:[%s1806_s2 + $0xc8] sm:$0xff]  ;;  %s1728_s27 = scalar_lea.vmem %s1804_s0, %s1330_s24  ;;  %s1736_s6 = scalar_lea.vmem %s1805_s1, %s1331_s28 }
  0x11   : > { %v653_v32 = vld [vmem:[%s1807_s3 + $0x38] sm:$0xff]  ;;  %v430_v35 = vld [vmem:[%s1806_s2 + $0x40] sm:$0xff]  ;;  %v431_v36 = vld [vmem:[%s1806_s2 + $0x48] sm:$0xff]  ;;  %s1332_s7 = sshll.u32 %s1815_s18, 5 }
  0x12   : > { %v670_v37 = vld [vmem:[%s1807_s3 + $0xc0] sm:$0xff]  ;;  %v671_v38 = vld [vmem:[%s1807_s3 + $0xc8] sm:$0xff]  ;;  %v448_v41 = vld [vmem:[%s1806_s2 + $0xd0] sm:$0xff]  ;;  %s372_s10 = scalar_lea.vmem %s1808_s4, %s1332_s7  ;;  %s381_s13 = scalar_lea.vmem %s1809_s5, %s1332_s7 }
  0x13   : > { %v654_v39 = vld [vmem:[%s1807_s3 + $0x40] sm:$0xff]  ;;  %v655_v40 = vld [vmem:[%s1807_s3 + $0x48] sm:$0xff]  ;;  %v449_v42 = vld [vmem:[%s1806_s2 + $0xd8] sm:$0xff] }
  0x14   : > { %680 = vperm.xlu0 %1451, %v646_v7   ;;  %685 = vperm.xlu1 %1452, %v647_v8   ;;  %v432_v43 = vld [vmem:[%s1806_s2 + $0x50] sm:$0xff]  ;;  %v433_v44 = vld [vmem:[%s1806_s2 + $0x58] sm:$0xff]  ;;  %v450_v49 = vld [vmem:[%s1806_s2 + $0xe0] sm:$0xff] }
  0x15   : > { %v672_v45 = vld [vmem:[%s1807_s3 + $0xd0] sm:$0xff]  ;;  %v673_v46 = vld [vmem:[%s1807_s3 + $0xd8] sm:$0xff]  ;;  %v451_v50 = vld [vmem:[%s1806_s2 + $0xe8] sm:$0xff] }
  0x16   : > { %v656_v47 = vld [vmem:[%s1807_s3 + $0x50] sm:$0xff]  ;;  %v657_v48 = vld [vmem:[%s1807_s3 + $0x58] sm:$0xff]  ;;  %v434_v51 = vld [vmem:[%s1806_s2 + $0x60] sm:$0xff] }
  0x17   : > { %v435_v52 = vld [vmem:[%s1806_s2 + $0x68] sm:$0xff]  ;;  %v674_v53 = vld [vmem:[%s1807_s3 + $0xe0] sm:$0xff]  ;;  %v452_v57 = vld [vmem:[%s1806_s2 + $0xf0] sm:$0xff] }
  0x18   : > { %546 = vperm.xlu0 %1451, %v440_v9   ;;  %551 = vperm.xlu1 %1452, %v441_v10   ;;  %v675_v54 = vld [vmem:[%s1807_s3 + $0xe8] sm:$0xff]  ;;  %v658_v55 = vld [vmem:[%s1807_s3 + $0x60] sm:$0xff]  ;;  %v453_v58 = vld [vmem:[%s1806_s2 + $0xf8] sm:$0xff] }
  0x19   : > { %v659_v56 = vld [vmem:[%s1807_s3 + $0x68] sm:$0xff]  ;;  %v436_v59 = vld [vmem:[%s1806_s2 + $0x70] sm:$0xff]  ;;  %v437_v60 = vld [vmem:[%s1806_s2 + $0x78] sm:$0xff] }
  0x1a   : > { %v676_v61 = vld [vmem:[%s1807_s3 + $0xf0] sm:$0xff]  ;;  %v677_v62 = vld [vmem:[%s1807_s3 + $0xf8] sm:$0xff]  ;;  %v406_v3 = vld [vmem:[%s1728_s27 + $0x80] sm:$0xff] }
  0x1b   : > { %v660_v63 = vld [vmem:[%s1807_s3 + $0x70] sm:$0xff]  ;;  %v661_v0 = vld [vmem:[%s1807_s3 + $0x78] sm:$0xff]  ;;  %v407_v5 = vld [vmem:[%s1728_s27 + $0x88] sm:$0xff] }
  0x1c   : > { %466 = vperm.xlu0 %1451, %v424_v11   ;;  %471 = vperm.xlu1 %1452, %v425_v12   ;;  %v971_v7 = vld [vmem:[%s1736_s6 + $0x8] sm:$0xff]  ;;  %v390_v9 = vld [vmem:[%s1728_s27] sm:$0xff] }
  0x1d   : > { %1042 = vmatprep.mubr.f32.mxu0 %v971_v7  ;;  %v391_v11 = vld [vmem:[%s1728_s27 + $0x8] sm:$0xff]  ;;  %v394_v7 = vld [vmem:[%s1728_s27 + $0x20] sm:$0xff] }
  0x1e   : > { %v975_v12 = vld [vmem:[%s1736_s6 + $0x28] sm:$0xff] }
  0x1f   : > { %1052 = vmatprep.mubr.f32.mxu1 %v975_v12 }
  0x20   : > { %770 = vperm.xlu0 %1451, %v664_v13   ;;  %775 = vperm.xlu1 %1452, %v665_v14  }
  0x24   : > { %690 = vperm.xlu0 %1451, %v648_v15   ;;  %695 = vperm.xlu1 %1452, %v649_v16  }
  0x28   : > { %556 = vperm.xlu0 %1451, %v442_v17   ;;  %561 = vperm.xlu1 %1452, %v443_v18  }
  0x2c   : > { %476 = vperm.xlu0 %1451, %v426_v19   ;;  %481 = vperm.xlu1 %1452, %v427_v20  }
  0x30   : > { %780 = vperm.xlu0 %1451, %v666_v21   ;;  %785 = vperm.xlu1 %1452, %v667_v22  }
  0x34   : > { %700 = vperm.xlu0 %1451, %v650_v23   ;;  %705 = vperm.xlu1 %1452, %v651_v24  }
  0x38   : > { %566 = vperm.xlu0 %1451, %v444_v25   ;;  %571 = vperm.xlu1 %1452, %v445_v26  }
  0x3c   : > { %486 = vperm.xlu0 %1451, %v428_v27   ;;  %491 = vperm.xlu1 %1452, %v429_v28  }
  0x40   : > { %790 = vperm.xlu0 %1451, %v668_v29   ;;  %795 = vperm.xlu1 %1452, %v669_v30  }
  0x44   : > { %710 = vperm.xlu0 %1451, %v652_v31   ;;  %715 = vperm.xlu1 %1452, %v653_v32  }
  0x48   : > { %576 = vperm.xlu0 %1451, %v446_v33   ;;  %581 = vperm.xlu1 %1452, %v447_v34  }
  0x4c   : > { %496 = vperm.xlu0 %1451, %v430_v35   ;;  %501 = vperm.xlu1 %1452, %v431_v36   ;;  %v408_v35 = vld [vmem:[%s1728_s27 + $0x90] sm:$0xff]  ;;  %v409_v36 = vld [vmem:[%s1728_s27 + $0x98] sm:$0xff] }
  0x50   : > { %800 = vperm.xlu0 %1451, %v670_v37   ;;  %805 = vperm.xlu1 %1452, %v671_v38  }
  0x54   : > { %720 = vperm.xlu0 %1451, %v654_v39   ;;  %725 = vperm.xlu1 %1452, %v655_v40  }
  0x58   : > { %586 = vperm.xlu0 %1451, %v448_v41   ;;  %591 = vperm.xlu1 %1452, %v449_v42   ;;  %v392_v41 = vld [vmem:[%s1728_s27 + $0x10] sm:$0xff]  ;;  %v393_v42 = vld [vmem:[%s1728_s27 + $0x18] sm:$0xff] }
  0x5c   : > { %506 = vperm.xlu0 %1451, %v432_v43   ;;  %511 = vperm.xlu1 %1452, %v433_v44  }
  0x60   : > { %810 = vperm.xlu0 %1451, %v672_v45   ;;  %815 = vperm.xlu1 %1452, %v673_v46  }
  0x64   : > { %730 = vperm.xlu0 %1451, %v656_v47   ;;  %735 = vperm.xlu1 %1452, %v657_v48  }
  0x68   : > { %596 = vperm.xlu0 %1451, %v450_v49   ;;  %601 = vperm.xlu1 %1452, %v451_v50  }
  0x6c   : > { %516 = vperm.xlu0 %1451, %v434_v51   ;;  %521 = vperm.xlu1 %1452, %v435_v52  }
  0x70   : > { %820 = vperm.xlu0 %1451, %v674_v53   ;;  %825 = vperm.xlu1 %1452, %v675_v54  }
  0x74   : > { %740 = vperm.xlu0 %1451, %v658_v55   ;;  %745 = vperm.xlu1 %1452, %v659_v56  }
  0x78   : > { %606 = vperm.xlu0 %1451, %v452_v57   ;;  %611 = vperm.xlu1 %1452, %v453_v58  }
  0x7c   : > { %526 = vperm.xlu0 %1451, %v436_v59   ;;  %531 = vperm.xlu1 %1452, %v437_v60  }
  0x80   : > { %830 = vperm.xlu0 %1451, %v676_v61   ;;  %835 = vperm.xlu1 %1452, %v677_v62  }
  0x84   : > { %750 = vperm.xlu0 %1451, %v660_v63   ;;  %755 = vperm.xlu1 %1452, %v661_v0  }
  0x87   : > { %v537_v1 = vpop.permute.xlu0 %536  ;;  %v457_v2 = vpop.permute.xlu1 %456 }
  0x88   : > { %v630_v8 = vmul.f32 %v537_v1, %v406_v3  ;;  %v614_v17 = vmul.f32 %v457_v2, %v390_v9  ;;  %v410_v1 = vld [vmem:[%s1728_s27 + $0xa0] sm:$0xff]  ;;  %v411_v2 = vld [vmem:[%s1728_s27 + $0xa8] sm:$0xff] }
  0x8b   : > { %v542_v4 = vpop.permute.xlu0 %541  ;;  %v462_v6 = vpop.permute.xlu1 %461 }
  0x8c   : > { %v631_v10 = vmul.f32 %v542_v4, %v407_v5  ;;  %v615_v18 = vmul.f32 %v462_v6, %v391_v11 }
  0x8f   : > { %v761_v13 = vpop.permute.xlu0 %760  ;;  %v766_v14 = vpop.permute.xlu1 %765 }
  0x90   : > { %v854_v15 = vadd.f32 %v761_v13, %v630_v8  ;;  %v855_v16 = vadd.f32 %v766_v14, %v631_v10  ;;  %v395_v8 = vld [vmem:[%s1728_s27 + $0x28] sm:$0xff] }
  0x92   : > { %v918_v19 = vmul.f32 0.2, %v854_v15  ;;  %v919_v20 = vmul.f32 0.2, %v855_v16  ;;  %vm886_vm0 = vcmp.gt.f32.partialorder %v854_v15, 0.0  ;;  %vm887_vm1 = vcmp.gt.f32.partialorder %v855_v16, 0.0 }
  0x93   : > { %v681_v21 = vpop.permute.xlu0 %680  ;;  %v686_v22 = vpop.permute.xlu1 %685 }
  0x94   : > { %v838_v23 = vadd.f32 %v681_v21, %v614_v17  ;;  %v839_v24 = vadd.f32 %v686_v22, %v615_v18  ;;  %v950_v25 = vsel %vm886_vm0, %v854_v15, %v918_v19  ;;  %v951_v26 = vsel %vm887_vm1, %v855_v16, %v919_v20 }
  0x95   : > { %v1378_v27 = vpack.c.bf16 %v951_v26, %v950_v25 }
  0x96   : > { %v902_v28 = vmul.f32 0.2, %v838_v23  ;;  %v903_v29 = vmul.f32 0.2, %v839_v24  ;;  %vm870_vm2 = vcmp.gt.f32.partialorder %v838_v23, 0.0  ;;  %vm871_vm3 = vcmp.gt.f32.partialorder %v839_v24, 0.0 }
  0x97   : > { %v547_v30 = vpop.permute.xlu0 %546  ;;  %v552_v31 = vpop.permute.xlu1 %551  ;;  %1379 = vmatprep.subr.bf16.mxu0 %v1378_v27  ;;  %1410 = vmatprep.subr.bf16.mxu1 %v1378_v27 }
  0x98   : > { %v934_v32 = vsel %vm870_vm2, %v838_v23, %v902_v28  ;;  %v935_v33 = vsel %vm871_vm3, %v839_v24, %v903_v29  ;;  %v632_v39 = vmul.f32 %v547_v30, %v408_v35  ;;  %v633_v40 = vmul.f32 %v552_v31, %v409_v36  ;;  %v412_v31 = vld [vmem:[%s1728_s27 + $0xb0] sm:$0xff] }
  0x99   : > { %v1380_v34 = vpack.c.bf16 %v935_v33, %v934_v32  ;;  %v413_v32 = vld [vmem:[%s1728_s27 + $0xb8] sm:$0xff] }
  0x9b   : > { %v467_v37 = vpop.permute.xlu0 %466  ;;  %v472_v38 = vpop.permute.xlu1 %471  ;;  %1381 = vmatpush3.bf16.msra.mxu0 %v1380_v34  ;;  %1418 = vmatpush3.bf16.msra.mxu1 %v1380_v34 }
  0x9c   : > { %v616_v47 = vmul.f32 %v467_v37, %v392_v41  ;;  %v617_v48 = vmul.f32 %v472_v38, %v393_v42  ;;  %v396_v37 = vld [vmem:[%s1728_s27 + $0x30] sm:$0xff]  ;;  %v397_v38 = vld [vmem:[%s1728_s27 + $0x38] sm:$0xff] }
  0x9f   : > { %v771_v43 = vpop.permute.xlu0 %770  ;;  %v776_v44 = vpop.permute.xlu1 %775 }
  0xa0   : > { %v856_v45 = vadd.f32 %v771_v43, %v632_v39  ;;  %v857_v46 = vadd.f32 %v776_v44, %v633_v40 }
  0xa2   : > { %vm888_vm4 = vcmp.gt.f32.partialorder %v856_v45, 0.0  ;;  %v920_v49 = vmul.f32 0.2, %v856_v45  ;;  %vm889_vm5 = vcmp.gt.f32.partialorder %v857_v46, 0.0  ;;  %v921_v50 = vmul.f32 0.2, %v857_v46 }
  0xa3   : > { %v691_v51 = vpop.permute.xlu0 %690  ;;  %v696_v52 = vpop.permute.xlu1 %695 }
  0xa4   : > { %v840_v53 = vadd.f32 %v691_v51, %v616_v47  ;;  %v841_v54 = vadd.f32 %v696_v52, %v617_v48  ;;  %v952_v55 = vsel %vm888_vm4, %v856_v45, %v920_v49  ;;  %v953_v56 = vsel %vm889_vm5, %v857_v46, %v921_v50 }
  0xa5   : > { %v1382_v57 = vpack.c.bf16 %v953_v56, %v952_v55 }
  0xa6   : > { %vm872_vm6 = vcmp.gt.f32.partialorder %v840_v53, 0.0  ;;  %v904_v58 = vmul.f32 0.2, %v840_v53  ;;  %vm873_vm7 = vcmp.gt.f32.partialorder %v841_v54, 0.0  ;;  %v905_v59 = vmul.f32 0.2, %v841_v54 }
  0xa7   : > { %v557_v60 = vpop.permute.xlu0 %556  ;;  %v562_v61 = vpop.permute.xlu1 %561  ;;  %1383 = vmatprep.subr.bf16.mxu0 %v1382_v57  ;;  %1411 = vmatprep.subr.bf16.mxu1 %v1382_v57 }
  0xa8   : > { %v936_v62 = vsel %vm872_vm6, %v840_v53, %v904_v58  ;;  %v937_v63 = vsel %vm873_vm7, %v841_v54, %v905_v59  ;;  %v634_v5 = vmul.f32 %v557_v60, %v410_v1  ;;  %v635_v6 = vmul.f32 %v562_v61, %v411_v2  ;;  %v414_v61 = vld [vmem:[%s1728_s27 + $0xc0] sm:$0xff] }
  0xa9   : > { %v1384_v0 = vpack.c.bf16 %v937_v63, %v936_v62  ;;  %v415_v62 = vld [vmem:[%s1728_s27 + $0xc8] sm:$0xff] }
  0xab   : > { %v477_v3 = vpop.permute.xlu0 %476  ;;  %v482_v4 = vpop.permute.xlu1 %481  ;;  %1385 = vmatpush3.bf16.msra.mxu0 %v1384_v0  ;;  %1419 = vmatpush3.bf16.msra.mxu1 %v1384_v0 }
  0xac   : > { %v618_v13 = vmul.f32 %v477_v3, %v394_v7  ;;  %v619_v14 = vmul.f32 %v482_v4, %v395_v8  ;;  %v398_v3 = vld [vmem:[%s1728_s27 + $0x40] sm:$0xff]  ;;  %v399_v4 = vld [vmem:[%s1728_s27 + $0x48] sm:$0xff] }
  0xaf   : > { %v781_v9 = vpop.permute.xlu0 %780  ;;  %v786_v10 = vpop.permute.xlu1 %785 }
  0xb0   : > { %v858_v11 = vadd.f32 %v781_v9, %v634_v5  ;;  %v859_v12 = vadd.f32 %v786_v10, %v635_v6 }
  0xb2   : > { %vm890_vm8 = vcmp.gt.f32.partialorder %v858_v11, 0.0  ;;  %v922_v15 = vmul.f32 0.2, %v858_v11  ;;  %vm891_vm9 = vcmp.gt.f32.partialorder %v859_v12, 0.0  ;;  %v923_v16 = vmul.f32 0.2, %v859_v12 }
  0xb3   : > { %v701_v17 = vpop.permute.xlu0 %700  ;;  %v706_v18 = vpop.permute.xlu1 %705 }
  0xb4   : > { %v842_v19 = vadd.f32 %v701_v17, %v618_v13  ;;  %v843_v20 = vadd.f32 %v706_v18, %v619_v14  ;;  %v954_v21 = vsel %vm890_vm8, %v858_v11, %v922_v15  ;;  %v955_v22 = vsel %vm891_vm9, %v859_v12, %v923_v16 }
  0xb5   : > { %v1386_v23 = vpack.c.bf16 %v955_v22, %v954_v21 }
  0xb6   : > { %vm874_vm10 = vcmp.gt.f32.partialorder %v842_v19, 0.0  ;;  %v906_v24 = vmul.f32 0.2, %v842_v19  ;;  %vm875_vm11 = vcmp.gt.f32.partialorder %v843_v20, 0.0  ;;  %v907_v25 = vmul.f32 0.2, %v843_v20 }
  0xb7   : > { %v567_v26 = vpop.permute.xlu0 %566  ;;  %v572_v27 = vpop.permute.xlu1 %571  ;;  %1387 = vmatprep.subr.bf16.mxu0 %v1386_v23  ;;  %1412 = vmatprep.subr.bf16.mxu1 %v1386_v23 }
  0xb8   : > { %v938_v28 = vsel %vm874_vm10, %v842_v19, %v906_v24  ;;  %v939_v29 = vsel %vm875_vm11, %v843_v20, %v907_v25  ;;  %v636_v35 = vmul.f32 %v567_v26, %v412_v31  ;;  %v637_v36 = vmul.f32 %v572_v27, %v413_v32  ;;  %v416_v27 = vld [vmem:[%s1728_s27 + $0xd0] sm:$0xff] }
  0xb9   : > { %v1388_v30 = vpack.c.bf16 %v939_v29, %v938_v28  ;;  %v417_v28 = vld [vmem:[%s1728_s27 + $0xd8] sm:$0xff] }
  0xbb   : > { %v487_v33 = vpop.permute.xlu0 %486  ;;  %v492_v34 = vpop.permute.xlu1 %491  ;;  %1389 = vmatpush3.bf16.msra.mxu0 %v1388_v30  ;;  %1420 = vmatpush3.bf16.msra.mxu1 %v1388_v30 }
  0xbc   : > { %v620_v43 = vmul.f32 %v487_v33, %v396_v37  ;;  %v621_v44 = vmul.f32 %v492_v34, %v397_v38  ;;  %v400_v33 = vld [vmem:[%s1728_s27 + $0x50] sm:$0xff]  ;;  %v401_v34 = vld [vmem:[%s1728_s27 + $0x58] sm:$0xff] }
  0xbf   : > { %v791_v39 = vpop.permute.xlu0 %790  ;;  %v796_v40 = vpop.permute.xlu1 %795 }
  0xc0   : > { %v860_v41 = vadd.f32 %v791_v39, %v636_v35  ;;  %v861_v42 = vadd.f32 %v796_v40, %v637_v36 }
  0xc2   : > { %vm892_vm12 = vcmp.gt.f32.partialorder %v860_v41, 0.0  ;;  %v924_v45 = vmul.f32 0.2, %v860_v41  ;;  %vm893_vm13 = vcmp.gt.f32.partialorder %v861_v42, 0.0  ;;  %v925_v46 = vmul.f32 0.2, %v861_v42 }
  0xc3   : > { %v711_v47 = vpop.permute.xlu0 %710  ;;  %v716_v48 = vpop.permute.xlu1 %715 }
  0xc4   : > { %v844_v49 = vadd.f32 %v711_v47, %v620_v43  ;;  %v845_v50 = vadd.f32 %v716_v48, %v621_v44  ;;  %v956_v51 = vsel %vm892_vm12, %v860_v41, %v924_v45  ;;  %v957_v52 = vsel %vm893_vm13, %v861_v42, %v925_v46 }
  0xc5   : > { %v1390_v53 = vpack.c.bf16 %v957_v52, %v956_v51 }
  0xc6   : > { %vm876_vm14 = vcmp.gt.f32.partialorder %v844_v49, 0.0  ;;  %v908_v54 = vmul.f32 0.2, %v844_v49  ;;  %vm877_vm15 = vcmp.gt.f32.partialorder %v845_v50, 0.0  ;;  %v909_v55 = vmul.f32 0.2, %v845_v50 }
  0xc7   : > { %v577_v56 = vpop.permute.xlu0 %576  ;;  %v582_v57 = vpop.permute.xlu1 %581  ;;  %1391 = vmatprep.subr.bf16.mxu0 %v1390_v53  ;;  %1413 = vmatprep.subr.bf16.mxu1 %v1390_v53 }
  0xc8   : > { %v940_v58 = vsel %vm876_vm14, %v844_v49, %v908_v54  ;;  %v941_v59 = vsel %vm877_vm15, %v845_v50, %v909_v55  ;;  %v638_v1 = vmul.f32 %v577_v56, %v414_v61  ;;  %v639_v2 = vmul.f32 %v582_v57, %v415_v62  ;;  %v418_v57 = vld [vmem:[%s1728_s27 + $0xe0] sm:$0xff] }
  0xc9   : > { %v1392_v60 = vpack.c.bf16 %v941_v59, %v940_v58  ;;  %v419_v58 = vld [vmem:[%s1728_s27 + $0xe8] sm:$0xff] }
  0xcb   : > { %v497_v63 = vpop.permute.xlu0 %496  ;;  %v502_v0 = vpop.permute.xlu1 %501  ;;  %1393 = vmatpush3.bf16.msra.mxu0 %v1392_v60  ;;  %1421 = vmatpush3.bf16.msra.mxu1 %v1392_v60 }
  0xcc   : > { %v622_v9 = vmul.f32 %v497_v63, %v398_v3  ;;  %v623_v10 = vmul.f32 %v502_v0, %v399_v4  ;;  %v402_v63 = vld [vmem:[%s1728_s27 + $0x60] sm:$0xff]  ;;  %v403_v0 = vld [vmem:[%s1728_s27 + $0x68] sm:$0xff] }
  0xcf   : > { %v801_v5 = vpop.permute.xlu0 %800  ;;  %v806_v6 = vpop.permute.xlu1 %805 }
  0xd0   : > { %v862_v7 = vadd.f32 %v801_v5, %v638_v1  ;;  %v863_v8 = vadd.f32 %v806_v6, %v639_v2 }
  0xd2   : > { %vm894_vm0 = vcmp.gt.f32.partialorder %v862_v7, 0.0  ;;  %v926_v11 = vmul.f32 0.2, %v862_v7  ;;  %vm895_vm1 = vcmp.gt.f32.partialorder %v863_v8, 0.0  ;;  %v927_v12 = vmul.f32 0.2, %v863_v8 }
  0xd3   : > { %v721_v13 = vpop.permute.xlu0 %720  ;;  %v726_v14 = vpop.permute.xlu1 %725 }
  0xd4   : > { %v846_v15 = vadd.f32 %v721_v13, %v622_v9  ;;  %v847_v16 = vadd.f32 %v726_v14, %v623_v10  ;;  %v958_v17 = vsel %vm894_vm0, %v862_v7, %v926_v11  ;;  %v959_v18 = vsel %vm895_vm1, %v863_v8, %v927_v12 }
  0xd5   : > { %v1394_v19 = vpack.c.bf16 %v959_v18, %v958_v17 }
  0xd6   : > { %vm878_vm2 = vcmp.gt.f32.partialorder %v846_v15, 0.0  ;;  %v910_v20 = vmul.f32 0.2, %v846_v15  ;;  %vm879_vm3 = vcmp.gt.f32.partialorder %v847_v16, 0.0  ;;  %v911_v21 = vmul.f32 0.2, %v847_v16 }
  0xd7   : > { %v587_v22 = vpop.permute.xlu0 %586  ;;  %v592_v23 = vpop.permute.xlu1 %591  ;;  %1395 = vmatprep.subr.bf16.mxu0 %v1394_v19  ;;  %1414 = vmatprep.subr.bf16.mxu1 %v1394_v19 }
  0xd8   : > { %v942_v24 = vsel %vm878_vm2, %v846_v15, %v910_v20  ;;  %v943_v25 = vsel %vm879_vm3, %v847_v16, %v911_v21  ;;  %v640_v31 = vmul.f32 %v587_v22, %v416_v27  ;;  %v641_v32 = vmul.f32 %v592_v23, %v417_v28  ;;  %v420_v23 = vld [vmem:[%s1728_s27 + $0xf0] sm:$0xff] }
  0xd9   : > { %v1396_v26 = vpack.c.bf16 %v943_v25, %v942_v24  ;;  %v421_v24 = vld [vmem:[%s1728_s27 + $0xf8] sm:$0xff] }
  0xdb   : > { %v507_v29 = vpop.permute.xlu0 %506  ;;  %v512_v30 = vpop.permute.xlu1 %511  ;;  %1397 = vmatpush3.bf16.msra.mxu0 %v1396_v26  ;;  %1422 = vmatpush3.bf16.msra.mxu1 %v1396_v26 }
  0xdc   : > { %v624_v39 = vmul.f32 %v507_v29, %v400_v33  ;;  %v625_v40 = vmul.f32 %v512_v30, %v401_v34  ;;  %v404_v29 = vld [vmem:[%s1728_s27 + $0x70] sm:$0xff]  ;;  %v405_v30 = vld [vmem:[%s1728_s27 + $0x78] sm:$0xff] }
  0xdf   : > { %v811_v35 = vpop.permute.xlu0 %810  ;;  %v816_v36 = vpop.permute.xlu1 %815 }
  0xe0   : > { %v864_v37 = vadd.f32 %v811_v35, %v640_v31  ;;  %v865_v38 = vadd.f32 %v816_v36, %v641_v32 }
  0xe2   : > { %vm896_vm4 = vcmp.gt.f32.partialorder %v864_v37, 0.0  ;;  %v928_v41 = vmul.f32 0.2, %v864_v37  ;;  %vm897_vm5 = vcmp.gt.f32.partialorder %v865_v38, 0.0  ;;  %v929_v42 = vmul.f32 0.2, %v865_v38 }
  0xe3   : > { %v731_v43 = vpop.permute.xlu0 %730  ;;  %v736_v44 = vpop.permute.xlu1 %735 }
  0xe4   : > { %v848_v45 = vadd.f32 %v731_v43, %v624_v39  ;;  %v849_v46 = vadd.f32 %v736_v44, %v625_v40  ;;  %v960_v47 = vsel %vm896_vm4, %v864_v37, %v928_v41  ;;  %v961_v48 = vsel %vm897_vm5, %v865_v38, %v929_v42 }
  0xe5   : > { %v1398_v49 = vpack.c.bf16 %v961_v48, %v960_v47 }
  0xe6   : > { %vm880_vm6 = vcmp.gt.f32.partialorder %v848_v45, 0.0  ;;  %v912_v50 = vmul.f32 0.2, %v848_v45  ;;  %vm881_vm7 = vcmp.gt.f32.partialorder %v849_v46, 0.0  ;;  %v913_v51 = vmul.f32 0.2, %v849_v46 }
  0xe7   : > { %v597_v52 = vpop.permute.xlu0 %596  ;;  %v602_v53 = vpop.permute.xlu1 %601  ;;  %1399 = vmatprep.subr.bf16.mxu0 %v1398_v49  ;;  %1415 = vmatprep.subr.bf16.mxu1 %v1398_v49 }
  0xe8   : > { %v944_v54 = vsel %vm880_vm6, %v848_v45, %v912_v50  ;;  %v945_v55 = vsel %vm881_vm7, %v849_v46, %v913_v51  ;;  %v642_v61 = vmul.f32 %v597_v52, %v418_v57  ;;  %v643_v62 = vmul.f32 %v602_v53, %v419_v58  ;;  %v970_v51 = vld [vmem:[%s1736_s6] sm:$0xff]  ;;  %v973_v53 = vld [vmem:[%s1736_s6 + $0x18] sm:$0xff] }
  0xe9   : > { %v1400_v56 = vpack.c.bf16 %v945_v55, %v944_v54  ;;  %v974_v52 = vld [vmem:[%s1736_s6 + $0x20] sm:$0xff]  ;;  %v977_v54 = vld [vmem:[%s1736_s6 + $0x38] sm:$0xff]  ;;  %v972_v55 = vld [vmem:[%s1736_s6 + $0x10] sm:$0xff] }
  0xeb   : > { %v517_v59 = vpop.permute.xlu0 %516  ;;  %v522_v60 = vpop.permute.xlu1 %521  ;;  %1401 = vmatpush3.bf16.msra.mxu0 %v1400_v56  ;;  %1423 = vmatpush3.bf16.msra.mxu1 %v1400_v56  ;;  %v976_v56 = vld [vmem:[%s1736_s6 + $0x30] sm:$0xff] }
  0xec   : > { %v626_v5 = vmul.f32 %v517_v59, %v402_v63  ;;  %v627_v6 = vmul.f32 %v522_v60, %v403_v0 }
  0xef   : > { %v821_v1 = vpop.permute.xlu0 %820  ;;  %v826_v2 = vpop.permute.xlu1 %825 }
  0xf0   : > { %v866_v3 = vadd.f32 %v821_v1, %v642_v61  ;;  %v867_v4 = vadd.f32 %v826_v2, %v643_v62 }
  0xf2   : > { %vm898_vm8 = vcmp.gt.f32.partialorder %v866_v3, 0.0  ;;  %v930_v7 = vmul.f32 0.2, %v866_v3  ;;  %vm899_vm9 = vcmp.gt.f32.partialorder %v867_v4, 0.0  ;;  %v931_v8 = vmul.f32 0.2, %v867_v4 }
  0xf3   : > { %v741_v9 = vpop.permute.xlu0 %740  ;;  %v746_v10 = vpop.permute.xlu1 %745 }
  0xf4   : > { %v850_v11 = vadd.f32 %v741_v9, %v626_v5  ;;  %v851_v12 = vadd.f32 %v746_v10, %v627_v6  ;;  %v962_v13 = vsel %vm898_vm8, %v866_v3, %v930_v7  ;;  %v963_v14 = vsel %vm899_vm9, %v867_v4, %v931_v8 }
  0xf5   : > { %v1402_v15 = vpack.c.bf16 %v963_v14, %v962_v13  ;;  %v1102_v9 = vlaneseq }
  0xf6   : > { %vm882_vm10 = vcmp.gt.f32.partialorder %v850_v11, 0.0  ;;  %v914_v16 = vmul.f32 0.2, %v850_v11  ;;  %vm883_vm11 = vcmp.gt.f32.partialorder %v851_v12, 0.0  ;;  %v915_v17 = vmul.f32 0.2, %v851_v12 }
  0xf7   : > { %v607_v18 = vpop.permute.xlu0 %606  ;;  %v612_v19 = vpop.permute.xlu1 %611  ;;  %1403 = vmatprep.subr.bf16.mxu0 %v1402_v15  ;;  %1416 = vmatprep.subr.bf16.mxu1 %v1402_v15  ;;  %v1103_v10 = vand.u32 127, %v1102_v9 }
  0xf8   : > { %v946_v20 = vsel %vm882_vm10, %v850_v11, %v914_v16  ;;  %v947_v21 = vsel %vm883_vm11, %v851_v12, %v915_v17  ;;  %v644_v27 = vmul.f32 %v607_v18, %v420_v23  ;;  %v645_v28 = vmul.f32 %v612_v19, %v421_v24 }
  0xf9   : > { %v1404_v22 = vpack.c.bf16 %v947_v21, %v946_v20  ;;  %vm1104_vm0 = vcmp.eq.s32.totalorder %v1103_v10, 0  ;;  %vm1109_vm1 = vcmp.eq.s32.totalorder %v1103_v10, 1 }
  0xfb   : > { %v527_v25 = vpop.permute.xlu0 %526  ;;  %v532_v26 = vpop.permute.xlu1 %531  ;;  %1405 = vmatpush3.bf16.msra.mxu0 %v1404_v22  ;;  %1424 = vmatpush3.bf16.msra.mxu1 %v1404_v22 }
  0xfc   : > { %v628_v35 = vmul.f32 %v527_v25, %v404_v29  ;;  %v629_v36 = vmul.f32 %v532_v26, %v405_v30 }
  0xff   : > { %v831_v31 = vpop.permute.xlu0 %830  ;;  %v836_v32 = vpop.permute.xlu1 %835 }
 0x100   : > { %v868_v33 = vadd.f32 %v831_v31, %v644_v27  ;;  %v869_v34 = vadd.f32 %v836_v32, %v645_v28 }
 0x102   : > { %vm900_vm12 = vcmp.gt.f32.partialorder %v868_v33, 0.0  ;;  %v932_v37 = vmul.f32 0.2, %v868_v33  ;;  %vm901_vm13 = vcmp.gt.f32.partialorder %v869_v34, 0.0  ;;  %v933_v38 = vmul.f32 0.2, %v869_v34 }
 0x103   : > { %v751_v39 = vpop.permute.xlu0 %750  ;;  %v756_v40 = vpop.permute.xlu1 %755 }
 0x104   : > { %v852_v41 = vadd.f32 %v751_v39, %v628_v35  ;;  %v853_v42 = vadd.f32 %v756_v40, %v629_v36  ;;  %v964_v43 = vsel %vm900_vm12, %v868_v33, %v932_v37  ;;  %v965_v44 = vsel %vm901_vm13, %v869_v34, %v933_v38 }
 0x105   : > { %v1406_v45 = vpack.c.bf16 %v965_v44, %v964_v43 }
 0x106   : > { %vm884_vm14 = vcmp.gt.f32.partialorder %v852_v41, 0.0  ;;  %v916_v46 = vmul.f32 0.2, %v852_v41  ;;  %vm885_vm15 = vcmp.gt.f32.partialorder %v853_v42, 0.0  ;;  %v917_v47 = vmul.f32 0.2, %v853_v42 }
 0x107   : > { %1407 = vmatprep.subr.bf16.mxu0 %v1406_v45  ;;  %1417 = vmatprep.subr.bf16.mxu1 %v1406_v45 }
 0x108   : > { %v948_v48 = vsel %vm884_vm14, %v852_v41, %v916_v46  ;;  %v949_v49 = vsel %vm885_vm15, %v853_v42, %v917_v47 }
 0x109   : > { %v1408_v50 = vpack.c.bf16 %v949_v49, %v948_v48 }
 0x10b   : > { %1409 = vmatpush3.bf16.msra.mxu0 %v1408_v50  ;;  %1425 = vmatpush3.bf16.msra.mxu1 %v1408_v50 }
 0x10e   : > { %1043 = vmatmul.mubr.f32.vlgmr.msra.gmra.mrb[0].mxu0 %v970_v51  ;;  %1053 = vmatmul.mubr.f32.vlgmr.msra.gmra.mrb[0].mxu1 %v974_v52 }
 0x10f   : > { %1047 = vmatprep.mubr.f32.mxu0 %v973_v53  ;;  %1057 = vmatprep.mubr.f32.mxu1 %v977_v54 }
 0x112   : > { %1048 = vmatmul.mubr.f32.gmra.mrb[2].mxu0 %v972_v55  ;;  %1058 = vmatmul.mubr.f32.gmra.mrb[2].mxu1 %v976_v56 }
 0x1e1   : > { %v1366_v57 = vpop.f32.mrb[0].mxu0  ;;  %v1372_v58 = vpop.f32.mrb[0].mxu1 }
 0x1e2   : > { %v1367_v59 = vpop.f32.mrb[1].mxu0  ;;  %v1373_v60 = vpop.f32.mrb[1].mxu1 }
 0x1e3   : > { %v1368_v61 = vadd.f32 %v1367_v59, %v1366_v57  ;;  %v1374_v62 = vadd.f32 %v1373_v60, %v1372_v58 }
 0x1e5   : > { %1078 = vst [vmem:[%s372_s10] sm:$0xff] %v1368_v61  ;;  %1080 = vst [vmem:[%s372_s10 + $0x10] sm:$0xff] %v1374_v62  ;;  %1082 = vadd.xlane.f32.xlu0 %v1368_v61  ;;  %v1369_v63 = vpop.f32.mrb[2].mxu0  ;;  %v1090_v0 = vmul.f32 %v1368_v61, %v1368_v61  ;;  %v1375_v1 = vpop.f32.mrb[2].mxu1  ;;  %v1092_v6 = vmul.f32 %v1374_v62, %v1374_v62 }
 0x1e6   : > { %v1370_v2 = vpop.f32.mrb[3].mxu0  ;;  %v1376_v3 = vpop.f32.mrb[3].mxu1 }
 0x1e7   : > { %1094 = vadd.xlane.f32.xlu1 %v1090_v0  ;;  %v1371_v4 = vadd.f32 %v1370_v2, %v1369_v63  ;;  %v1377_v5 = vadd.f32 %v1376_v3, %v1375_v1 }
 0x1e9   : > { %1079 = vst [vmem:[%s372_s10 + $0x8] sm:$0xff] %v1371_v4  ;;  %1081 = vst [vmem:[%s372_s10 + $0x18] sm:$0xff] %v1377_v5  ;;  %1086 = vadd.xlane.f32.xlu0 %v1374_v62  ;;  %v1091_v7 = vmul.f32 %v1371_v4, %v1371_v4  ;;  %v1093_v8 = vmul.f32 %v1377_v5, %v1377_v5 }
 0x1eb   : > { %1084 = vadd.xlane.f32.xlu1 %v1371_v4 }
 0x1ed   : > { %1088 = vadd.xlane.f32.xlu0 %v1377_v5 }
 0x1ef   : > { %1098 = vadd.xlane.f32.xlu1 %v1092_v6 }
 0x1f1   : > { %1096 = vadd.xlane.f32.xlu0 %v1091_v7 }
 0x1f5   : > { %1100 = vadd.xlane.f32.xlu0 %v1093_v8 }
 0x272   : > { %v1083_v11 = vpop.xlane.xlu0 %1082 }
 0x273   : > { %v1105_v13 = vsel %vm1104_vm0, %v1083_v11, 0.0 }
 0x274   : > { %v1095_v12 = vpop.xlane.xlu1 %1094 }
 0x275   : > { %v1110_v14 = vsel %vm1109_vm1, %v1095_v12, 0.0 }
 0x276   : > { %v1114_v15 = vadd.f32 %v1110_v14, %v1105_v13  ;;  %v1087_v16 = vpop.xlane.xlu0 %1086 }
 0x277   : > { %v1107_v20 = vsel %vm1104_vm0, %v1087_v16, 0.0 }
 0x278   : > { %1118 = vst [vmem:[%s381_s13] sm:$0xff] %v1114_v15  ;;  %v1085_v17 = vpop.xlane.xlu1 %1084 }
 0x279   : > { %v1106_v24 = vsel %vm1104_vm0, %v1085_v17, 0.0 }
 0x27a   : > { %v1089_v18 = vpop.xlane.xlu0 %1088 }
 0x27b   : > { %v1108_v28 = vsel %vm1104_vm0, %v1089_v18, 0.0 }
 0x27c   : > { %v1099_v19 = vpop.xlane.xlu1 %1098 }
 0x27d   : > { %v1112_v21 = vsel %vm1109_vm1, %v1099_v19, 0.0 }
 0x27e   : > { %v1116_v22 = vadd.f32 %v1112_v21, %v1107_v20  ;;  %v1097_v23 = vpop.xlane.xlu0 %1096 }
 0x27f   : > { %v1111_v25 = vsel %vm1109_vm1, %v1097_v23, 0.0 }
 0x280   : > { %1120 = vst [vmem:[%s381_s13 + $0x10] sm:$0xff] %v1116_v22  ;;  %v1115_v26 = vadd.f32 %v1111_v25, %v1106_v24 }
 0x282   : > { %1119 = vst [vmem:[%s381_s13 + $0x8] sm:$0xff] %v1115_v26  ;;  %v1101_v27 = vpop.xlane.xlu0 %1100 }
 0x283   : > { %v1113_v29 = vsel %vm1109_vm1, %v1101_v27, 0.0 }
 0x284   : > { %v1117_v30 = vadd.f32 %v1113_v29, %v1108_v28 }
 0x286   : > { %1121 = vst [vmem:[%s381_s13 + $0x18] sm:$0xff] %v1117_v30 }
 0x287 PF: > { %s16_s20 = sadd.s32 1, %s1475_s20   ;;  %s1810_s18 = smov %s1471_s19 }
 0x288   : > { %p13_p5 = scmp.ge.s32.totalorder %s16_s20, 6   ;;  %s1811_s19 = smov %s1813_s21 }
 0x28a   :  { %15 = sbr.rel (!%p13_p5) target bundleno = 2 (0x2), region = 95 }

// kernel: _lambda_.9
= control target key start
LH: loop header
LB: loop body
LE: loop exit
PB: predicated region body
PF: predicated region fallthrough
CT: control target
= control target key end

     0   :  { %s1581_s18 = smov 0   ;;  %s1583_s19 = smov 0   ;;  %s2106_s0 = inlined_call_operand.vmem [shape: f32[4,128,512], index: 0, kind: input, shape index: {}]   ;;  %s2107_s1 = inlined_call_operand.vmem [shape: f32[4,16,128], index: 1, kind: input, shape index: {}]   ;;  %s2108_s2 = inlined_call_operand.vmem [shape: f32[128,1], index: 2, kind: input, shape index: {}]   ;;  %s2109_s3 = inlined_call_operand.vmem [shape: f32[128,1], index: 3, kind: input, shape index: {}]   ;;  %s2110_s4 = inlined_call_operand.vmem [shape: f32[4,16,512], index: 4, kind: output, shape index: {0}]   ;;  %s2111_s5 = inlined_call_operand.vmem [shape: f32[4,1,16,128], index: 5, kind: output, shape index: {1}]  }
   0x1   :  { %s1585_s20 = smov 0  }
   0x2 LB: > { %s35_s21 = sadd.s32 1, %s1543_s19  ;;  %p1418_p0 = scmp.ge.s32.totalorder %s1547_s20, 1  ;;  %s1547_s20 = sphi %s1585_s20, %s16_s20   ;;  %s1543_s19 = sphi %s1583_s19, %s2113_s19   ;;  %s1539_s18 = sphi %s1581_s18, %s2112_s18  }
   0x3   : > { %p37_p1 = scmp.ge.s32.totalorder %s35_s21, 4  ;;  %p265_p2 = scmp.lt.s32.totalorder %s1547_s20, 5 }
   0x5   : > { %s2115_s21 = smov (%p37_p1, %s35_s21), 0  ;;  %p266_p3 = pnand %p1418_p0, %p265_p2 }
   0x6   : > { %v624_v0 = vld [vmem:[%s2109_s3] sm:$0xff] (!%p266_p3)  ;;  %v1549_v2 = vmov (!%p266_p3), 0   ;;  %v625_v3 = vld [vmem:[%s2109_s3 + $0x8] sm:$0xff] (!%p266_p3)  ;;  %v467_v5 = vld [vmem:[%s2108_s2 + $0x18] sm:$0xff] (!%p266_p3)  ;;  %v1550_v33 = vmov (!%p266_p3), 0.0   ;;  %p335_p4 = scmp.lt.s32.totalorder (!%p266_p3), %s1539_s18, 3 }
   0x7   : > { %269 = sbr.rel (%p266_p3) target bundleno = 603 (0x25b), region = 36  ;;  %v464_v1 = vld [vmem:[%s2108_s2] sm:$0xff] (!%p266_p3)  ;;  %1524 = vset.pattern.permute.xlu1 (!%p266_p3), %v1549_v2  ;;  %1523 = vset.pattern.permute.xlu0 (!%p266_p3), %v1549_v2  ;;  %v465_v4 = vld [vmem:[%s2108_s2 + $0x8] sm:$0xff] (!%p266_p3)  ;;  %v466_v6 = vld [vmem:[%s2108_s2 + $0x10] sm:$0xff] (!%p266_p3) }
   0x8   : > { %642 = vperm.xlu1 (!%p266_p3), %1524, %v624_v0   ;;  %482 = vperm.xlu0 (!%p266_p3), %1523, %v464_v1   ;;  %v627_v7 = vld [vmem:[%s2109_s3 + $0x18] sm:$0xff] (!%p266_p3)  ;;  %v626_v8 = vld [vmem:[%s2109_s3 + $0x10] sm:$0xff] (!%p266_p3)  ;;  %v469_v9 = vld [vmem:[%s2108_s2 + $0x28] sm:$0xff] (!%p266_p3) }
   0x9   : > { %v468_v10 = vld [vmem:[%s2108_s2 + $0x20] sm:$0xff] (!%p266_p3)  ;;  %v629_v11 = vld [vmem:[%s2109_s3 + $0x28] sm:$0xff] (!%p266_p3)  ;;  %v471_v13 = vld [vmem:[%s2108_s2 + $0x38] sm:$0xff] (!%p266_p3)  ;;  %1050 = vmatprep.mubr.f32.mxu0 (!%p266_p3), %v1550_v33  ;;  %1127 = vmatprep.mubr.f32.mxu1 (!%p266_p3), %v1550_v33 }
   0xa   : > { %v628_v12 = vld [vmem:[%s2109_s3 + $0x20] sm:$0xff] (!%p266_p3)  ;;  %v470_v14 = vld [vmem:[%s2108_s2 + $0x30] sm:$0xff] (!%p266_p3)  ;;  %v631_v15 = vld [vmem:[%s2109_s3 + $0x38] sm:$0xff] (!%p266_p3) }
   0xb   : > { %v630_v16 = vld [vmem:[%s2109_s3 + $0x30] sm:$0xff] (!%p266_p3)  ;;  %v473_v17 = vld [vmem:[%s2108_s2 + $0x48] sm:$0xff] (!%p266_p3)  ;;  %v472_v18 = vld [vmem:[%s2108_s2 + $0x40] sm:$0xff] (!%p266_p3) }
   0xc   : > { %647 = vperm.xlu1 (!%p266_p3), %1524, %v625_v3   ;;  %487 = vperm.xlu0 (!%p266_p3), %1523, %v465_v4   ;;  %v633_v19 = vld [vmem:[%s2109_s3 + $0x48] sm:$0xff] (!%p266_p3)  ;;  %v632_v20 = vld [vmem:[%s2109_s3 + $0x40] sm:$0xff] (!%p266_p3)  ;;  %v475_v21 = vld [vmem:[%s2108_s2 + $0x58] sm:$0xff] (!%p266_p3) }
   0xd   : > { %v474_v22 = vld [vmem:[%s2108_s2 + $0x50] sm:$0xff] (!%p266_p3)  ;;  %v635_v23 = vld [vmem:[%s2109_s3 + $0x58] sm:$0xff] (!%p266_p3)  ;;  %v477_v25 = vld [vmem:[%s2108_s2 + $0x68] sm:$0xff] (!%p266_p3) }
   0xe   : > { %v634_v24 = vld [vmem:[%s2109_s3 + $0x50] sm:$0xff]  ;;  %v476_v26 = vld [vmem:[%s2108_s2 + $0x60] sm:$0xff]  ;;  %v637_v27 = vld [vmem:[%s2109_s3 + $0x68] sm:$0xff]  ;;  %s2117_s18 = smov (!%p335_p4, %s1539_s18), 3 }
   0xf   : > { %v636_v28 = vld [vmem:[%s2109_s3 + $0x60] sm:$0xff]  ;;  %v479_v29 = vld [vmem:[%s2108_s2 + $0x78] sm:$0xff]  ;;  %v478_v30 = vld [vmem:[%s2108_s2 + $0x70] sm:$0xff]  ;;  %s1429_s23 = sshll.u32 %s2117_s18, 9  ;;  %s1430_s27 = sshll.u32 %s2117_s18, 4 }
  0x10   : > { %497 = vperm.xlu1 %1524, %v467_v5   ;;  %492 = vperm.xlu0 %1523, %v466_v6   ;;  %v639_v31 = vld [vmem:[%s2109_s3 + $0x78] sm:$0xff]  ;;  %v638_v32 = vld [vmem:[%s2109_s3 + $0x70] sm:$0xff]  ;;  %s1707_s26 = scalar_lea.vmem %s2106_s0, %s1429_s23  ;;  %s356_s30 = scalar_lea.vmem %s2107_s1, %s1430_s27 }
  0x11   : > { %v400_v34 = vld [vmem:[%s1707_s26] sm:$0xff]  ;;  %v401_v35 = vld [vmem:[%s1707_s26 + $0x8] sm:$0xff]  ;;  %v402_v36 = vld [vmem:[%s1707_s26 + $0x10] sm:$0xff]  ;;  %s1431_s6 = sshll.u32 %s2117_s18, 6  ;;  %s387_s12 = scalar_lea.vmem %s2111_s5, %s1430_s27 }
  0x12   : > { %v403_v37 = vld [vmem:[%s1707_s26 + $0x18] sm:$0xff]  ;;  %v404_v44 = vld [vmem:[%s1707_s26 + $0x20] sm:$0xff]  ;;  %v405_v45 = vld [vmem:[%s1707_s26 + $0x28] sm:$0xff]  ;;  %s2082_s9 = scalar_lea.vmem %s2110_s4, %s1431_s6 }
  0x13   : > { %v406_v46 = vld [vmem:[%s1707_s26 + $0x30] sm:$0xff]  ;;  %v407_v47 = vld [vmem:[%s1707_s26 + $0x38] sm:$0xff]  ;;  %v412_v53 = vld [vmem:[%s1707_s26 + $0x60] sm:$0xff] }
  0x14   : > { %657 = vperm.xlu1 %1524, %v627_v7   ;;  %652 = vperm.xlu0 %1523, %v626_v8   ;;  %v413_v54 = vld [vmem:[%s1707_s26 + $0x68] sm:$0xff]  ;;  %v414_v60 = vld [vmem:[%s1707_s26 + $0x70] sm:$0xff]  ;;  %v415_v61 = vld [vmem:[%s1707_s26 + $0x78] sm:$0xff] }
  0x15   : > { %v408_v62 = vld [vmem:[%s1707_s26 + $0x40] sm:$0xff]  ;;  %v409_v1 = vld [vmem:[%s1707_s26 + $0x48] sm:$0xff]  ;;  %v410_v2 = vld [vmem:[%s1707_s26 + $0x50] sm:$0xff] }
  0x16   : > { %v411_v3 = vld [vmem:[%s1707_s26 + $0x58] sm:$0xff] }
  0x18   : > { %507 = vperm.xlu1 %1524, %v469_v9   ;;  %502 = vperm.xlu0 %1523, %v468_v10  }
  0x1c   : > { %667 = vperm.xlu1 %1524, %v629_v11   ;;  %662 = vperm.xlu0 %1523, %v628_v12  }
  0x20   : > { %517 = vperm.xlu1 %1524, %v471_v13   ;;  %512 = vperm.xlu0 %1523, %v470_v14  }
  0x24   : > { %677 = vperm.xlu1 %1524, %v631_v15   ;;  %672 = vperm.xlu0 %1523, %v630_v16  }
  0x28   : > { %527 = vperm.xlu1 %1524, %v473_v17   ;;  %522 = vperm.xlu0 %1523, %v472_v18  }
  0x2c   : > { %687 = vperm.xlu1 %1524, %v633_v19   ;;  %682 = vperm.xlu0 %1523, %v632_v20  }
  0x30   : > { %537 = vperm.xlu1 %1524, %v475_v21   ;;  %532 = vperm.xlu0 %1523, %v474_v22  }
  0x34   : > { %697 = vperm.xlu1 %1524, %v635_v23   ;;  %692 = vperm.xlu0 %1523, %v634_v24  }
  0x38   : > { %547 = vperm.xlu1 %1524, %v477_v25   ;;  %542 = vperm.xlu0 %1523, %v476_v26  }
  0x3c   : > { %707 = vperm.xlu1 %1524, %v637_v27   ;;  %702 = vperm.xlu0 %1523, %v636_v28  }
  0x40   : > { %557 = vperm.xlu1 %1524, %v479_v29   ;;  %552 = vperm.xlu0 %1523, %v478_v30  }
  0x44   : > { %717 = vperm.xlu1 %1524, %v639_v31   ;;  %712 = vperm.xlu0 %1523, %v638_v32  }
  0x87   : > { %v643_v38 = vpop.permute.xlu1 %642  ;;  %v483_v39 = vpop.permute.xlu0 %482 }
  0x88   : > { %v560_v40 = vmul.f32 %v483_v39, %v400_v34  ;;  %v561_v41 = vmul.f32 %v483_v39, %v401_v35  ;;  %v562_v42 = vmul.f32 %v483_v39, %v402_v36  ;;  %v563_v43 = vmul.f32 %v483_v39, %v403_v37  ;;  %v420_v36 = vld [vmem:[%s1707_s26 + $0xa0] sm:$0xff]  ;;  %v421_v37 = vld [vmem:[%s1707_s26 + $0xa8] sm:$0xff] }
  0x8a   : > { %v721_v48 = vadd.f32 %v643_v38, %v561_v41  ;;  %v723_v49 = vadd.f32 %v643_v38, %v563_v43  ;;  %v720_v50 = vadd.f32 %v643_v38, %v560_v40  ;;  %v1719_v55 = vadd.f32 %v643_v38, %v562_v42  ;;  %v422_v38 = vld [vmem:[%s1707_s26 + $0xb0] sm:$0xff]  ;;  %v423_v42 = vld [vmem:[%s1707_s26 + $0xb8] sm:$0xff]  ;;  %v416_v43 = vld [vmem:[%s1707_s26 + $0x80] sm:$0xff] }
  0x8b   : > { %v648_v51 = vpop.permute.xlu1 %647  ;;  %v488_v52 = vpop.permute.xlu0 %487 }
  0x8c   : > { %v564_v56 = vmul.f32 %v488_v52, %v404_v44  ;;  %v565_v57 = vmul.f32 %v488_v52, %v405_v45  ;;  %v566_v58 = vmul.f32 %v488_v52, %v406_v46  ;;  %v567_v59 = vmul.f32 %v488_v52, %v407_v47  ;;  %v419_v52 = vld [vmem:[%s1707_s26 + $0x98] sm:$0xff] }
  0x8d   : > { %vm785_vm0 = vcmp.gt.f32.partialorder %v721_v48, 0.0  ;;  %v849_v63 = vmul.f32 0.2, %v721_v48  ;;  %vm787_vm1 = vcmp.gt.f32.partialorder %v723_v49, 0.0  ;;  %v851_v0 = vmul.f32 0.2, %v723_v49 }
  0x8e   : > { %v725_v4 = vadd.f32 %v648_v51, %v565_v57  ;;  %v727_v5 = vadd.f32 %v648_v51, %v567_v59  ;;  %v724_v6 = vadd.f32 %v648_v51, %v564_v56  ;;  %vm784_vm2 = vcmp.gt.f32.partialorder %v720_v50, 0.0 }
  0x8f   : > { %v498_v7 = vpop.permute.xlu1 %497  ;;  %v493_v8 = vpop.permute.xlu0 %492  ;;  %v913_v9 = vsel %vm785_vm0, %v721_v48, %v849_v63  ;;  %v915_v10 = vsel %vm787_vm1, %v723_v49, %v851_v0  ;;  %v848_v11 = vmul.f32 0.2, %v720_v50  ;;  %v726_v12 = vadd.f32 %v648_v51, %v566_v58  ;;  %v418_v51 = vld [vmem:[%s1707_s26 + $0x90] sm:$0xff] }
  0x90   : > { %v572_v13 = vmul.f32 %v498_v7, %v412_v53  ;;  %v573_v14 = vmul.f32 %v498_v7, %v413_v54  ;;  %v574_v15 = vmul.f32 %v498_v7, %v414_v60  ;;  %v575_v16 = vmul.f32 %v498_v7, %v415_v61 }
  0x91   : > { %v568_v17 = vmul.f32 %v493_v8, %v408_v62  ;;  %v569_v18 = vmul.f32 %v493_v8, %v409_v1  ;;  %v570_v19 = vmul.f32 %v493_v8, %v410_v2  ;;  %v571_v20 = vmul.f32 %v493_v8, %v411_v3 }
  0x92   : > { %vm789_vm3 = vcmp.gt.f32.partialorder %v725_v4, 0.0  ;;  %v853_v21 = vmul.f32 0.2, %v725_v4  ;;  %vm791_vm4 = vcmp.gt.f32.partialorder %v727_v5, 0.0  ;;  %v855_v22 = vmul.f32 0.2, %v727_v5 }
  0x93   : > { %v658_v23 = vpop.permute.xlu1 %657  ;;  %v653_v24 = vpop.permute.xlu0 %652  ;;  %vm788_vm5 = vcmp.gt.f32.partialorder %v724_v6, 0.0  ;;  %v852_v25 = vmul.f32 0.2, %v724_v6  ;;  %v912_v26 = vsel %vm784_vm2, %v720_v50, %v848_v11  ;;  %vm786_vm6 = vcmp.gt.f32.partialorder %v1719_v55, 0.0  ;;  %v417_v50 = vld [vmem:[%s1707_s26 + $0x88] sm:$0xff] }
  0x94   : > { %v1729_v27 = vadd.f32 %v658_v23, %v572_v13  ;;  %v733_v28 = vadd.f32 %v658_v23, %v573_v14  ;;  %v1731_v29 = vadd.f32 %v658_v23, %v574_v15  ;;  %v1733_v30 = vadd.f32 %v658_v23, %v575_v16  ;;  %v428_v15 = vld [vmem:[%s1707_s26 + $0xe0] sm:$0xff] }
  0x95   : > { %v1735_v31 = vadd.f32 %v653_v24, %v568_v17  ;;  %v729_v32 = vadd.f32 %v653_v24, %v569_v18  ;;  %v1737_v34 = vadd.f32 %v653_v24, %v570_v19  ;;  %v1739_v35 = vadd.f32 %v653_v24, %v571_v20  ;;  %v429_v20 = vld [vmem:[%s1707_s26 + $0xe8] sm:$0xff] }
  0x96   : > { %v917_v39 = vsel %vm789_vm3, %v725_v4, %v853_v21  ;;  %v919_v40 = vsel %vm791_vm4, %v727_v5, %v855_v22  ;;  %v916_v41 = vsel %vm788_vm5, %v724_v6, %v852_v25  ;;  %vm790_vm7 = vcmp.gt.f32.partialorder %v726_v12, 0.0 }
  0x97   : > { %v1433_v44 = vpack.c.bf16 %v917_v39, %v913_v9  ;;  %v1465_v45 = vpack.c.bf16 %v919_v40, %v915_v10  ;;  %v1435_v46 = vpack.c.bf16 %v916_v41, %v912_v26  ;;  %v850_v47 = vmul.f32 0.2, %v1719_v55  ;;  %v508_v48 = vpop.permute.xlu1 %507  ;;  %v503_v49 = vpop.permute.xlu0 %502  ;;  %v425_v41 = vld [vmem:[%s1707_s26 + $0xc8] sm:$0xff] }
  0x98   : > { %v854_v53 = vmul.f32 0.2, %v726_v12  ;;  %v580_v54 = vmul.f32 %v508_v48, %v420_v36  ;;  %v581_v56 = vmul.f32 %v508_v48, %v421_v37  ;;  %v582_v57 = vmul.f32 %v508_v48, %v422_v38  ;;  %v424_v36 = vld [vmem:[%s1707_s26 + $0xc0] sm:$0xff] }
  0x99   : > { %1434 = vmatprep.subr.bf16.mxu0 %v1433_v44  ;;  %1466 = vmatprep.subr.bf16.mxu1 %v1465_v45  ;;  %v914_v58 = vsel %vm786_vm6, %v1719_v55, %v850_v47  ;;  %v583_v59 = vmul.f32 %v508_v48, %v423_v42  ;;  %v576_v60 = vmul.f32 %v503_v49, %v416_v43  ;;  %vm793_vm8 = vcmp.gt.f32.partialorder %v729_v32, 0.0  ;;  %v427_v42 = vld [vmem:[%s1707_s26 + $0xd8] sm:$0xff] }
  0x9a   : > { %1436 = vmatpush1.bf16.msra.mxu0 %v1435_v46  ;;  %v918_v61 = vsel %vm790_vm7, %v726_v12, %v854_v53  ;;  %v577_v62 = vmul.f32 %v503_v49, %v417_v50  ;;  %v578_v63 = vmul.f32 %v503_v49, %v418_v51  ;;  %v579_v0 = vmul.f32 %v503_v49, %v419_v52 }
  0x9b   : > { %v1467_v1 = vpack.c.bf16 %v918_v61, %v914_v58  ;;  %v668_v2 = vpop.permute.xlu1 %667  ;;  %v663_v3 = vpop.permute.xlu0 %662  ;;  %vm797_vm9 = vcmp.gt.f32.partialorder %v733_v28, 0.0  ;;  %v857_v4 = vmul.f32 0.2, %v729_v32  ;;  %v861_v5 = vmul.f32 0.2, %v733_v28 }
  0x9c   : > { %v1757_v6 = vadd.f32 %v668_v2, %v580_v54  ;;  %v1759_v7 = vadd.f32 %v668_v2, %v581_v56  ;;  %v1761_v55 = vadd.f32 %v668_v2, %v582_v57  ;;  %v1763_v8 = vadd.f32 %v668_v2, %v583_v59 }
  0x9d   : > { %1468 = vmatpush1.bf16.msra.mxu1 %v1467_v1  ;;  %v1765_v9 = vadd.f32 %v663_v3, %v576_v60  ;;  %v1767_v10 = vadd.f32 %v663_v3, %v577_v62  ;;  %v1769_v11 = vadd.f32 %v663_v3, %v578_v63  ;;  %v1771_v12 = vadd.f32 %v663_v3, %v579_v0 }
  0x9e   : > { %v921_v13 = vsel %vm793_vm8, %v729_v32, %v857_v4  ;;  %v925_v14 = vsel %vm797_vm9, %v733_v28, %v861_v5  ;;  %vm795_vm10 = vcmp.gt.f32.partialorder %v1739_v35, 0.0  ;;  %vm799_vm11 = vcmp.gt.f32.partialorder %v1733_v30, 0.0  ;;  %v430_v28 = vld [vmem:[%s1707_s26 + $0xf0] sm:$0xff]  ;;  %v431_v32 = vld [vmem:[%s1707_s26 + $0xf8] sm:$0xff]  ;;  %v436_v5 = vld [vmem:[%s1707_s26 + $0x120] sm:$0xff] }
  0x9f   : > { %v1437_v16 = vpack.c.bf16 %v925_v14, %v921_v13  ;;  %v859_v17 = vmul.f32 0.2, %v1739_v35  ;;  %v863_v18 = vmul.f32 0.2, %v1733_v30  ;;  %vm792_vm12 = vcmp.gt.f32.partialorder %v1735_v31, 0.0  ;;  %v518_v19 = vpop.permute.xlu1 %517  ;;  %v513_v21 = vpop.permute.xlu0 %512 }
  0xa0   : > { %vm796_vm13 = vcmp.gt.f32.partialorder %v1729_v27, 0.0  ;;  %v856_v22 = vmul.f32 0.2, %v1735_v31  ;;  %v860_v23 = vmul.f32 0.2, %v1729_v27  ;;  %vm794_vm14 = vcmp.gt.f32.partialorder %v1737_v34, 0.0 }
  0xa1   : > { %1438 = vmatprep.subr.bf16.mxu0 %v1437_v16  ;;  %v923_v24 = vsel %vm795_vm10, %v1739_v35, %v859_v17  ;;  %v927_v25 = vsel %vm799_vm11, %v1733_v30, %v863_v18  ;;  %vm798_vm15 = vcmp.gt.f32.partialorder %v1731_v29, 0.0  ;;  %v858_v26 = vmul.f32 0.2, %v1737_v34  ;;  %v426_v35 = vld [vmem:[%s1707_s26 + $0xd0] sm:$0xff]  ;;  %v437_v17 = vld [vmem:[%s1707_s26 + $0x128] sm:$0xff] }
  0xa2   : > { %v1469_v37 = vpack.c.bf16 %v927_v25, %v923_v24  ;;  %v920_v38 = vsel %vm792_vm12, %v1735_v31, %v856_v22  ;;  %v924_v39 = vsel %vm796_vm13, %v1729_v27, %v860_v23  ;;  %v862_v40 = vmul.f32 0.2, %v1731_v29  ;;  %v438_v18 = vld [vmem:[%s1707_s26 + $0x130] sm:$0xff]  ;;  %v433_v22 = vld [vmem:[%s1707_s26 + $0x108] sm:$0xff] }
  0xa3   : > { %v1439_v30 = vpack.c.bf16 %v924_v39, %v920_v38  ;;  %v922_v43 = vsel %vm794_vm14, %v1737_v34, %v858_v26  ;;  %v588_v44 = vmul.f32 %v518_v19, %v428_v15  ;;  %v589_v45 = vmul.f32 %v518_v19, %v429_v20  ;;  %v678_v46 = vpop.permute.xlu1 %677  ;;  %v673_v47 = vpop.permute.xlu0 %672  ;;  %v434_v26 = vld [vmem:[%s1707_s26 + $0x110] sm:$0xff] }
  0xa4   : > { %1470 = vmatprep.subr.bf16.mxu1 %v1469_v37  ;;  %v926_v31 = vsel %vm798_vm15, %v1731_v29, %v862_v40  ;;  %v590_v27 = vmul.f32 %v518_v19, %v430_v28  ;;  %v591_v48 = vmul.f32 %v518_v19, %v431_v32  ;;  %v584_v49 = vmul.f32 %v513_v21, %v424_v36  ;;  %v435_v28 = vld [vmem:[%s1707_s26 + $0x118] sm:$0xff] }
  0xa5   : > { %1440 = vmatpush1.bf16.msra.mxu0 %v1439_v30  ;;  %v1471_v50 = vpack.c.bf16 %v926_v31, %v922_v43  ;;  %v585_v51 = vmul.f32 %v513_v21, %v425_v41  ;;  %v586_v52 = vmul.f32 %v513_v21, %v426_v35  ;;  %v587_v53 = vmul.f32 %v513_v21, %v427_v42  ;;  %v432_v21 = vld [vmem:[%s1707_s26 + $0x100] sm:$0xff] }
  0xa6   : > { %v1806_v54 = vadd.f32 %v678_v46, %v588_v44  ;;  %v1808_v34 = vadd.f32 %v678_v46, %v589_v45  ;;  %v1810_v56 = vadd.f32 %v678_v46, %v590_v27  ;;  %v1812_v57 = vadd.f32 %v678_v46, %v591_v48 }
  0xa7   : > { %1472 = vmatpush1.bf16.msra.mxu1 %v1471_v50  ;;  %v1814_v58 = vadd.f32 %v673_v47, %v584_v49  ;;  %v1816_v29 = vadd.f32 %v673_v47, %v585_v51  ;;  %v1818_v59 = vadd.f32 %v673_v47, %v586_v52  ;;  %v1820_v60 = vadd.f32 %v673_v47, %v587_v53  ;;  %v528_v61 = vpop.permute.xlu1 %527  ;;  %v523_v62 = vpop.permute.xlu0 %522 }
  0xa8   : > { %vm801_vm0 = vcmp.gt.f32.partialorder %v1767_v10, 0.0  ;;  %vm805_vm1 = vcmp.gt.f32.partialorder %v1759_v7, 0.0  ;;  %v865_v63 = vmul.f32 0.2, %v1767_v10  ;;  %v869_v0 = vmul.f32 0.2, %v1759_v7 }
  0xa9   : > { %vm803_vm2 = vcmp.gt.f32.partialorder %v1771_v12, 0.0  ;;  %vm807_vm3 = vcmp.gt.f32.partialorder %v1763_v8, 0.0  ;;  %v867_v1 = vmul.f32 0.2, %v1771_v12  ;;  %v871_v2 = vmul.f32 0.2, %v1763_v8 }
  0xaa   : > { %v929_v3 = vsel %vm801_vm0, %v1767_v10, %v865_v63  ;;  %v933_v4 = vsel %vm805_vm1, %v1759_v7, %v869_v0  ;;  %vm800_vm4 = vcmp.gt.f32.partialorder %v1765_v9, 0.0  ;;  %vm804_vm5 = vcmp.gt.f32.partialorder %v1757_v6, 0.0  ;;  %v439_v10 = vld [vmem:[%s1707_s26 + $0x138] sm:$0xff] }
  0xab   : > { %v1441_v13 = vpack.c.bf16 %v933_v4, %v929_v3  ;;  %v931_v14 = vsel %vm803_vm2, %v1771_v12, %v867_v1  ;;  %v935_v15 = vsel %vm807_vm3, %v1763_v8, %v871_v2  ;;  %v864_v16 = vmul.f32 0.2, %v1765_v9  ;;  %v688_v7 = vpop.permute.xlu1 %687  ;;  %v683_v12 = vpop.permute.xlu0 %682  ;;  %v445_v3 = vld [vmem:[%s1707_s26 + $0x168] sm:$0xff]  ;;  %v447_v4 = vld [vmem:[%s1707_s26 + $0x178] sm:$0xff] }
  0xac   : > { %v1473_v19 = vpack.c.bf16 %v935_v15, %v931_v14  ;;  %v868_v20 = vmul.f32 0.2, %v1757_v6  ;;  %vm802_vm6 = vcmp.gt.f32.partialorder %v1769_v11, 0.0  ;;  %vm806_vm7 = vcmp.gt.f32.partialorder %v1761_v55, 0.0  ;;  %v441_v14 = vld [vmem:[%s1707_s26 + $0x148] sm:$0xff] }
  0xad   : > { %1442 = vmatprep.subr.bf16.mxu0 %v1441_v13  ;;  %v928_v8 = vsel %vm800_vm4, %v1765_v9, %v864_v16  ;;  %v866_v23 = vmul.f32 0.2, %v1769_v11  ;;  %v870_v24 = vmul.f32 0.2, %v1761_v55  ;;  %v596_v25 = vmul.f32 %v528_v61, %v436_v5  ;;  %v440_v13 = vld [vmem:[%s1707_s26 + $0x140] sm:$0xff] }
  0xae   : > { %1474 = vmatprep.subr.bf16.mxu1 %v1473_v19  ;;  %v932_v32 = vsel %vm804_vm5, %v1757_v6, %v868_v20  ;;  %v597_v36 = vmul.f32 %v528_v61, %v437_v17  ;;  %v598_v37 = vmul.f32 %v528_v61, %v438_v18  ;;  %v599_v38 = vmul.f32 %v528_v61, %v439_v10  ;;  %v442_v18 = vld [vmem:[%s1707_s26 + $0x150] sm:$0xff]  ;;  %v443_v10 = vld [vmem:[%s1707_s26 + $0x158] sm:$0xff] }
  0xaf   : > { %v1443_v39 = vpack.c.bf16 %v932_v32, %v928_v8  ;;  %v930_v9 = vsel %vm802_vm6, %v1769_v11, %v866_v23  ;;  %v934_v40 = vsel %vm806_vm7, %v1761_v55, %v870_v24  ;;  %v592_v41 = vmul.f32 %v523_v62, %v432_v21  ;;  %v538_v47 = vpop.permute.xlu1 %537  ;;  %v533_v48 = vpop.permute.xlu0 %532 }
  0xb0   : > { %v1475_v35 = vpack.c.bf16 %v934_v40, %v930_v9  ;;  %v593_v42 = vmul.f32 %v523_v62, %v433_v22  ;;  %v594_v30 = vmul.f32 %v523_v62, %v434_v26  ;;  %v595_v43 = vmul.f32 %v523_v62, %v435_v28  ;;  %v444_v62 = vld [vmem:[%s1707_s26 + $0x160] sm:$0xff] }
  0xb1   : > { %1444 = vmatpush1.bf16.msra.mxu0 %v1443_v39  ;;  %v1862_v44 = vadd.f32 %v688_v7, %v596_v25  ;;  %v1864_v6 = vadd.f32 %v688_v7, %v597_v36  ;;  %v1866_v45 = vadd.f32 %v688_v7, %v598_v37  ;;  %v1868_v46 = vadd.f32 %v688_v7, %v599_v38 }
  0xb2   : > { %1476 = vmatpush1.bf16.msra.mxu1 %v1475_v35  ;;  %v1870_v11 = vadd.f32 %v683_v12, %v592_v41  ;;  %v1872_v31 = vadd.f32 %v683_v12, %v593_v42  ;;  %v1874_v55 = vadd.f32 %v683_v12, %v594_v30  ;;  %v1876_v27 = vadd.f32 %v683_v12, %v595_v43 }
  0xb3   : > { %vm809_vm8 = vcmp.gt.f32.partialorder %v1816_v29, 0.0  ;;  %vm813_vm9 = vcmp.gt.f32.partialorder %v1808_v34, 0.0  ;;  %v873_v49 = vmul.f32 0.2, %v1816_v29  ;;  %v877_v50 = vmul.f32 0.2, %v1808_v34  ;;  %v698_v15 = vpop.permute.xlu1 %697  ;;  %v693_v7 = vpop.permute.xlu0 %692 }
  0xb4   : > { %vm811_vm10 = vcmp.gt.f32.partialorder %v1820_v60, 0.0  ;;  %vm815_vm11 = vcmp.gt.f32.partialorder %v1812_v57, 0.0  ;;  %v875_v51 = vmul.f32 0.2, %v1820_v60  ;;  %v879_v52 = vmul.f32 0.2, %v1812_v57 }
  0xb5   : > { %v937_v53 = vsel %vm809_vm8, %v1816_v29, %v873_v49  ;;  %v941_v61 = vsel %vm813_vm9, %v1808_v34, %v877_v50  ;;  %vm808_vm12 = vcmp.gt.f32.partialorder %v1814_v58, 0.0  ;;  %vm812_vm13 = vcmp.gt.f32.partialorder %v1806_v54, 0.0  ;;  %v446_v29 = vld [vmem:[%s1707_s26 + $0x170] sm:$0xff] }
  0xb6   : > { %v1445_v63 = vpack.c.bf16 %v941_v61, %v937_v53  ;;  %v939_v0 = vsel %vm811_vm10, %v1820_v60, %v875_v51  ;;  %v943_v1 = vsel %vm815_vm11, %v1812_v57, %v879_v52  ;;  %v872_v2 = vmul.f32 0.2, %v1814_v58  ;;  %v453_v53 = vld [vmem:[%s1707_s26 + $0x1a8] sm:$0xff]  ;;  %v455_v61 = vld [vmem:[%s1707_s26 + $0x1b8] sm:$0xff] }
  0xb7   : > { %v1477_v5 = vpack.c.bf16 %v943_v1, %v939_v0  ;;  %v876_v34 = vmul.f32 0.2, %v1806_v54  ;;  %vm810_vm14 = vcmp.gt.f32.partialorder %v1818_v59, 0.0  ;;  %vm814_vm15 = vcmp.gt.f32.partialorder %v1810_v56, 0.0  ;;  %v548_v9 = vpop.permute.xlu1 %547  ;;  %v543_v35 = vpop.permute.xlu0 %542  ;;  %v449_v0 = vld [vmem:[%s1707_s26 + $0x188] sm:$0xff] }
  0xb8   : > { %1446 = vmatprep.subr.bf16.mxu0 %v1445_v63  ;;  %v936_v57 = vsel %vm808_vm12, %v1814_v58, %v872_v2  ;;  %v874_v60 = vmul.f32 0.2, %v1818_v59  ;;  %v878_v16 = vmul.f32 0.2, %v1810_v56  ;;  %v604_v17 = vmul.f32 %v538_v47, %v444_v62  ;;  %v448_v63 = vld [vmem:[%s1707_s26 + $0x180] sm:$0xff] }
  0xb9   : > { %1478 = vmatprep.subr.bf16.mxu1 %v1477_v5  ;;  %v940_v19 = vsel %vm812_vm13, %v1806_v54, %v876_v34  ;;  %v605_v20 = vmul.f32 %v538_v47, %v445_v3  ;;  %v606_v21 = vmul.f32 %v538_v47, %v446_v29  ;;  %v607_v22 = vmul.f32 %v538_v47, %v447_v4  ;;  %v450_v3 = vld [vmem:[%s1707_s26 + $0x190] sm:$0xff]  ;;  %v451_v29 = vld [vmem:[%s1707_s26 + $0x198] sm:$0xff] }
  0xba   : > { %v1447_v12 = vpack.c.bf16 %v940_v19, %v936_v57  ;;  %v938_v58 = vsel %vm810_vm14, %v1818_v59, %v874_v60  ;;  %v942_v8 = vsel %vm814_vm15, %v1810_v56, %v878_v16  ;;  %v600_v23 = vmul.f32 %v533_v48, %v440_v13 }
  0xbb   : > { %v1479_v24 = vpack.c.bf16 %v942_v8, %v938_v58  ;;  %v601_v25 = vmul.f32 %v533_v48, %v441_v14  ;;  %v602_v26 = vmul.f32 %v533_v48, %v442_v18  ;;  %v603_v28 = vmul.f32 %v533_v48, %v443_v10  ;;  %v452_v48 = vld [vmem:[%s1707_s26 + $0x1a0] sm:$0xff]  ;;  %v708_v4 = vpop.permute.xlu1 %707 }
  0xbc   : > { %1448 = vmatpush1.bf16.msra.mxu0 %v1447_v12  ;;  %v1918_v32 = vadd.f32 %v698_v15, %v604_v17  ;;  %v1920_v54 = vadd.f32 %v698_v15, %v605_v20  ;;  %v1922_v36 = vadd.f32 %v698_v15, %v606_v21  ;;  %v1924_v37 = vadd.f32 %v698_v15, %v607_v22  ;;  %v703_v15 = vpop.permute.xlu0 %702 }
  0xbd   : > { %1480 = vmatpush1.bf16.msra.mxu1 %v1479_v24  ;;  %v1926_v59 = vadd.f32 %v693_v7, %v600_v23  ;;  %v1928_v38 = vadd.f32 %v693_v7, %v601_v25  ;;  %v1930_v56 = vadd.f32 %v693_v7, %v602_v26  ;;  %v1932_v39 = vadd.f32 %v693_v7, %v603_v28 }
  0xbe   : > { %vm817_vm0 = vcmp.gt.f32.partialorder %v1872_v31, 0.0  ;;  %vm821_vm1 = vcmp.gt.f32.partialorder %v1864_v6, 0.0  ;;  %v881_v40 = vmul.f32 0.2, %v1872_v31  ;;  %v885_v41 = vmul.f32 0.2, %v1864_v6 }
  0xbf   : > { %vm819_vm2 = vcmp.gt.f32.partialorder %v1876_v27, 0.0  ;;  %vm823_vm3 = vcmp.gt.f32.partialorder %v1868_v46, 0.0  ;;  %v883_v42 = vmul.f32 0.2, %v1876_v27  ;;  %v887_v30 = vmul.f32 0.2, %v1868_v46  ;;  %v558_v23 = vpop.permute.xlu1 %557 }
  0xc0   : > { %v945_v43 = vsel %vm817_vm0, %v1872_v31, %v881_v40  ;;  %v949_v47 = vsel %vm821_vm1, %v1864_v6, %v885_v41  ;;  %vm816_vm4 = vcmp.gt.f32.partialorder %v1870_v11, 0.0  ;;  %vm820_vm5 = vcmp.gt.f32.partialorder %v1862_v44, 0.0  ;;  %v454_v31 = vld [vmem:[%s1707_s26 + $0x1b0] sm:$0xff]  ;;  %v553_v26 = vpop.permute.xlu0 %552  ;;  %v460_v40 = vld [vmem:[%s1707_s26 + $0x1e0] sm:$0xff] }
  0xc1   : > { %v1449_v49 = vpack.c.bf16 %v949_v47, %v945_v43  ;;  %v947_v50 = vsel %vm819_vm2, %v1876_v27, %v883_v42  ;;  %v951_v51 = vsel %vm823_vm3, %v1868_v46, %v887_v30  ;;  %v880_v52 = vmul.f32 0.2, %v1870_v11  ;;  %v461_v43 = vld [vmem:[%s1707_s26 + $0x1e8] sm:$0xff]  ;;  %v463_v47 = vld [vmem:[%s1707_s26 + $0x1f8] sm:$0xff] }
  0xc2   : > { %v1481_v62 = vpack.c.bf16 %v951_v51, %v947_v50  ;;  %v884_v6 = vmul.f32 0.2, %v1862_v44  ;;  %vm818_vm6 = vcmp.gt.f32.partialorder %v1874_v55, 0.0  ;;  %vm822_vm7 = vcmp.gt.f32.partialorder %v1866_v45, 0.0  ;;  %v457_v50 = vld [vmem:[%s1707_s26 + $0x1c8] sm:$0xff] }
  0xc3   : > { %1450 = vmatprep.subr.bf16.mxu0 %v1449_v49  ;;  %v944_v46 = vsel %vm816_vm4, %v1870_v11, %v880_v52  ;;  %v882_v27 = vmul.f32 0.2, %v1874_v55  ;;  %v886_v1 = vmul.f32 0.2, %v1866_v45  ;;  %v612_v2 = vmul.f32 %v548_v9, %v452_v48  ;;  %v456_v49 = vld [vmem:[%s1707_s26 + $0x1c0] sm:$0xff] }
  0xc4   : > { %1482 = vmatprep.subr.bf16.mxu1 %v1481_v62  ;;  %v948_v5 = vsel %vm820_vm5, %v1862_v44, %v884_v6  ;;  %v613_v34 = vmul.f32 %v548_v9, %v453_v53  ;;  %v614_v13 = vmul.f32 %v548_v9, %v454_v31  ;;  %v615_v14 = vmul.f32 %v548_v9, %v455_v61  ;;  %v458_v53 = vld [vmem:[%s1707_s26 + $0x1d0] sm:$0xff]  ;;  %v459_v31 = vld [vmem:[%s1707_s26 + $0x1d8] sm:$0xff] }
  0xc5   : > { %v1451_v57 = vpack.c.bf16 %v948_v5, %v944_v46  ;;  %v946_v11 = vsel %vm818_vm6, %v1874_v55, %v882_v27  ;;  %v950_v60 = vsel %vm822_vm7, %v1866_v45, %v886_v1  ;;  %v608_v16 = vmul.f32 %v543_v35, %v448_v63 }
  0xc6   : > { %v1483_v17 = vpack.c.bf16 %v950_v60, %v946_v11  ;;  %v609_v18 = vmul.f32 %v543_v35, %v449_v0  ;;  %v610_v10 = vmul.f32 %v543_v35, %v450_v3  ;;  %v611_v7 = vmul.f32 %v543_v35, %v451_v29  ;;  %v718_v0 = vpop.permute.xlu1 %717 }
  0xc7   : > { %1452 = vmatpush1.bf16.msra.mxu0 %v1451_v57  ;;  %v1974_v44 = vadd.f32 %v708_v4, %v612_v2  ;;  %v1976_v19 = vadd.f32 %v708_v4, %v613_v34  ;;  %v1978_v20 = vadd.f32 %v708_v4, %v614_v13  ;;  %v1980_v21 = vadd.f32 %v708_v4, %v615_v14  ;;  %v713_v2 = vpop.permute.xlu0 %712 }
  0xc8   : > { %1484 = vmatpush1.bf16.msra.mxu1 %v1483_v17  ;;  %v1982_v55 = vadd.f32 %v703_v15, %v608_v16  ;;  %v1984_v22 = vadd.f32 %v703_v15, %v609_v18  ;;  %v1986_v45 = vadd.f32 %v703_v15, %v610_v10  ;;  %v1988_v12 = vadd.f32 %v703_v15, %v611_v7 }
  0xc9   : > { %vm825_vm8 = vcmp.gt.f32.partialorder %v1928_v38, 0.0  ;;  %vm829_vm9 = vcmp.gt.f32.partialorder %v1920_v54, 0.0  ;;  %v889_v58 = vmul.f32 0.2, %v1928_v38  ;;  %v893_v8 = vmul.f32 0.2, %v1920_v54 }
  0xca   : > { %vm827_vm10 = vcmp.gt.f32.partialorder %v1932_v39, 0.0  ;;  %vm831_vm11 = vcmp.gt.f32.partialorder %v1924_v37, 0.0  ;;  %v891_v24 = vmul.f32 0.2, %v1932_v39  ;;  %v895_v25 = vmul.f32 0.2, %v1924_v37 }
  0xcb   : > { %v953_v28 = vsel %vm825_vm8, %v1928_v38, %v889_v58  ;;  %v957_v9 = vsel %vm829_vm9, %v1920_v54, %v893_v8  ;;  %vm824_vm12 = vcmp.gt.f32.partialorder %v1926_v59, 0.0  ;;  %vm828_vm13 = vcmp.gt.f32.partialorder %v1918_v32, 0.0  ;;  %v462_v38 = vld [vmem:[%s1707_s26 + $0x1f0] sm:$0xff] }
  0xcc   : > { %v1453_v41 = vpack.c.bf16 %v957_v9, %v953_v28  ;;  %v955_v35 = vsel %vm827_vm10, %v1932_v39, %v891_v24  ;;  %v959_v42 = vsel %vm831_vm11, %v1924_v37, %v895_v25  ;;  %v888_v30 = vmul.f32 0.2, %v1926_v59 }
  0xcd   : > { %v1485_v48 = vpack.c.bf16 %v959_v42, %v955_v35  ;;  %v892_v54 = vmul.f32 0.2, %v1918_v32  ;;  %vm826_vm14 = vcmp.gt.f32.partialorder %v1930_v56, 0.0  ;;  %vm830_vm15 = vcmp.gt.f32.partialorder %v1922_v36, 0.0 }
  0xce   : > { %1454 = vmatprep.subr.bf16.mxu0 %v1453_v41  ;;  %v952_v37 = vsel %vm824_vm12, %v1926_v59, %v888_v30  ;;  %v890_v39 = vmul.f32 0.2, %v1930_v56  ;;  %v894_v51 = vmul.f32 0.2, %v1922_v36  ;;  %v620_v52 = vmul.f32 %v558_v23, %v460_v40 }
  0xcf   : > { %1486 = vmatprep.subr.bf16.mxu1 %v1485_v48  ;;  %v956_v61 = vsel %vm828_vm13, %v1918_v32, %v892_v54  ;;  %v621_v62 = vmul.f32 %v558_v23, %v461_v43  ;;  %v622_v6 = vmul.f32 %v558_v23, %v462_v38  ;;  %v623_v63 = vmul.f32 %v558_v23, %v463_v47 }
  0xd0   : > { %v1455_v46 = vpack.c.bf16 %v956_v61, %v952_v37  ;;  %v954_v59 = vsel %vm826_vm14, %v1930_v56, %v890_v39  ;;  %v958_v27 = vsel %vm830_vm15, %v1922_v36, %v894_v51  ;;  %v616_v1 = vmul.f32 %v553_v26, %v456_v49  ;;  %v985_v61 = vld [vmem:[%s356_s30 + $0x8] sm:$0xff] }
  0xd1   : > { %v1487_v3 = vpack.c.bf16 %v958_v27, %v954_v59  ;;  %v617_v29 = vmul.f32 %v553_v26, %v457_v50  ;;  %v618_v4 = vmul.f32 %v553_v26, %v458_v53  ;;  %v619_v5 = vmul.f32 %v553_v26, %v459_v31  ;;  %v984_v31 = vld [vmem:[%s356_s30] sm:$0xff] }
  0xd2   : > { %1456 = vmatpush1.bf16.msra.mxu0 %v1455_v46  ;;  %v2030_v32 = vadd.f32 %v718_v0, %v620_v52  ;;  %v781_v34 = vadd.f32 %v718_v0, %v621_v62  ;;  %v2032_v13 = vadd.f32 %v718_v0, %v622_v6  ;;  %v783_v14 = vadd.f32 %v718_v0, %v623_v63 }
  0xd3   : > { %1488 = vmatpush1.bf16.msra.mxu1 %v1487_v3  ;;  %v776_v15 = vadd.f32 %v713_v2, %v616_v1  ;;  %v777_v56 = vadd.f32 %v713_v2, %v617_v29  ;;  %v2034_v57 = vadd.f32 %v713_v2, %v618_v4  ;;  %v779_v11 = vadd.f32 %v713_v2, %v619_v5 }
  0xd4   : > { %vm833_vm0 = vcmp.gt.f32.partialorder %v1984_v22, 0.0  ;;  %vm837_vm1 = vcmp.gt.f32.partialorder %v1976_v19, 0.0  ;;  %v897_v36 = vmul.f32 0.2, %v1984_v22  ;;  %v901_v60 = vmul.f32 0.2, %v1976_v19 }
  0xd5   : > { %vm835_vm2 = vcmp.gt.f32.partialorder %v1988_v12, 0.0  ;;  %vm839_vm3 = vcmp.gt.f32.partialorder %v1980_v21, 0.0  ;;  %v899_v16 = vmul.f32 0.2, %v1988_v12  ;;  %v903_v17 = vmul.f32 0.2, %v1980_v21 }
  0xd6   : > { %v961_v18 = vsel %vm833_vm0, %v1984_v22, %v897_v36  ;;  %v965_v10 = vsel %vm837_vm1, %v1976_v19, %v901_v60  ;;  %vm832_vm4 = vcmp.gt.f32.partialorder %v1982_v55, 0.0  ;;  %vm836_vm5 = vcmp.gt.f32.partialorder %v1974_v44, 0.0 }
  0xd7   : > { %v1457_v7 = vpack.c.bf16 %v965_v10, %v961_v18  ;;  %v963_v58 = vsel %vm835_vm2, %v1988_v12, %v899_v16  ;;  %v967_v8 = vsel %vm839_vm3, %v1980_v21, %v903_v17  ;;  %v896_v23 = vmul.f32 0.2, %v1982_v55 }
  0xd8   : > { %v1489_v24 = vpack.c.bf16 %v967_v8, %v963_v58  ;;  %v900_v25 = vmul.f32 0.2, %v1974_v44  ;;  %vm834_vm6 = vcmp.gt.f32.partialorder %v1986_v45, 0.0  ;;  %vm838_vm7 = vcmp.gt.f32.partialorder %v1978_v20, 0.0 }
  0xd9   : > { %1458 = vmatprep.subr.bf16.mxu0 %v1457_v7  ;;  %v960_v19 = vsel %vm832_vm4, %v1982_v55, %v896_v23  ;;  %v898_v22 = vmul.f32 0.2, %v1986_v45  ;;  %v902_v26 = vmul.f32 0.2, %v1978_v20  ;;  %vm841_vm8 = vcmp.gt.f32.partialorder %v777_v56, 0.0 }
  0xda   : > { %1490 = vmatprep.subr.bf16.mxu1 %v1489_v24  ;;  %v964_v21 = vsel %vm836_vm5, %v1974_v44, %v900_v25  ;;  %vm845_vm9 = vcmp.gt.f32.partialorder %v781_v34, 0.0  ;;  %v905_v12 = vmul.f32 0.2, %v777_v56  ;;  %v909_v28 = vmul.f32 0.2, %v781_v34 }
  0xdb   : > { %v1459_v9 = vpack.c.bf16 %v964_v21, %v960_v19  ;;  %v962_v40 = vsel %vm834_vm6, %v1986_v45, %v898_v22  ;;  %v966_v41 = vsel %vm838_vm7, %v1978_v20, %v902_v26  ;;  %vm843_vm10 = vcmp.gt.f32.partialorder %v779_v11, 0.0 }
  0xdc   : > { %v1491_v35 = vpack.c.bf16 %v966_v41, %v962_v40  ;;  %v969_v55 = vsel %vm841_vm8, %v777_v56, %v905_v12  ;;  %v973_v42 = vsel %vm845_vm9, %v781_v34, %v909_v28  ;;  %vm847_vm11 = vcmp.gt.f32.partialorder %v783_v14, 0.0 }
  0xdd   : > { %1460 = vmatpush1.bf16.msra.mxu0 %v1459_v9  ;;  %v1461_v30 = vpack.c.bf16 %v973_v42, %v969_v55  ;;  %v907_v43 = vmul.f32 0.2, %v779_v11  ;;  %v911_v38 = vmul.f32 0.2, %v783_v14  ;;  %vm840_vm12 = vcmp.gt.f32.partialorder %v776_v15, 0.0 }
  0xde   : > { %1492 = vmatpush1.bf16.msra.mxu1 %v1491_v35  ;;  %vm844_vm13 = vcmp.gt.f32.partialorder %v2030_v32, 0.0  ;;  %v904_v44 = vmul.f32 0.2, %v776_v15  ;;  %v908_v45 = vmul.f32 0.2, %v2030_v32  ;;  %vm842_vm14 = vcmp.gt.f32.partialorder %v2034_v57, 0.0 }
  0xdf   : > { %1462 = vmatprep.subr.bf16.mxu0 %v1461_v30  ;;  %v971_v20 = vsel %vm843_vm10, %v779_v11, %v907_v43  ;;  %v975_v47 = vsel %vm847_vm11, %v783_v14, %v911_v38  ;;  %vm846_vm15 = vcmp.gt.f32.partialorder %v2032_v13, 0.0  ;;  %v906_v48 = vmul.f32 0.2, %v2034_v57 }
  0xe0   : > { %v1493_v54 = vpack.c.bf16 %v975_v47, %v971_v20  ;;  %v968_v49 = vsel %vm840_vm12, %v776_v15, %v904_v44  ;;  %v972_v50 = vsel %vm844_vm13, %v2030_v32, %v908_v45  ;;  %v910_v37 = vmul.f32 0.2, %v2032_v13 }
  0xe1   : > { %v1463_v39 = vpack.c.bf16 %v972_v50, %v968_v49  ;;  %v970_v51 = vsel %vm842_vm14, %v2034_v57, %v906_v48  ;;  %v1203_v7 = vlaneseq }
  0xe2   : > { %1494 = vmatprep.subr.bf16.mxu1 %v1493_v54  ;;  %v974_v52 = vsel %vm846_vm15, %v2032_v13, %v910_v37 }
  0xe3   : > { %1464 = vmatpush1.bf16.msra.mxu0 %v1463_v39  ;;  %v1495_v53 = vpack.c.bf16 %v974_v52, %v970_v51  ;;  %v1204_v58 = vand.u32 127, %v1203_v7 }
  0xe5   : > { %1496 = vmatpush1.bf16.msra.mxu1 %v1495_v53  ;;  %vm1205_vm0 = vcmp.eq.s32.totalorder %v1204_v58, 0  ;;  %vm1208_vm1 = vcmp.eq.s32.totalorder %v1204_v58, 1 }
  0xe6   : > { %1051 = vmatmul.mubr.f32.vlgmr.msra.gmra.mrb[0].mxu0 %v984_v31 }
  0xe7   : > { %1056 = vmatprep.mubr.f32.mxu0 %v1550_v33 }
  0xe8   : > { %1128 = vmatmul.mubr.f32.vlgmr.msra.gmra.mrb[0].mxu1 %v984_v31 }
  0xe9   : > { %1133 = vmatprep.mubr.f32.mxu1 %v1550_v33 }
  0xea   : > { %1057 = vmatmul.mubr.f32.gmra.mrb[2].mxu0 %v985_v61 }
  0xec   : > { %1134 = vmatmul.mubr.f32.gmra.mrb[2].mxu1 %v985_v61 }
 0x1b9   : > { %v1052_v62 = vpop.f32.mrb[0].mxu0 }
 0x1ba   : > { %1167 = vst [vmem:[%s2082_s9] sm:$0xff] %v1052_v62  ;;  %v1185_v6 = vmul.f32 %v1052_v62, %v1052_v62  ;;  %v1054_v63 = vpop.f32.mrb[1].mxu0 }
 0x1bb   : > { %1168 = vst [vmem:[%s2082_s9 + $0x8] sm:$0xff] %v1054_v63  ;;  %v1175_v33 = vadd.f32 %v1054_v63, %v1052_v62  ;;  %v1186_v0 = vmul.f32 %v1054_v63, %v1054_v63  ;;  %v1129_v46 = vpop.f32.mrb[0].mxu1 }
 0x1bc   : > { %1169 = vst [vmem:[%s2082_s9 + $0x10] sm:$0xff] %v1129_v46  ;;  %v1187_v59 = vmul.f32 %v1129_v46, %v1129_v46  ;;  %v1131_v27 = vpop.f32.mrb[1].mxu1 }
 0x1bd   : > { %1170 = vst [vmem:[%s2082_s9 + $0x18] sm:$0xff] %v1131_v27  ;;  %v1058_v1 = vpop.f32.mrb[2].mxu0  ;;  %v1176_v2 = vadd.f32 %v1175_v33, %v1129_v46  ;;  %v1193_v3 = vadd.f32 %v1186_v0, %v1185_v6  ;;  %v1188_v5 = vmul.f32 %v1131_v27, %v1131_v27 }
 0x1be   : > { %1171 = vst [vmem:[%s2082_s9 + $0x20] sm:$0xff] %v1058_v1  ;;  %v1189_v29 = vmul.f32 %v1058_v1, %v1058_v1  ;;  %v1060_v4 = vpop.f32.mrb[3].mxu0 }
 0x1bf   : > { %1172 = vst [vmem:[%s2082_s9 + $0x28] sm:$0xff] %v1060_v4  ;;  %v1180_v32 = vadd.f32 %v1060_v4, %v1058_v1  ;;  %v1190_v34 = vmul.f32 %v1060_v4, %v1060_v4  ;;  %v1135_v13 = vpop.f32.mrb[2].mxu1  ;;  %v1177_v14 = vadd.f32 %v1176_v2, %v1131_v27  ;;  %v1194_v15 = vadd.f32 %v1193_v3, %v1187_v59 }
 0x1c0   : > { %1173 = vst [vmem:[%s2082_s9 + $0x30] sm:$0xff] %v1135_v13  ;;  %v1191_v56 = vmul.f32 %v1135_v13, %v1135_v13  ;;  %v1137_v57 = vpop.f32.mrb[3].mxu1 }
 0x1c1   : > { %v1198_v11 = vadd.f32 %v1190_v34, %v1189_v29  ;;  %1178 = vadd.xlane.f32.xlu0 %v1177_v14  ;;  %1174 = vst [vmem:[%s2082_s9 + $0x38] sm:$0xff] %v1137_v57  ;;  %v1192_v36 = vmul.f32 %v1137_v57, %v1137_v57  ;;  %v1195_v60 = vadd.f32 %v1194_v15, %v1188_v5 }
 0x1c2   : > { %v1181_v16 = vadd.f32 %v1180_v32, %v1135_v13 }
 0x1c3   : > { %v1199_v18 = vadd.f32 %v1198_v11, %v1191_v56 }
 0x1c4   : > { %v1182_v17 = vadd.f32 %v1181_v16, %v1137_v57 }
 0x1c5   : > { %1196 = vadd.xlane.f32.xlu0 %v1195_v60  ;;  %v1200_v10 = vadd.f32 %v1199_v18, %v1192_v36 }
 0x1c6   : > { %1183 = vadd.xlane.f32.xlu1 %v1182_v17 }
 0x1c9   : > { %1201 = vadd.xlane.f32.xlu0 %v1200_v10 }
 0x24e   : > { %v1179_v8 = vpop.xlane.xlu0 %1178 }
 0x24f   : > { %v1206_v24 = vsel %vm1205_vm0, %v1179_v8, 0.0 }
 0x252   : > { %v1197_v23 = vpop.xlane.xlu0 %1196 }
 0x253   : > { %v1209_v25 = vsel %vm1208_vm1, %v1197_v23, 0.0  ;;  %v1184_v22 = vpop.xlane.xlu1 %1183 }
 0x254   : > { %v1211_v19 = vadd.f32 %v1209_v25, %v1206_v24  ;;  %v1207_v21 = vsel %vm1205_vm0, %v1184_v22, 0.0 }
 0x256   : > { %1213 = vst [vmem:[%s387_s12] sm:$0xff] %v1211_v19  ;;  %v1202_v26 = vpop.xlane.xlu0 %1201 }
 0x257   : > { %v1210_v12 = vsel %vm1208_vm1, %v1202_v26, 0.0 }
 0x258   : > { %v1212_v28 = vadd.f32 %v1210_v12, %v1207_v21 }
 0x25a   : > { %1214 = vst [vmem:[%s387_s12 + $0x8] sm:$0xff] %v1212_v28 }
 0x25b PF: > { %s16_s20 = sadd.s32 1, %s1547_s20   ;;  %s2112_s18 = smov %s1543_s19 }
 0x25c   : > { %p13_p5 = scmp.ge.s32.totalorder %s16_s20, 6   ;;  %s2113_s19 = smov %s2115_s21 }
 0x25e   :  { %15 = sbr.rel (!%p13_p5) target bundleno = 2 (0x2), region = 95 }

// kernel: _lambda_.10
= control target key start
LH: loop header
LB: loop body
LE: loop exit
PB: predicated region body
PF: predicated region fallthrough
CT: control target
= control target key end

     0   :  { %s1321_s18 = smov 0   ;;  %s1323_s19 = smov 0   ;;  %s1683_s0 = inlined_call_operand.vmem [shape: f32[4,64,2048], index: 0, kind: input, shape index: {}]   ;;  %s1684_s1 = inlined_call_operand.vmem [shape: f32[4,8,64], index: 1, kind: input, shape index: {}]   ;;  %s1685_s2 = inlined_call_operand.vmem [shape: f32[64,1], index: 2, kind: input, shape index: {}]   ;;  %s1686_s3 = inlined_call_operand.vmem [shape: f32[64,1], index: 3, kind: input, shape index: {}]   ;;  %s1687_s4 = inlined_call_operand.vmem [shape: f32[4,8,2048], index: 4, kind: output, shape index: {0}]   ;;  %s1688_s5 = inlined_call_operand.vmem [shape: f32[4,4,8,128], index: 5, kind: output, shape index: {1}]  }
   0x1   :  { %s1325_s20 = smov 0   ;;  %s1327_s21 = smov 0  }
   0x2   :  { %s1329_s22 = smov 0   ;;  %s1331_s23 = smov 0  }
   0x3   :  { %s1333_s24 = smov 0  }
   0x4 LB: > { %s31_s25 = sadd.s32 1, %s1279_s22  ;;  %s35_s26 = sadd.s32 1, %s1283_s23  ;;  %s1287_s24 = sphi %s1333_s24, %s16_s24   ;;  %s1283_s23 = sphi %s1331_s23, %s1694_s23   ;;  %s1279_s22 = sphi %s1329_s22, %s1693_s22   ;;  %s1275_s21 = sphi %s1327_s21, %s1692_s21   ;;  %s1271_s20 = sphi %s1325_s20, %s1691_s20   ;;  %s1267_s19 = sphi %s1323_s19, %s1690_s19   ;;  %s1263_s18 = sphi %s1321_s18, %s1689_s18  }
   0x5   : > { %p33_p0 = scmp.ge.s32.totalorder %s31_s25, 4  ;;  %p53_p1 = scmp.ne.s32.totalorder %s1267_s19, %s1263_s18 }
   0x6   : > { %p54_p2 = scmp.eq.s32.totalorder %s1287_s24, 0  ;;  %s46_s30 = sadd.s32 1, %s1267_s19 }
   0x7   : > { %s1696_s25 = smov (%p33_p0, %s31_s25), 0  ;;  %s1698_s26 = smov (!%p33_p0, %s35_s26), %s1283_s23 }
   0x8   : > { %p55_p3 = por %p54_p2, %p53_p1  ;;  %p37_p4 = scmp.ge.s32.totalorder %s1698_s26, 4 }
   0x9   : > { %s42_s27 = ssub.s32 %s1279_s22, %s1696_s25  ;;  %p1124_p6 = scmp.ge.s32.totalorder %s1287_s24, 16 }
   0xa   : > { %s1700_s26 = smov (%p37_p4, %s1698_s26), 0 }
   0xb   : > { %s39_s28 = ssub.s32 %s1283_s23, %s1700_s26  ;;  %233 = sbr.rel (%p1124_p6) target bundleno = 41 (0x29), region = 24 }
   0xc   : > { %s43_s29 = sor.u32 %s42_s27, %s39_s28 }
   0xd   : > { %p44_p5 = scmp.eq.s32.totalorder %s43_s29, 0 }
   0xf   : > { %s1372_s6 = scalar_select %p44_p5, %s1267_s19, %s46_s30  }
  0x12   : > { %236 = sbr.rel (!%p55_p3) target bundleno = 41 (0x29), region = 28  ;;  %s238_s7 = sand.u32 (%p55_p3), 1, %s1267_s19  }
  0x13   : > { %s1126_s8 = sshll.u32 (%p55_p3), %s1279_s22, 2  ;;  %s1125_s9 = sshll.u32 (%p55_p3), %s238_s7, 8 }
  0x14   : > { %s1127_s10 = sshll.u32 (%p55_p3), %s1283_s23, 7  ;;  %s1386_s16 = scalar_lea.vmem (%p55_p3), [#allocation3], %s1125_s9 }
  0x15   : > { %s246_s11 = sadd.s32 (%p55_p3), %s1127_s10, %s1126_s8 }
  0x16   : > { %s1128_s12 = sshll.u32 (%p55_p3), %s246_s11, 3 }
  0x17   : > { %s1381_s15 = scalar_lea.vmem (%p55_p3), %s1683_s0, %s1128_s12 }
  0x18   : > { %v261_v0 = vld [vmem:[%s1381_s15] sm:$0xff] (%p55_p3)  ;;  %v263_v1 = vld [vmem:[%s1381_s15 + $0x8] sm:$0xff] (%p55_p3)  ;;  %v265_v2 = vld [vmem:[%s1381_s15 + $0x10] sm:$0xff] (%p55_p3) }
  0x19   : > { %262 = vst [vmem:[%s1386_s16] sm:$0xff] %v261_v0  ;;  %264 = vst [vmem:[%s1386_s16 + $0x8] sm:$0xff] %v263_v1  ;;  %v267_v3 = vld [vmem:[%s1381_s15 + $0x18] sm:$0xff]  ;;  %v269_v4 = vld [vmem:[%s1381_s15 + $0x80] sm:$0xff] }
  0x1a   : > { %266 = vst [vmem:[%s1386_s16 + $0x10] sm:$0xff] %v265_v2  ;;  %v271_v5 = vld [vmem:[%s1381_s15 + $0x88] sm:$0xff]  ;;  %268 = vst [vmem:[%s1386_s16 + $0x18] sm:$0xff] %v267_v3  ;;  %v273_v6 = vld [vmem:[%s1381_s15 + $0x90] sm:$0xff] }
  0x1b   : > { %270 = vst [vmem:[%s1386_s16 + $0x20] sm:$0xff] %v269_v4  ;;  %272 = vst [vmem:[%s1386_s16 + $0x28] sm:$0xff] %v271_v5  ;;  %v275_v7 = vld [vmem:[%s1381_s15 + $0x98] sm:$0xff]  ;;  %v277_v8 = vld [vmem:[%s1381_s15 + $0x100] sm:$0xff] }
  0x1c   : > { %274 = vst [vmem:[%s1386_s16 + $0x30] sm:$0xff] %v273_v6  ;;  %276 = vst [vmem:[%s1386_s16 + $0x38] sm:$0xff] %v275_v7  ;;  %v279_v9 = vld [vmem:[%s1381_s15 + $0x108] sm:$0xff]  ;;  %v281_v10 = vld [vmem:[%s1381_s15 + $0x110] sm:$0xff] }
  0x1d   : > { %278 = vst [vmem:[%s1386_s16 + $0x40] sm:$0xff] %v277_v8  ;;  %v283_v11 = vld [vmem:[%s1381_s15 + $0x118] sm:$0xff]  ;;  %280 = vst [vmem:[%s1386_s16 + $0x48] sm:$0xff] %v279_v9  ;;  %v285_v12 = vld [vmem:[%s1381_s15 + $0x180] sm:$0xff] }
  0x1e   : > { %282 = vst [vmem:[%s1386_s16 + $0x50] sm:$0xff] %v281_v10  ;;  %284 = vst [vmem:[%s1386_s16 + $0x58] sm:$0xff] %v283_v11  ;;  %v287_v13 = vld [vmem:[%s1381_s15 + $0x188] sm:$0xff]  ;;  %v289_v14 = vld [vmem:[%s1381_s15 + $0x190] sm:$0xff] }
  0x1f   : > { %286 = vst [vmem:[%s1386_s16 + $0x60] sm:$0xff] %v285_v12  ;;  %288 = vst [vmem:[%s1386_s16 + $0x68] sm:$0xff] %v287_v13  ;;  %v291_v15 = vld [vmem:[%s1381_s15 + $0x198] sm:$0xff]  ;;  %v293_v16 = vld [vmem:[%s1381_s15 + $0x200] sm:$0xff] }
  0x20   : > { %290 = vst [vmem:[%s1386_s16 + $0x70] sm:$0xff] %v289_v14  ;;  %v295_v17 = vld [vmem:[%s1381_s15 + $0x208] sm:$0xff]  ;;  %292 = vst [vmem:[%s1386_s16 + $0x78] sm:$0xff] %v291_v15  ;;  %v297_v18 = vld [vmem:[%s1381_s15 + $0x210] sm:$0xff] }
  0x21   : > { %294 = vst [vmem:[%s1386_s16 + $0x80] sm:$0xff] %v293_v16  ;;  %296 = vst [vmem:[%s1386_s16 + $0x88] sm:$0xff] %v295_v17  ;;  %v299_v19 = vld [vmem:[%s1381_s15 + $0x218] sm:$0xff]  ;;  %v301_v20 = vld [vmem:[%s1381_s15 + $0x280] sm:$0xff] }
  0x22   : > { %298 = vst [vmem:[%s1386_s16 + $0x90] sm:$0xff] %v297_v18  ;;  %300 = vst [vmem:[%s1386_s16 + $0x98] sm:$0xff] %v299_v19  ;;  %v303_v21 = vld [vmem:[%s1381_s15 + $0x288] sm:$0xff]  ;;  %v305_v22 = vld [vmem:[%s1381_s15 + $0x290] sm:$0xff] }
  0x23   : > { %302 = vst [vmem:[%s1386_s16 + $0xa0] sm:$0xff] %v301_v20  ;;  %v307_v23 = vld [vmem:[%s1381_s15 + $0x298] sm:$0xff]  ;;  %304 = vst [vmem:[%s1386_s16 + $0xa8] sm:$0xff] %v303_v21  ;;  %v309_v24 = vld [vmem:[%s1381_s15 + $0x300] sm:$0xff] }
  0x24   : > { %306 = vst [vmem:[%s1386_s16 + $0xb0] sm:$0xff] %v305_v22  ;;  %308 = vst [vmem:[%s1386_s16 + $0xb8] sm:$0xff] %v307_v23  ;;  %v311_v25 = vld [vmem:[%s1381_s15 + $0x308] sm:$0xff]  ;;  %v313_v26 = vld [vmem:[%s1381_s15 + $0x310] sm:$0xff] }
  0x25   : > { %310 = vst [vmem:[%s1386_s16 + $0xc0] sm:$0xff] %v309_v24  ;;  %312 = vst [vmem:[%s1386_s16 + $0xc8] sm:$0xff] %v311_v25  ;;  %v315_v27 = vld [vmem:[%s1381_s15 + $0x318] sm:$0xff]  ;;  %v317_v28 = vld [vmem:[%s1381_s15 + $0x380] sm:$0xff] }
  0x26   : > { %314 = vst [vmem:[%s1386_s16 + $0xd0] sm:$0xff] %v313_v26  ;;  %v319_v29 = vld [vmem:[%s1381_s15 + $0x388] sm:$0xff]  ;;  %316 = vst [vmem:[%s1386_s16 + $0xd8] sm:$0xff] %v315_v27  ;;  %v321_v30 = vld [vmem:[%s1381_s15 + $0x390] sm:$0xff] }
  0x27   : > { %318 = vst [vmem:[%s1386_s16 + $0xe0] sm:$0xff] %v317_v28  ;;  %320 = vst [vmem:[%s1386_s16 + $0xe8] sm:$0xff] %v319_v29  ;;  %v323_v31 = vld [vmem:[%s1381_s15 + $0x398] sm:$0xff] }
  0x28   : > { %322 = vst [vmem:[%s1386_s16 + $0xf0] sm:$0xff] %v321_v30  ;;  %324 = vst [vmem:[%s1386_s16 + $0xf8] sm:$0xff] %v323_v31 }
  0x29 PF: > { %p1129_p7 = scmp.ge.s32.totalorder %s1287_s24, 1  ;;  %p339_p8 = scmp.lt.s32.totalorder %s1287_s24, 17 }
  0x2b   : > { %p340_p9 = pnand %p1129_p7, %p339_p8 }
  0x2c   : > { %v561_v32 = vld [vmem:[%s1686_s3] sm:$0xff] (!%p340_p9)  ;;  %v1289_v34 = vmov (!%p340_p9), 0   ;;  %v562_v35 = vld [vmem:[%s1686_s3 + $0x8] sm:$0xff] (!%p340_p9)  ;;  %v484_v37 = vld [vmem:[%s1685_s2 + $0x18] sm:$0xff] (!%p340_p9)  ;;  %v1290_v49 = vmov (!%p340_p9), 0.0   ;;  %s346_s28 = sand.u32 (!%p340_p9), 1, %s1263_s18  }
  0x2d   : > { %343 = sbr.rel (%p340_p9) target bundleno = 591 (0x24f), region = 55  ;;  %v481_v33 = vld [vmem:[%s1685_s2] sm:$0xff] (!%p340_p9)  ;;  %1232 = vset.pattern.permute.xlu1 (!%p340_p9), %v1289_v34  ;;  %1231 = vset.pattern.permute.xlu0 (!%p340_p9), %v1289_v34  ;;  %v482_v36 = vld [vmem:[%s1685_s2 + $0x8] sm:$0xff] (!%p340_p9)  ;;  %v483_v38 = vld [vmem:[%s1685_s2 + $0x10] sm:$0xff] (!%p340_p9)  ;;  %s1130_s29 = sshll.u32 (!%p340_p9), %s346_s28, 8 }
  0x2e   : > { %571 = vperm.xlu1 (!%p340_p9), %1232, %v561_v32   ;;  %491 = vperm.xlu0 (!%p340_p9), %1231, %v481_v33   ;;  %v564_v39 = vld [vmem:[%s1686_s3 + $0x18] sm:$0xff] (!%p340_p9)  ;;  %v563_v40 = vld [vmem:[%s1686_s3 + $0x10] sm:$0xff] (!%p340_p9)  ;;  %v486_v41 = vld [vmem:[%s1685_s2 + $0x28] sm:$0xff] (!%p340_p9)  ;;  %s1500_s30 = scalar_lea.vmem (!%p340_p9), [#allocation3], %s1130_s29  ;;  %p404_p10 = scmp.lt.s32.totalorder (!%p340_p9), %s1275_s21, 3 }
  0x2f   : > { %v485_v42 = vld [vmem:[%s1685_s2 + $0x20] sm:$0xff] (!%p340_p9)  ;;  %v566_v43 = vld [vmem:[%s1686_s3 + $0x28] sm:$0xff] (!%p340_p9)  ;;  %v488_v45 = vld [vmem:[%s1685_s2 + $0x38] sm:$0xff] (!%p340_p9)  ;;  %810 = vmatprep.mubr.f32.mxu0 (!%p340_p9), %v1290_v49  ;;  %881 = vmatprep.mubr.f32.mxu1 (!%p340_p9), %v1290_v49  ;;  %s1132_s10 = sshll.u32 (!%p340_p9), %s1271_s20, 2  ;;  %p435_p12 = scmp.lt.s32.totalorder (!%p340_p9), %s1271_s20, 3 }
  0x30   : > { %v565_v44 = vld [vmem:[%s1686_s3 + $0x20] sm:$0xff] (!%p340_p9)  ;;  %v487_v46 = vld [vmem:[%s1685_s2 + $0x30] sm:$0xff] (!%p340_p9)  ;;  %v568_v47 = vld [vmem:[%s1686_s3 + $0x38] sm:$0xff] (!%p340_p9)  ;;  %p426_p11 = scmp.lt.s32.totalorder (!%p340_p9), %s1132_s10, 15 }
  0x31   : > { %v567_v48 = vld [vmem:[%s1686_s3 + $0x30] sm:$0xff] (!%p340_p9)  ;;  %v449_v50 = vld [vmem:[%s1500_s30] sm:$0xff] (!%p340_p9)  ;;  %v450_v51 = vld [vmem:[%s1500_s30 + $0x8] sm:$0xff] (!%p340_p9) }
  0x32   : > { %576 = vperm.xlu1 (!%p340_p9), %1232, %v562_v35   ;;  %496 = vperm.xlu0 (!%p340_p9), %1231, %v482_v36   ;;  %v451_v52 = vld [vmem:[%s1500_s30 + $0x10] sm:$0xff] (!%p340_p9)  ;;  %v452_v53 = vld [vmem:[%s1500_s30 + $0x18] sm:$0xff] (!%p340_p9)  ;;  %v453_v60 = vld [vmem:[%s1500_s30 + $0x20] sm:$0xff] (!%p340_p9) }
  0x33   : > { %v454_v61 = vld [vmem:[%s1500_s30 + $0x28] sm:$0xff] (!%p340_p9)  ;;  %v455_v62 = vld [vmem:[%s1500_s30 + $0x30] sm:$0xff] (!%p340_p9)  ;;  %v456_v63 = vld [vmem:[%s1500_s30 + $0x38] sm:$0xff] (!%p340_p9) }
  0x34   : > { %v461_v5 = vld [vmem:[%s1500_s30 + $0x60] sm:$0xff]  ;;  %v462_v6 = vld [vmem:[%s1500_s30 + $0x68] sm:$0xff]  ;;  %v463_v12 = vld [vmem:[%s1500_s30 + $0x70] sm:$0xff]  ;;  %s1702_s21 = smov (!%p404_p10, %s1275_s21), 3  ;;  %s1704_s10 = smov (!%p426_p11, %s1132_s10), 15 }
  0x35   : > { %v464_v13 = vld [vmem:[%s1500_s30 + $0x78] sm:$0xff]  ;;  %v457_v14 = vld [vmem:[%s1500_s30 + $0x40] sm:$0xff]  ;;  %v458_v17 = vld [vmem:[%s1500_s30 + $0x48] sm:$0xff]  ;;  %s1131_s18 = sshll.u32 %s1702_s21, 3  ;;  %s1133_s11 = sshll.u32 %s1702_s21, 4 }
  0x36   : > { %506 = vperm.xlu1 %1232, %v484_v37   ;;  %501 = vperm.xlu0 %1231, %v483_v38   ;;  %v459_v18 = vld [vmem:[%s1500_s30 + $0x50] sm:$0xff]  ;;  %v460_v19 = vld [vmem:[%s1500_s30 + $0x58] sm:$0xff]  ;;  %s410_s9 = scalar_lea.vmem %s1684_s1, %s1131_s18  ;;  %s429_s12 = sadd.s32 %s1133_s11, %s1704_s10 }
  0x37   : > { %s1134_s13 = sshll.u32 %s429_s12, 3  ;;  %s1706_s20 = smov (!%p435_p12, %s1271_s20), 3 }
  0x38   : > { %s431_s16 = scalar_lea.vmem %s1687_s4, %s1134_s13  ;;  %s1135_s17 = sshll.u32 %s1702_s21, 2 }
  0x39   : > { %s438_s27 = sadd.s32 %s1135_s17, %s1706_s20 }
  0x3a   : > { %586 = vperm.xlu1 %1232, %v564_v39   ;;  %581 = vperm.xlu0 %1231, %v563_v40   ;;  %s1136_s28 = sshll.u32 %s438_s27, 3 }
  0x3b   : > { %s440_s18 = scalar_lea.vmem %s1688_s5, %s1136_s28 }
  0x3e   : > { %516 = vperm.xlu1 %1232, %v486_v41   ;;  %511 = vperm.xlu0 %1231, %v485_v42  }
  0x42   : > { %596 = vperm.xlu1 %1232, %v566_v43   ;;  %591 = vperm.xlu0 %1231, %v565_v44  }
  0x46   : > { %526 = vperm.xlu1 %1232, %v488_v45   ;;  %521 = vperm.xlu0 %1231, %v487_v46  }
  0x4a   : > { %606 = vperm.xlu1 %1232, %v568_v47   ;;  %601 = vperm.xlu0 %1231, %v567_v48  }
  0xad   : > { %v572_v54 = vpop.permute.xlu1 %571  ;;  %v492_v55 = vpop.permute.xlu0 %491 }
  0xae   : > { %v529_v56 = vmul.f32 %v492_v55, %v449_v50  ;;  %v530_v57 = vmul.f32 %v492_v55, %v450_v51  ;;  %v531_v58 = vmul.f32 %v492_v55, %v451_v52  ;;  %v532_v59 = vmul.f32 %v492_v55, %v452_v53  ;;  %v469_v51 = vld [vmem:[%s1500_s30 + $0xa0] sm:$0xff]  ;;  %v470_v52 = vld [vmem:[%s1500_s30 + $0xa8] sm:$0xff]  ;;  %v471_v53 = vld [vmem:[%s1500_s30 + $0xb0] sm:$0xff] }
  0xb0   : > { %v610_v0 = vadd.f32 %v572_v54, %v530_v57  ;;  %v612_v1 = vadd.f32 %v572_v54, %v532_v59  ;;  %v609_v2 = vadd.f32 %v572_v54, %v529_v56  ;;  %v1512_v7 = vadd.f32 %v572_v54, %v531_v58  ;;  %v472_v57 = vld [vmem:[%s1500_s30 + $0xb8] sm:$0xff]  ;;  %v465_v58 = vld [vmem:[%s1500_s30 + $0x80] sm:$0xff] }
  0xb1   : > { %v577_v3 = vpop.permute.xlu1 %576  ;;  %v497_v4 = vpop.permute.xlu0 %496 }
  0xb2   : > { %v533_v8 = vmul.f32 %v497_v4, %v453_v60  ;;  %v534_v9 = vmul.f32 %v497_v4, %v454_v61  ;;  %v535_v10 = vmul.f32 %v497_v4, %v455_v62  ;;  %v536_v11 = vmul.f32 %v497_v4, %v456_v63 }
  0xb3   : > { %vm642_vm0 = vcmp.gt.f32.partialorder %v610_v0, 0.0  ;;  %v674_v15 = vmul.f32 0.2, %v610_v0  ;;  %vm644_vm1 = vcmp.gt.f32.partialorder %v612_v1, 0.0  ;;  %v676_v16 = vmul.f32 0.2, %v612_v1 }
  0xb4   : > { %v614_v20 = vadd.f32 %v577_v3, %v534_v9  ;;  %v616_v21 = vadd.f32 %v577_v3, %v536_v11  ;;  %v613_v22 = vadd.f32 %v577_v3, %v533_v8  ;;  %vm641_vm2 = vcmp.gt.f32.partialorder %v609_v2, 0.0 }
  0xb5   : > { %v507_v23 = vpop.permute.xlu1 %506  ;;  %v502_v24 = vpop.permute.xlu0 %501  ;;  %v706_v25 = vsel %vm642_vm0, %v610_v0, %v674_v15  ;;  %v708_v26 = vsel %vm644_vm1, %v612_v1, %v676_v16  ;;  %v673_v27 = vmul.f32 0.2, %v609_v2  ;;  %v615_v28 = vadd.f32 %v577_v3, %v535_v10  ;;  %v466_v1 = vld [vmem:[%s1500_s30 + $0x88] sm:$0xff]  ;;  %v468_v3 = vld [vmem:[%s1500_s30 + $0x98] sm:$0xff] }
  0xb6   : > { %v541_v29 = vmul.f32 %v507_v23, %v461_v5  ;;  %v542_v30 = vmul.f32 %v507_v23, %v462_v6  ;;  %v543_v31 = vmul.f32 %v507_v23, %v463_v12  ;;  %v544_v32 = vmul.f32 %v507_v23, %v464_v13 }
  0xb7   : > { %v537_v33 = vmul.f32 %v502_v24, %v457_v14  ;;  %v538_v34 = vmul.f32 %v502_v24, %v458_v17  ;;  %v539_v35 = vmul.f32 %v502_v24, %v459_v18  ;;  %v540_v36 = vmul.f32 %v502_v24, %v460_v19 }
  0xb8   : > { %vm646_vm3 = vcmp.gt.f32.partialorder %v614_v20, 0.0  ;;  %v678_v37 = vmul.f32 0.2, %v614_v20  ;;  %vm648_vm4 = vcmp.gt.f32.partialorder %v616_v21, 0.0  ;;  %v680_v38 = vmul.f32 0.2, %v616_v21 }
  0xb9   : > { %v587_v39 = vpop.permute.xlu1 %586  ;;  %v582_v40 = vpop.permute.xlu0 %581  ;;  %vm645_vm5 = vcmp.gt.f32.partialorder %v613_v22, 0.0  ;;  %v677_v41 = vmul.f32 0.2, %v613_v22  ;;  %v705_v42 = vsel %vm641_vm2, %v609_v2, %v673_v27  ;;  %vm643_vm6 = vcmp.gt.f32.partialorder %v1512_v7, 0.0  ;;  %v467_v2 = vld [vmem:[%s1500_s30 + $0x90] sm:$0xff] }
  0xba   : > { %v1522_v43 = vadd.f32 %v587_v39, %v541_v29  ;;  %v622_v44 = vadd.f32 %v587_v39, %v542_v30  ;;  %v1524_v45 = vadd.f32 %v587_v39, %v543_v31  ;;  %v1526_v46 = vadd.f32 %v587_v39, %v544_v32  ;;  %v477_v30 = vld [vmem:[%s1500_s30 + $0xe0] sm:$0xff] }
  0xbb   : > { %v1528_v47 = vadd.f32 %v582_v40, %v537_v33  ;;  %v618_v48 = vadd.f32 %v582_v40, %v538_v34  ;;  %v1530_v49 = vadd.f32 %v582_v40, %v539_v35  ;;  %v1532_v50 = vadd.f32 %v582_v40, %v540_v36  ;;  %v478_v35 = vld [vmem:[%s1500_s30 + $0xe8] sm:$0xff] }
  0xbc   : > { %v710_v54 = vsel %vm646_vm3, %v614_v20, %v678_v37  ;;  %v712_v55 = vsel %vm648_vm4, %v616_v21, %v680_v38  ;;  %v709_v56 = vsel %vm645_vm5, %v613_v22, %v677_v41  ;;  %vm647_vm7 = vcmp.gt.f32.partialorder %v615_v28, 0.0 }
  0xbd   : > { %v1141_v59 = vpack.c.bf16 %v710_v54, %v706_v25  ;;  %v1157_v60 = vpack.c.bf16 %v712_v55, %v708_v26  ;;  %v1143_v61 = vpack.c.bf16 %v709_v56, %v705_v42  ;;  %v675_v62 = vmul.f32 0.2, %v1512_v7  ;;  %v517_v63 = vpop.permute.xlu1 %516  ;;  %v512_v0 = vpop.permute.xlu0 %511  ;;  %v479_v42 = vld [vmem:[%s1500_s30 + $0xf0] sm:$0xff]  ;;  %v474_v55 = vld [vmem:[%s1500_s30 + $0xc8] sm:$0xff]  ;;  %v476_v56 = vld [vmem:[%s1500_s30 + $0xd8] sm:$0xff] }
  0xbe   : > { %v679_v4 = vmul.f32 0.2, %v615_v28  ;;  %v549_v5 = vmul.f32 %v517_v63, %v469_v51  ;;  %v550_v6 = vmul.f32 %v517_v63, %v470_v52  ;;  %v551_v8 = vmul.f32 %v517_v63, %v471_v53 }
  0xbf   : > { %1142 = vmatprep.subr.bf16.mxu0 %v1141_v59  ;;  %1158 = vmatprep.subr.bf16.mxu1 %v1157_v60  ;;  %v707_v9 = vsel %vm643_vm6, %v1512_v7, %v675_v62  ;;  %v552_v10 = vmul.f32 %v517_v63, %v472_v57  ;;  %v545_v11 = vmul.f32 %v512_v0, %v465_v58  ;;  %vm650_vm8 = vcmp.gt.f32.partialorder %v618_v48, 0.0 }
  0xc0   : > { %1144 = vmatpush1.bf16.msra.mxu0 %v1143_v61  ;;  %v711_v12 = vsel %vm647_vm7, %v615_v28, %v679_v4  ;;  %v546_v13 = vmul.f32 %v512_v0, %v466_v1  ;;  %v547_v14 = vmul.f32 %v512_v0, %v467_v2  ;;  %v548_v15 = vmul.f32 %v512_v0, %v468_v3 }
  0xc1   : > { %v1159_v16 = vpack.c.bf16 %v711_v12, %v707_v9  ;;  %v597_v17 = vpop.permute.xlu1 %596  ;;  %v592_v18 = vpop.permute.xlu0 %591  ;;  %vm654_vm9 = vcmp.gt.f32.partialorder %v622_v44, 0.0  ;;  %v682_v19 = vmul.f32 0.2, %v618_v48  ;;  %v686_v20 = vmul.f32 0.2, %v622_v44 }
  0xc2   : > { %v1550_v21 = vadd.f32 %v597_v17, %v549_v5  ;;  %v1552_v22 = vadd.f32 %v597_v17, %v550_v6  ;;  %v1554_v7 = vadd.f32 %v597_v17, %v551_v8  ;;  %v1556_v23 = vadd.f32 %v597_v17, %v552_v10 }
  0xc3   : > { %1160 = vmatpush1.bf16.msra.mxu1 %v1159_v16  ;;  %v1558_v24 = vadd.f32 %v592_v18, %v545_v11  ;;  %v1560_v25 = vadd.f32 %v592_v18, %v546_v13  ;;  %v1562_v26 = vadd.f32 %v592_v18, %v547_v14  ;;  %v1564_v27 = vadd.f32 %v592_v18, %v548_v15 }
  0xc4   : > { %v714_v28 = vsel %vm650_vm8, %v618_v48, %v682_v19  ;;  %v718_v29 = vsel %vm654_vm9, %v622_v44, %v686_v20  ;;  %vm652_vm10 = vcmp.gt.f32.partialorder %v1532_v50, 0.0  ;;  %vm656_vm11 = vcmp.gt.f32.partialorder %v1526_v46, 0.0  ;;  %v480_v44 = vld [vmem:[%s1500_s30 + $0xf8] sm:$0xff]  ;;  %v473_v48 = vld [vmem:[%s1500_s30 + $0xc0] sm:$0xff] }
  0xc5   : > { %v1145_v31 = vpack.c.bf16 %v718_v29, %v714_v28  ;;  %v684_v32 = vmul.f32 0.2, %v1532_v50  ;;  %v688_v33 = vmul.f32 0.2, %v1526_v46  ;;  %vm649_vm12 = vcmp.gt.f32.partialorder %v1528_v47, 0.0  ;;  %v527_v34 = vpop.permute.xlu1 %526  ;;  %v522_v36 = vpop.permute.xlu0 %521 }
  0xc6   : > { %vm653_vm13 = vcmp.gt.f32.partialorder %v1522_v43, 0.0  ;;  %v681_v37 = vmul.f32 0.2, %v1528_v47  ;;  %v685_v38 = vmul.f32 0.2, %v1522_v43  ;;  %vm651_vm14 = vcmp.gt.f32.partialorder %v1530_v49, 0.0 }
  0xc7   : > { %1146 = vmatprep.subr.bf16.mxu0 %v1145_v31  ;;  %v716_v39 = vsel %vm652_vm10, %v1532_v50, %v684_v32  ;;  %v720_v40 = vsel %vm656_vm11, %v1526_v46, %v688_v33  ;;  %vm655_vm15 = vcmp.gt.f32.partialorder %v1524_v45, 0.0  ;;  %v683_v41 = vmul.f32 0.2, %v1530_v49  ;;  %v475_v50 = vld [vmem:[%s1500_s30 + $0xd0] sm:$0xff] }
  0xc8   : > { %v1161_v51 = vpack.c.bf16 %v720_v40, %v716_v39  ;;  %v713_v52 = vsel %vm649_vm12, %v1528_v47, %v681_v37  ;;  %v717_v53 = vsel %vm653_vm13, %v1522_v43, %v685_v38  ;;  %v687_v54 = vmul.f32 0.2, %v1524_v45 }
  0xc9   : > { %v1147_v46 = vpack.c.bf16 %v717_v53, %v713_v52  ;;  %v715_v57 = vsel %vm651_vm14, %v1530_v49, %v683_v41  ;;  %v557_v58 = vmul.f32 %v527_v34, %v477_v30  ;;  %v558_v59 = vmul.f32 %v527_v34, %v478_v35  ;;  %v607_v60 = vpop.permute.xlu1 %606  ;;  %v602_v63 = vpop.permute.xlu0 %601 }
  0xca   : > { %1162 = vmatprep.subr.bf16.mxu1 %v1161_v51  ;;  %v719_v47 = vsel %vm655_vm15, %v1524_v45, %v687_v54  ;;  %v559_v61 = vmul.f32 %v527_v34, %v479_v42  ;;  %v560_v43 = vmul.f32 %v527_v34, %v480_v44  ;;  %v553_v62 = vmul.f32 %v522_v36, %v473_v48 }
  0xcb   : > { %1148 = vmatpush1.bf16.msra.mxu0 %v1147_v46  ;;  %v1163_v0 = vpack.c.bf16 %v719_v47, %v715_v57  ;;  %v554_v1 = vmul.f32 %v522_v36, %v474_v55  ;;  %v555_v2 = vmul.f32 %v522_v36, %v475_v50  ;;  %v556_v3 = vmul.f32 %v522_v36, %v476_v56  ;;  %v741_v50 = vld [vmem:[%s410_s9] sm:$0xff] }
  0xcc   : > { %v1599_v4 = vadd.f32 %v607_v60, %v557_v58  ;;  %v638_v49 = vadd.f32 %v607_v60, %v558_v59  ;;  %v1601_v5 = vadd.f32 %v607_v60, %v559_v61  ;;  %v640_v6 = vadd.f32 %v607_v60, %v560_v43 }
  0xcd   : > { %1164 = vmatpush1.bf16.msra.mxu1 %v1163_v0  ;;  %v633_v8 = vadd.f32 %v602_v63, %v553_v62  ;;  %v634_v9 = vadd.f32 %v602_v63, %v554_v1  ;;  %v1603_v45 = vadd.f32 %v602_v63, %v555_v2  ;;  %v636_v10 = vadd.f32 %v602_v63, %v556_v3 }
  0xce   : > { %vm658_vm0 = vcmp.gt.f32.partialorder %v1560_v25, 0.0  ;;  %vm662_vm1 = vcmp.gt.f32.partialorder %v1552_v22, 0.0  ;;  %v690_v11 = vmul.f32 0.2, %v1560_v25  ;;  %v694_v12 = vmul.f32 0.2, %v1552_v22 }
  0xcf   : > { %vm660_vm2 = vcmp.gt.f32.partialorder %v1564_v27, 0.0  ;;  %vm664_vm3 = vcmp.gt.f32.partialorder %v1556_v23, 0.0  ;;  %v692_v13 = vmul.f32 0.2, %v1564_v27  ;;  %v696_v14 = vmul.f32 0.2, %v1556_v23 }
  0xd0   : > { %v722_v15 = vsel %vm658_vm0, %v1560_v25, %v690_v11  ;;  %v726_v16 = vsel %vm662_vm1, %v1552_v22, %v694_v12  ;;  %vm657_vm4 = vcmp.gt.f32.partialorder %v1558_v24, 0.0  ;;  %vm661_vm5 = vcmp.gt.f32.partialorder %v1550_v21, 0.0 }
  0xd1   : > { %v1149_v17 = vpack.c.bf16 %v726_v16, %v722_v15  ;;  %v724_v18 = vsel %vm660_vm2, %v1564_v27, %v692_v13  ;;  %v728_v19 = vsel %vm664_vm3, %v1556_v23, %v696_v14  ;;  %v689_v20 = vmul.f32 0.2, %v1558_v24 }
  0xd2   : > { %v1165_v28 = vpack.c.bf16 %v728_v19, %v724_v18  ;;  %v693_v29 = vmul.f32 0.2, %v1550_v21  ;;  %vm659_vm6 = vcmp.gt.f32.partialorder %v1562_v26, 0.0  ;;  %vm663_vm7 = vcmp.gt.f32.partialorder %v1554_v7, 0.0 }
  0xd3   : > { %1150 = vmatprep.subr.bf16.mxu0 %v1149_v17  ;;  %v721_v22 = vsel %vm657_vm4, %v1558_v24, %v689_v20  ;;  %v691_v25 = vmul.f32 0.2, %v1562_v26  ;;  %v695_v30 = vmul.f32 0.2, %v1554_v7  ;;  %vm666_vm8 = vcmp.gt.f32.partialorder %v634_v9, 0.0 }
  0xd4   : > { %1166 = vmatprep.subr.bf16.mxu1 %v1165_v28  ;;  %v725_v23 = vsel %vm661_vm5, %v1550_v21, %v693_v29  ;;  %vm670_vm9 = vcmp.gt.f32.partialorder %v638_v49, 0.0  ;;  %v698_v27 = vmul.f32 0.2, %v634_v9  ;;  %v702_v31 = vmul.f32 0.2, %v638_v49 }
  0xd5   : > { %v1151_v32 = vpack.c.bf16 %v725_v23, %v721_v22  ;;  %v723_v24 = vsel %vm659_vm6, %v1562_v26, %v691_v25  ;;  %v727_v33 = vsel %vm663_vm7, %v1554_v7, %v695_v30  ;;  %vm668_vm10 = vcmp.gt.f32.partialorder %v636_v10, 0.0 }
  0xd6   : > { %v1167_v34 = vpack.c.bf16 %v727_v33, %v723_v24  ;;  %v730_v35 = vsel %vm666_vm8, %v634_v9, %v698_v27  ;;  %v734_v36 = vsel %vm670_vm9, %v638_v49, %v702_v31  ;;  %vm672_vm11 = vcmp.gt.f32.partialorder %v640_v6, 0.0 }
  0xd7   : > { %1152 = vmatpush1.bf16.msra.mxu0 %v1151_v32  ;;  %v1153_v37 = vpack.c.bf16 %v734_v36, %v730_v35  ;;  %v700_v38 = vmul.f32 0.2, %v636_v10  ;;  %v704_v39 = vmul.f32 0.2, %v640_v6  ;;  %vm665_vm12 = vcmp.gt.f32.partialorder %v633_v8, 0.0 }
  0xd8   : > { %1168 = vmatpush1.bf16.msra.mxu1 %v1167_v34  ;;  %vm669_vm13 = vcmp.gt.f32.partialorder %v1599_v4, 0.0  ;;  %v697_v21 = vmul.f32 0.2, %v633_v8  ;;  %v701_v40 = vmul.f32 0.2, %v1599_v4  ;;  %vm667_vm14 = vcmp.gt.f32.partialorder %v1603_v45, 0.0 }
  0xd9   : > { %1154 = vmatprep.subr.bf16.mxu0 %v1153_v37  ;;  %v732_v7 = vsel %vm668_vm10, %v636_v10, %v700_v38  ;;  %v736_v26 = vsel %vm672_vm11, %v640_v6, %v704_v39  ;;  %vm671_vm15 = vcmp.gt.f32.partialorder %v1601_v5, 0.0  ;;  %v699_v41 = vmul.f32 0.2, %v1603_v45 }
  0xda   : > { %v1169_v42 = vpack.c.bf16 %v736_v26, %v732_v7  ;;  %v729_v44 = vsel %vm665_vm12, %v633_v8, %v697_v21  ;;  %v733_v48 = vsel %vm669_vm13, %v1599_v4, %v701_v40  ;;  %v703_v51 = vmul.f32 0.2, %v1601_v5 }
  0xdb   : > { %v1155_v52 = vpack.c.bf16 %v733_v48, %v729_v44  ;;  %v731_v53 = vsel %vm667_vm14, %v1603_v45, %v699_v41  ;;  %vm742_vm0 = vcmask 523264   ;;  %v921_v3 = vlaneseq }
  0xdc   : > { %1170 = vmatprep.subr.bf16.mxu1 %v1169_v42  ;;  %v735_v54 = vsel %vm671_vm15, %v1601_v5, %v703_v51 }
  0xdd   : > { %1156 = vmatpush1.bf16.msra.mxu0 %v1155_v52  ;;  %v1171_v55 = vpack.c.bf16 %v735_v54, %v731_v53  ;;  %v922_v4 = vand.u32 127, %v921_v3 }
  0xdf   : > { %1172 = vmatpush1.bf16.msra.mxu1 %v1171_v55  ;;  %vm923_vm1 = vcmp.eq.s32.totalorder %v922_v4, 0  ;;  %vm925_vm2 = vcmp.eq.s32.totalorder %v922_v4, 1 }
  0xe0   : > { %1137 = vmatmul.mubr.msk.f32.vlgmr.msra.gmra.mrb[0].mxu0 %vm742_vm0, %v741_v50 }
  0xe2   : > { %1138 = vmatmul.mubr.msk.f32.vlgmr.msra.gmra.mrb[0].mxu1 %vm742_vm0, %v741_v50 }
 0x1b3   : > { %v812_v56 = vpop.f32.mrb[0].mxu0 }
 0x1b4   : > { %903 = vst [vmem:[%s431_s16] sm:$0xff] %v812_v56  ;;  %v912_v46 = vmul.f32 %v812_v56, %v812_v56  ;;  %v814_v57 = vpop.f32.mrb[1].mxu0 }
 0x1b5   : > { %904 = vst [vmem:[%s431_s16 + $0x8] sm:$0xff] %v814_v57  ;;  %v907_v58 = vadd.f32 %v814_v57, %v812_v56  ;;  %v913_v59 = vmul.f32 %v814_v57, %v814_v57  ;;  %v883_v60 = vpop.f32.mrb[0].mxu1 }
 0x1b6   : > { %905 = vst [vmem:[%s431_s16 + $0x10] sm:$0xff] %v883_v60  ;;  %v914_v47 = vmul.f32 %v883_v60, %v883_v60  ;;  %v885_v61 = vpop.f32.mrb[1].mxu1 }
 0x1b7   : > { %v916_v43 = vadd.f32 %v913_v59, %v912_v46  ;;  %906 = vst [vmem:[%s431_s16 + $0x18] sm:$0xff] %v885_v61  ;;  %v908_v62 = vadd.f32 %v907_v58, %v883_v60  ;;  %v915_v63 = vmul.f32 %v885_v61, %v885_v61 }
 0x1b9   : > { %v909_v0 = vadd.f32 %v908_v62, %v885_v61  ;;  %v917_v1 = vadd.f32 %v916_v43, %v914_v47 }
 0x1bb   : > { %910 = vadd.xlane.f32.xlu0 %v909_v0  ;;  %v918_v2 = vadd.f32 %v917_v1, %v915_v63 }
 0x1bd   : > { %919 = vadd.xlane.f32.xlu1 %v918_v2 }
 0x248   : > { %v911_v49 = vpop.xlane.xlu0 %910 }
 0x249   : > { %v924_v6 = vsel %vm923_vm1, %v911_v49, 0.0 }
 0x24a   : > { %v920_v5 = vpop.xlane.xlu1 %919 }
 0x24b   : > { %v926_v8 = vsel %vm925_vm2, %v920_v5, 0.0 }
 0x24c   : > { %v927_v9 = vadd.f32 %v926_v8, %v924_v6 }
 0x24e   : > { %928 = vst [vmem:[%s440_s18] sm:$0xff] %v927_v9 }
 0x24f PF: > { %s16_s24 = sadd.s32 1, %s1287_s24   ;;  %s1689_s18 = smov %s1267_s19 }
 0x250   : > { %p13_p13 = scmp.ge.s32.totalorder %s16_s24, 18   ;;  %s1690_s19 = smov %s1372_s6 }
 0x251   : > { %s1691_s20 = smov %s1279_s22  ;;  %s1692_s21 = smov %s1283_s23 }
 0x252   : > { %s1693_s22 = smov %s1696_s25  ;;  %s1694_s23 = smov %s1700_s26 }
 0x253   :  { %15 = sbr.rel (!%p13_p13) target bundleno = 4 (0x4), region = 123 }

// kernel: _lambda_.11
= control target key start
LH: loop header
LB: loop body
LE: loop exit
PB: predicated region body
PF: predicated region fallthrough
CT: control target
= control target key end

     0   :  { %s1017_s15 = smov 0   ;;  %s1019_s16 = smov 0   ;;  %s1187_s0 = inlined_call_operand.vmem [shape: f32[4,32,8192], index: 0, kind: input, shape index: {}]   ;;  %s1188_s1 = inlined_call_operand.vmem [shape: f32[4,8,32], index: 1, kind: input, shape index: {}]   ;;  %s1189_s2 = inlined_call_operand.vmem [shape: f32[32,1], index: 2, kind: input, shape index: {}]   ;;  %s1190_s3 = inlined_call_operand.vmem [shape: f32[32,1], index: 3, kind: input, shape index: {}]   ;;  %s1191_s4 = inlined_call_operand.vmem [shape: f32[4,8,8192], index: 4, kind: output, shape index: {}]  }
   0x1   :  { %s1021_s17 = smov 0   ;;  %s1023_s18 = smov 0  }
   0x2   :  { %s1025_s19 = smov 0   ;;  %s1027_s20 = smov 0  }
   0x3   :  { %s1029_s21 = smov 0  }
   0x4 LB: > { %s29_s22 = sadd.s32 1, %s980_s19  ;;  %s33_s23 = sadd.s32 1, %s984_s20  ;;  %s988_s21 = sphi %s1029_s21, %s14_s21   ;;  %s984_s20 = sphi %s1027_s20, %s1197_s20   ;;  %s980_s19 = sphi %s1025_s19, %s1196_s19   ;;  %s976_s18 = sphi %s1023_s18, %s1195_s18   ;;  %s972_s17 = sphi %s1021_s17, %s1194_s17   ;;  %s968_s16 = sphi %s1019_s16, %s1193_s16   ;;  %s964_s15 = sphi %s1017_s15, %s1192_s15  }
   0x5   : > { %p31_p0 = scmp.ge.s32.totalorder %s29_s22, 16  ;;  %p51_p1 = scmp.ne.s32.totalorder %s968_s16, %s964_s15 }
   0x6   : > { %p52_p2 = scmp.eq.s32.totalorder %s988_s21, 0  ;;  %s44_s27 = sadd.s32 1, %s968_s16 }
   0x7   : > { %s1199_s22 = smov (%p31_p0, %s29_s22), 0  ;;  %s1201_s23 = smov (!%p31_p0, %s33_s23), %s984_s20 }
   0x8   : > { %p53_p3 = por %p52_p2, %p51_p1  ;;  %p35_p4 = scmp.ge.s32.totalorder %s1201_s23, 4 }
   0x9   : > { %s40_s24 = ssub.s32 %s980_s19, %s1199_s22  ;;  %p835_p6 = scmp.ge.s32.totalorder %s988_s21, 64 }
   0xa   : > { %s1203_s23 = smov (%p35_p4, %s1201_s23), 0 }
   0xb   : > { %s37_s25 = ssub.s32 %s984_s20, %s1203_s23  ;;  %203 = sbr.rel (%p835_p6) target bundleno = 33 (0x21), region = 24 }
   0xc   : > { %s41_s26 = sor.u32 %s40_s24, %s37_s25 }
   0xd   : > { %p42_p5 = scmp.eq.s32.totalorder %s41_s26, 0 }
   0xf   : > { %s1068_s28 = scalar_select %p42_p5, %s968_s16, %s44_s27  }
  0x12   : > { %206 = sbr.rel (!%p53_p3) target bundleno = 33 (0x21), region = 28  ;;  %s208_s29 = sand.u32 (%p53_p3), 1, %s968_s16  }
  0x13   : > { %s837_s30 = sshll.u32 (%p53_p3), %s980_s19, 2  ;;  %s836_s5 = sshll.u32 (%p53_p3), %s208_s29, 7 }
  0x14   : > { %s838_s6 = sshll.u32 (%p53_p3), %s984_s20, 8  ;;  %s210_s12 = scalar_lea.vmem (%p53_p3), [#allocation3], %s836_s5 }
  0x15   : > { %s216_s7 = sadd.s32 (%p53_p3), %s838_s6, %s837_s30 }
  0x16   : > { %s839_s8 = sshll.u32 (%p53_p3), %s216_s7, 3 }
  0x17   : > { %s1077_s11 = scalar_lea.vmem (%p53_p3), %s1187_s0, %s839_s8 }
  0x18   : > { %v231_v0 = vld [vmem:[%s1077_s11] sm:$0xff] (%p53_p3)  ;;  %v233_v1 = vld [vmem:[%s1077_s11 + $0x8] sm:$0xff] (%p53_p3)  ;;  %v235_v2 = vld [vmem:[%s1077_s11 + $0x10] sm:$0xff] (%p53_p3) }
  0x19   : > { %232 = vst [vmem:[%s210_s12] sm:$0xff] %v231_v0  ;;  %234 = vst [vmem:[%s210_s12 + $0x8] sm:$0xff] %v233_v1  ;;  %v237_v3 = vld [vmem:[%s1077_s11 + $0x18] sm:$0xff]  ;;  %v239_v4 = vld [vmem:[%s1077_s11 + $0x200] sm:$0xff] }
  0x1a   : > { %236 = vst [vmem:[%s210_s12 + $0x10] sm:$0xff] %v235_v2  ;;  %v241_v5 = vld [vmem:[%s1077_s11 + $0x208] sm:$0xff]  ;;  %238 = vst [vmem:[%s210_s12 + $0x18] sm:$0xff] %v237_v3  ;;  %v243_v6 = vld [vmem:[%s1077_s11 + $0x210] sm:$0xff] }
  0x1b   : > { %240 = vst [vmem:[%s210_s12 + $0x20] sm:$0xff] %v239_v4  ;;  %242 = vst [vmem:[%s210_s12 + $0x28] sm:$0xff] %v241_v5  ;;  %v245_v7 = vld [vmem:[%s1077_s11 + $0x218] sm:$0xff]  ;;  %v247_v8 = vld [vmem:[%s1077_s11 + $0x400] sm:$0xff] }
  0x1c   : > { %244 = vst [vmem:[%s210_s12 + $0x30] sm:$0xff] %v243_v6  ;;  %246 = vst [vmem:[%s210_s12 + $0x38] sm:$0xff] %v245_v7  ;;  %v249_v9 = vld [vmem:[%s1077_s11 + $0x408] sm:$0xff]  ;;  %v251_v10 = vld [vmem:[%s1077_s11 + $0x410] sm:$0xff] }
  0x1d   : > { %248 = vst [vmem:[%s210_s12 + $0x40] sm:$0xff] %v247_v8  ;;  %v253_v11 = vld [vmem:[%s1077_s11 + $0x418] sm:$0xff]  ;;  %250 = vst [vmem:[%s210_s12 + $0x48] sm:$0xff] %v249_v9  ;;  %v255_v12 = vld [vmem:[%s1077_s11 + $0x600] sm:$0xff] }
  0x1e   : > { %252 = vst [vmem:[%s210_s12 + $0x50] sm:$0xff] %v251_v10  ;;  %254 = vst [vmem:[%s210_s12 + $0x58] sm:$0xff] %v253_v11  ;;  %v257_v13 = vld [vmem:[%s1077_s11 + $0x608] sm:$0xff]  ;;  %v259_v14 = vld [vmem:[%s1077_s11 + $0x610] sm:$0xff] }
  0x1f   : > { %256 = vst [vmem:[%s210_s12 + $0x60] sm:$0xff] %v255_v12  ;;  %258 = vst [vmem:[%s210_s12 + $0x68] sm:$0xff] %v257_v13  ;;  %v261_v15 = vld [vmem:[%s1077_s11 + $0x618] sm:$0xff] }
  0x20   : > { %260 = vst [vmem:[%s210_s12 + $0x70] sm:$0xff] %v259_v14  ;;  %262 = vst [vmem:[%s210_s12 + $0x78] sm:$0xff] %v261_v15 }
  0x21 PF: > { %p840_p7 = scmp.ge.s32.totalorder %s988_s21, 1  ;;  %p277_p8 = scmp.lt.s32.totalorder %s988_s21, 65 }
  0x23   : > { %p278_p9 = pnand %p840_p7, %p277_p8 }
  0x24   : > { %v425_v16 = vld [vmem:[%s1190_s3] sm:$0xff] (!%p278_p9)  ;;  %v990_v18 = vmov (!%p278_p9), 0   ;;  %v426_v19 = vld [vmem:[%s1190_s3 + $0x8] sm:$0xff] (!%p278_p9)  ;;  %v388_v21 = vld [vmem:[%s1189_s2 + $0x18] sm:$0xff] (!%p278_p9)  ;;  %v991_v25 = vmov (!%p278_p9), 0.0   ;;  %s284_s13 = sand.u32 (!%p278_p9), 1, %s964_s15  }
  0x25   : > { %281 = sbr.rel (%p278_p9) target bundleno = 421 (0x1a5), region = 55  ;;  %v385_v17 = vld [vmem:[%s1189_s2] sm:$0xff] (!%p278_p9)  ;;  %925 = vset.pattern.permute.xlu1 (!%p278_p9), %v990_v18  ;;  %924 = vset.pattern.permute.xlu0 (!%p278_p9), %v990_v18  ;;  %v386_v20 = vld [vmem:[%s1189_s2 + $0x8] sm:$0xff] (!%p278_p9)  ;;  %v387_v22 = vld [vmem:[%s1189_s2 + $0x10] sm:$0xff] (!%p278_p9)  ;;  %s841_s14 = sshll.u32 (!%p278_p9), %s284_s13, 7 }
  0x26   : > { %431 = vperm.xlu1 (!%p278_p9), %925, %v425_v16   ;;  %391 = vperm.xlu0 (!%p278_p9), %924, %v385_v17   ;;  %v428_v23 = vld [vmem:[%s1190_s3 + $0x18] sm:$0xff] (!%p278_p9)  ;;  %v427_v24 = vld [vmem:[%s1190_s3 + $0x10] sm:$0xff] (!%p278_p9)  ;;  %s1122_s24 = scalar_lea.vmem (!%p278_p9), [#allocation3], %s841_s14  ;;  %p332_p10 = scmp.lt.s32.totalorder (!%p278_p9), %s976_s18, 3 }
  0x27   : > { %586 = vmatprep.mubr.f32.mxu0 (!%p278_p9), %v991_v25  ;;  %657 = vmatprep.mubr.f32.mxu1 (!%p278_p9), %v991_v25  ;;  %v369_v26 = vld [vmem:[%s1122_s24] sm:$0xff] (!%p278_p9)  ;;  %v370_v27 = vld [vmem:[%s1122_s24 + $0x8] sm:$0xff] (!%p278_p9)  ;;  %v371_v28 = vld [vmem:[%s1122_s24 + $0x10] sm:$0xff] (!%p278_p9)  ;;  %s843_s29 = sshll.u32 (!%p278_p9), %s972_s17, 2 }
  0x28   : > { %v372_v29 = vld [vmem:[%s1122_s24 + $0x18] sm:$0xff] (!%p278_p9)  ;;  %v373_v36 = vld [vmem:[%s1122_s24 + $0x20] sm:$0xff] (!%p278_p9)  ;;  %v374_v37 = vld [vmem:[%s1122_s24 + $0x28] sm:$0xff] (!%p278_p9)  ;;  %p354_p11 = scmp.lt.s32.totalorder (!%p278_p9), %s843_s29, 63 }
  0x29   : > { %v375_v38 = vld [vmem:[%s1122_s24 + $0x30] sm:$0xff] (!%p278_p9)  ;;  %v376_v39 = vld [vmem:[%s1122_s24 + $0x38] sm:$0xff] (!%p278_p9)  ;;  %v381_v45 = vld [vmem:[%s1122_s24 + $0x60] sm:$0xff] (!%p278_p9) }
  0x2a   : > { %436 = vperm.xlu1 (!%p278_p9), %925, %v426_v19   ;;  %396 = vperm.xlu0 (!%p278_p9), %924, %v386_v20   ;;  %v382_v46 = vld [vmem:[%s1122_s24 + $0x68] sm:$0xff] (!%p278_p9)  ;;  %v383_v52 = vld [vmem:[%s1122_s24 + $0x70] sm:$0xff] (!%p278_p9)  ;;  %v384_v53 = vld [vmem:[%s1122_s24 + $0x78] sm:$0xff] (!%p278_p9) }
  0x2b   : > { %v377_v54 = vld [vmem:[%s1122_s24 + $0x40] sm:$0xff] (!%p278_p9)  ;;  %v378_v57 = vld [vmem:[%s1122_s24 + $0x48] sm:$0xff] (!%p278_p9)  ;;  %v379_v58 = vld [vmem:[%s1122_s24 + $0x50] sm:$0xff] (!%p278_p9) }
  0x2c   : > { %v380_v59 = vld [vmem:[%s1122_s24 + $0x58] sm:$0xff]  ;;  %s1205_s18 = smov (!%p332_p10, %s976_s18), 3  ;;  %s1207_s29 = smov (!%p354_p11, %s843_s29), 63 }
  0x2d   : > { %s842_s15 = sshll.u32 %s1205_s18, 3  ;;  %s844_s30 = sshll.u32 %s1205_s18, 6 }
  0x2e   : > { %406 = vperm.xlu1 %925, %v388_v21   ;;  %401 = vperm.xlu0 %924, %v387_v22   ;;  %s338_s27 = scalar_lea.vmem %s1188_s1, %s842_s15  ;;  %s357_s5 = sadd.s32 %s844_s30, %s1207_s29 }
  0x2f   : > { %s845_s6 = sshll.u32 %s357_s5, 3 }
  0x30   : > { %s359_s9 = scalar_lea.vmem %s1191_s4, %s845_s6 }
  0x32   : > { %446 = vperm.xlu1 %925, %v428_v23   ;;  %441 = vperm.xlu0 %924, %v427_v24  }
  0xa5   : > { %v432_v30 = vpop.permute.xlu1 %431  ;;  %v392_v31 = vpop.permute.xlu0 %391 }
  0xa6   : > { %v409_v32 = vmul.f32 %v392_v31, %v369_v26  ;;  %v410_v33 = vmul.f32 %v392_v31, %v370_v27  ;;  %v411_v34 = vmul.f32 %v392_v31, %v371_v28  ;;  %v412_v35 = vmul.f32 %v392_v31, %v372_v29 }
  0xa8   : > { %v450_v40 = vadd.f32 %v432_v30, %v410_v33  ;;  %v452_v41 = vadd.f32 %v432_v30, %v412_v35  ;;  %v449_v42 = vadd.f32 %v432_v30, %v409_v32  ;;  %v1134_v47 = vadd.f32 %v432_v30, %v411_v34 }
  0xa9   : > { %v437_v43 = vpop.permute.xlu1 %436  ;;  %v397_v44 = vpop.permute.xlu0 %396 }
  0xaa   : > { %v413_v48 = vmul.f32 %v397_v44, %v373_v36  ;;  %v414_v49 = vmul.f32 %v397_v44, %v374_v37  ;;  %v415_v50 = vmul.f32 %v397_v44, %v375_v38  ;;  %v416_v51 = vmul.f32 %v397_v44, %v376_v39 }
  0xab   : > { %vm466_vm0 = vcmp.gt.f32.partialorder %v450_v40, 0.0  ;;  %v482_v55 = vmul.f32 0.2, %v450_v40  ;;  %vm468_vm1 = vcmp.gt.f32.partialorder %v452_v41, 0.0  ;;  %v484_v56 = vmul.f32 0.2, %v452_v41 }
  0xac   : > { %v454_v60 = vadd.f32 %v437_v43, %v414_v49  ;;  %v456_v61 = vadd.f32 %v437_v43, %v416_v51  ;;  %v453_v62 = vadd.f32 %v437_v43, %v413_v48  ;;  %vm465_vm2 = vcmp.gt.f32.partialorder %v449_v42, 0.0 }
  0xad   : > { %v407_v63 = vpop.permute.xlu1 %406  ;;  %v402_v0 = vpop.permute.xlu0 %401  ;;  %v498_v1 = vsel %vm466_vm0, %v450_v40, %v482_v55  ;;  %v500_v2 = vsel %vm468_vm1, %v452_v41, %v484_v56  ;;  %v481_v3 = vmul.f32 0.2, %v449_v42  ;;  %v455_v4 = vadd.f32 %v437_v43, %v415_v50 }
  0xae   : > { %v421_v5 = vmul.f32 %v407_v63, %v381_v45  ;;  %v422_v6 = vmul.f32 %v407_v63, %v382_v46  ;;  %v423_v7 = vmul.f32 %v407_v63, %v383_v52  ;;  %v424_v8 = vmul.f32 %v407_v63, %v384_v53 }
  0xaf   : > { %v417_v9 = vmul.f32 %v402_v0, %v377_v54  ;;  %v418_v10 = vmul.f32 %v402_v0, %v378_v57  ;;  %v419_v11 = vmul.f32 %v402_v0, %v379_v58  ;;  %v420_v12 = vmul.f32 %v402_v0, %v380_v59  ;;  %v517_v58 = vld [vmem:[%s338_s27] sm:$0xff] }
  0xb0   : > { %vm470_vm3 = vcmp.gt.f32.partialorder %v454_v60, 0.0  ;;  %v486_v13 = vmul.f32 0.2, %v454_v60  ;;  %vm472_vm4 = vcmp.gt.f32.partialorder %v456_v61, 0.0  ;;  %v488_v14 = vmul.f32 0.2, %v456_v61 }
  0xb1   : > { %v447_v15 = vpop.permute.xlu1 %446  ;;  %v442_v16 = vpop.permute.xlu0 %441  ;;  %vm469_vm5 = vcmp.gt.f32.partialorder %v453_v62, 0.0  ;;  %v485_v17 = vmul.f32 0.2, %v453_v62  ;;  %v497_v18 = vsel %vm465_vm2, %v449_v42, %v481_v3  ;;  %vm467_vm6 = vcmp.gt.f32.partialorder %v1134_v47, 0.0 }
  0xb2   : > { %v461_v19 = vadd.f32 %v447_v15, %v421_v5  ;;  %v462_v20 = vadd.f32 %v447_v15, %v422_v6  ;;  %v463_v21 = vadd.f32 %v447_v15, %v423_v7  ;;  %v464_v22 = vadd.f32 %v447_v15, %v424_v8 }
  0xb3   : > { %v457_v23 = vadd.f32 %v442_v16, %v417_v9  ;;  %v458_v24 = vadd.f32 %v442_v16, %v418_v10  ;;  %v459_v25 = vadd.f32 %v442_v16, %v419_v11  ;;  %v460_v26 = vadd.f32 %v442_v16, %v420_v12 }
  0xb4   : > { %v493_v27 = vmul.f32 0.2, %v461_v19  ;;  %v494_v28 = vmul.f32 0.2, %v462_v20  ;;  %v495_v29 = vmul.f32 0.2, %v463_v21  ;;  %v502_v30 = vsel %vm470_vm3, %v454_v60, %v486_v13 }
  0xb5   : > { %v496_v31 = vmul.f32 0.2, %v464_v22  ;;  %v489_v32 = vmul.f32 0.2, %v457_v23  ;;  %v490_v33 = vmul.f32 0.2, %v458_v24  ;;  %v850_v34 = vpack.c.bf16 %v502_v30, %v498_v1 }
  0xb6   : > { %v491_v35 = vmul.f32 0.2, %v459_v25  ;;  %v492_v36 = vmul.f32 0.2, %v460_v26  ;;  %v504_v37 = vsel %vm472_vm4, %v456_v61, %v488_v14  ;;  %v501_v38 = vsel %vm469_vm5, %v453_v62, %v485_v17 }
  0xb7   : > { %851 = vmatprep.subr.bf16.mxu0 %v850_v34  ;;  %v858_v39 = vpack.c.bf16 %v504_v37, %v500_v2  ;;  %v852_v40 = vpack.c.bf16 %v501_v38, %v497_v18  ;;  %vm471_vm7 = vcmp.gt.f32.partialorder %v455_v4, 0.0  ;;  %v483_v41 = vmul.f32 0.2, %v1134_v47 }
  0xb8   : > { %v487_v42 = vmul.f32 0.2, %v455_v4  ;;  %vm474_vm8 = vcmp.gt.f32.partialorder %v458_v24, 0.0  ;;  %vm478_vm9 = vcmp.gt.f32.partialorder %v462_v20, 0.0  ;;  %vm476_vm10 = vcmp.gt.f32.partialorder %v460_v26, 0.0 }
  0xb9   : > { %859 = vmatprep.subr.bf16.mxu1 %v858_v39  ;;  %853 = vmatpush1.bf16.msra.mxu0 %v852_v40  ;;  %v499_v43 = vsel %vm467_vm6, %v1134_v47, %v483_v41  ;;  %v506_v44 = vsel %vm474_vm8, %v458_v24, %v490_v33  ;;  %v510_v45 = vsel %vm478_vm9, %v462_v20, %v494_v28  ;;  %vm480_vm11 = vcmp.gt.f32.partialorder %v464_v22, 0.0 }
  0xba   : > { %v503_v46 = vsel %vm471_vm7, %v455_v4, %v487_v42  ;;  %v854_v48 = vpack.c.bf16 %v510_v45, %v506_v44  ;;  %v508_v49 = vsel %vm476_vm10, %v460_v26, %v492_v36  ;;  %v512_v50 = vsel %vm480_vm11, %v464_v22, %v496_v31 }
  0xbb   : > { %v860_v51 = vpack.c.bf16 %v503_v46, %v499_v43  ;;  %v862_v52 = vpack.c.bf16 %v512_v50, %v508_v49  ;;  %vm473_vm12 = vcmp.gt.f32.partialorder %v457_v23, 0.0  ;;  %vm477_vm13 = vcmp.gt.f32.partialorder %v461_v19, 0.0 }
  0xbc   : > { %855 = vmatprep.subr.bf16.mxu0 %v854_v48  ;;  %v505_v53 = vsel %vm473_vm12, %v457_v23, %v489_v32  ;;  %v509_v54 = vsel %vm477_vm13, %v461_v19, %v493_v27  ;;  %vm475_vm14 = vcmp.gt.f32.partialorder %v459_v25, 0.0  ;;  %vm479_vm15 = vcmp.gt.f32.partialorder %v463_v21, 0.0 }
  0xbd   : > { %861 = vmatpush1.bf16.msra.mxu1 %v860_v51  ;;  %v856_v47 = vpack.c.bf16 %v509_v54, %v505_v53  ;;  %v507_v55 = vsel %vm475_vm14, %v459_v25, %v491_v35  ;;  %v511_v56 = vsel %vm479_vm15, %v463_v21, %v495_v29  ;;  %vm518_vm0 = vcmask 261120  }
  0xbe   : > { %863 = vmatprep.subr.bf16.mxu1 %v862_v52  ;;  %v864_v57 = vpack.c.bf16 %v511_v56, %v507_v55 }
  0xbf   : > { %857 = vmatpush1.bf16.msra.mxu0 %v856_v47 }
  0xc1   : > { %865 = vmatpush1.bf16.msra.mxu1 %v864_v57 }
  0xc2   : > { %846 = vmatmul.mubr.msk.f32.vlgmr.msra.gmra.mrb[0].mxu0 %vm518_vm0, %v517_v58 }
  0xc4   : > { %847 = vmatmul.mubr.msk.f32.vlgmr.msra.gmra.mrb[0].mxu1 %vm518_vm0, %v517_v58 }
 0x195   : > { %v588_v59 = vpop.f32.mrb[0].mxu0 }
 0x196   : > { %926 = vtanh.f32 %v588_v59  ;;  %v590_v60 = vpop.f32.mrb[1].mxu0 }
 0x197   : > { %v659_v61 = vpop.f32.mrb[0].mxu1  ;;  %928 = vtanh.f32 %v590_v60 }
 0x198   : > { %930 = vtanh.f32 %v659_v61  ;;  %v661_v62 = vpop.f32.mrb[1].mxu1 }
 0x199   : > { %932 = vtanh.f32 %v661_v62 }
 0x1a0   : > { %v927_v63 = vpop.eup %926 }
 0x1a1   : > { %v929_v0 = vpop.eup %928  ;;  %683 = vst [vmem:[%s359_s9] sm:$0xff] %v927_v63 }
 0x1a2   : > { %v931_v1 = vpop.eup %930  ;;  %684 = vst [vmem:[%s359_s9 + $0x8] sm:$0xff] %v929_v0 }
 0x1a3   : > { %v933_v2 = vpop.eup %932  ;;  %685 = vst [vmem:[%s359_s9 + $0x10] sm:$0xff] %v931_v1 }
 0x1a4   : > { %686 = vst [vmem:[%s359_s9 + $0x18] sm:$0xff] %v933_v2 }
 0x1a5 PF: > { %s14_s21 = sadd.s32 1, %s988_s21   ;;  %s1192_s15 = smov %s968_s16 }
 0x1a6   : > { %p11_p12 = scmp.ge.s32.totalorder %s14_s21, 66   ;;  %s1193_s16 = smov %s1068_s28 }
 0x1a7   : > { %s1194_s17 = smov %s980_s19  ;;  %s1195_s18 = smov %s984_s20 }
 0x1a8   : > { %s1196_s19 = smov %s1199_s22  ;;  %s1197_s20 = smov %s1203_s23 }
 0x1a9   :  { %13 = sbr.rel (!%p11_p12) target bundleno = 4 (0x4), region = 111 }

</bundles_post_ra>
